<compile_context>
chip_gen: v7x
topology: tpu7x:2x2x1
jax: 0.10.0
libtpu: 0.0.40
codegen_flags: <defaults>
</compile_context>

<pallas_src>
import functools

import jax
import jax.numpy as jnp
from jax import lax
from jax.experimental import pallas as pl
from jax.experimental.pallas import tpu as pltpu

SELU_ALPHA = 1.6732632423543772
SELU_SCALE = 1.0507009873554805
BN_EPS = 1e-5


def _sigmoid(x):
    # Exact, overflow-free sigmoid that lowers to the EUP tanh unit.
    return 0.5 * (jnp.tanh(0.5 * x) + 1.0)


def _selu(x):
    return SELU_SCALE * jnp.where(x > 0, x, SELU_ALPHA * (jnp.exp(x) - 1.0))


def _gru_direction(x_rows, wi, bi, wh, bh, *, T, B, H, reverse):
    """One GRU direction, unrolled over T steps.

    x_rows: (T*B, Din) time-major flattened input (rows t*B:(t+1)*B belong to step t).
    Gate column order in wi/wh/bi/bh is [r | z | n] (PyTorch order).
    Returns a list of T hidden states (B, H) indexed by absolute time t.
    """
    # Hoisted input projection: off the recurrence critical path.
    p_in = jnp.dot(x_rows, wi, preferred_element_type=jnp.float32) + bi   # (T*B, 3H)

    h = jnp.zeros((B, H), jnp.float32)
    outs = [None] * T
    order = range(T - 1, -1, -1) if reverse else range(T)
    for t in order:
        p_i = p_in[t * B:(t + 1) * B]                                     # (B, 3H)
        p_h = jnp.dot(h, wh, preferred_element_type=jnp.float32) + bh     # (B, 3H)
        r = _sigmoid(p_i[:, 0:H] + p_h[:, 0:H])
        z = _sigmoid(p_i[:, H:2 * H] + p_h[:, H:2 * H])
        n = jnp.tanh(p_i[:, 2 * H:3 * H] + r * p_h[:, 2 * H:3 * H])
        h = (1.0 - z) * n + z * h
        outs[t] = h
    return outs


def birnn_kernel(ids_ref, emb_ref,
                 wi0f_ref, bi0f_ref, wh0f_ref, bh0f_ref,
                 wi0b_ref, bi0b_ref, wh0b_ref, bh0b_ref,
                 wi1f_ref, bi1f_ref, wh1f_ref, bh1f_ref,
                 wi1b_ref, bi1b_ref, wh1b_ref, bh1b_ref,
                 w1_ref, b1_ref, s1_ref, t1_ref,
                 w2_ref, b2_ref, s2_ref, t2_ref,
                 w3_ref, b3_ref,
                 out_ref, *, T, B):
    H = wh0f_ref.shape[0]
    V = emb_ref.shape[0]

    # ---- embedding gather as a one-hot matmul (time-major (T*B, E) directly) ----
    ids = ids_ref[...]                                                    # (T*B, 1) int32
    onehot = (ids == lax.broadcasted_iota(jnp.int32, (T * B, V), 1)).astype(jnp.float32)
    x0 = jnp.dot(onehot, emb_ref[...], preferred_element_type=jnp.float32)  # (T*B, E)

    # ---- GRU layer 0 (bidirectional) ----
    f0 = _gru_direction(x0, wi0f_ref[...], bi0f_ref[...], wh0f_ref[...], bh0f_ref[...],
                        T=T, B=B, H=H, reverse=False)
    b0 = _gru_direction(x0, wi0b_ref[...], bi0b_ref[...], wh0b_ref[...], bh0b_ref[...],
                        T=T, B=B, H=H, reverse=True)
    x1 = jnp.concatenate(
        [jnp.concatenate(f0, axis=0), jnp.concatenate(b0, axis=0)], axis=-1)  # (T*B, 2H)

    # ---- GRU layer 1 (bidirectional) ----
    f1 = _gru_direction(x1, wi1f_ref[...], bi1f_ref[...], wh1f_ref[...], bh1f_ref[...],
                        T=T, B=B, H=H, reverse=False)
    b1 = _gru_direction(x1, wi1b_ref[...], bi1b_ref[...], wh1b_ref[...], bh1b_ref[...],
                        T=T, B=B, H=H, reverse=True)

    # output[:, -1, :] of the batch-first bidirectional GRU == [fwd(T-1) | bwd at t=T-1]
    feat = jnp.concatenate([f1[T - 1], b1[T - 1]], axis=-1)               # (B, 2H)

    # ---- classifier: Linear -> BN(eval) -> SELU -> Linear -> BN -> SELU -> Linear -> Sigmoid
    h = jnp.dot(feat, w1_ref[...], preferred_element_type=jnp.float32) + b1_ref[...]
    h = _selu(h * s1_ref[...] + t1_ref[...])
    h = jnp.dot(h, w2_ref[...], preferred_element_type=jnp.float32) + b2_ref[...]
    h = _selu(h * s2_ref[...] + t2_ref[...])
    h = jnp.dot(h, w3_ref[...], preferred_element_type=jnp.float32) + b3_ref[...]
    out_ref[...] = _sigmoid(h)


@functools.partial(jax.jit, static_argnames=("num_layers",))
def birnn_forward(token_ids, params, num_layers=2):
    assert num_layers == 2, "fused kernel is specialized for num_layers=2"
    B, T = token_ids.shape
    # Time-major flat ids (tiny int preprocessing; everything else is in-kernel).
    ids_tm = token_ids.T.reshape(T * B, 1).astype(jnp.int32)

    g0f, g0b = params["gru"][0]["fwd"], params["gru"][0]["bwd"]
    g1f, g1b = params["gru"][1]["fwd"], params["gru"][1]["bwd"]
    c = params["cls"]
    inputs = (ids_tm, params["embedding"],
              g0f["wi"], g0f["bi"], g0f["wh"], g0f["bh"],
              g0b["wi"], g0b["bi"], g0b["wh"], g0b["bh"],
              g1f["wi"], g1f["bi"], g1f["wh"], g1f["bh"],
              g1b["wi"], g1b["bi"], g1b["wh"], g1b["bh"],
              c["w1"], c["b1"], c["s1"], c["t1"],
              c["w2"], c["b2"], c["s2"], c["t2"],
              c["w3"], c["b3"])

    kernel = functools.partial(birnn_kernel, T=T, B=B)
    return pl.pallas_call(
        kernel,
        out_shape=jax.ShapeDtypeStruct((B, 2), jnp.float32),
        in_specs=[pl.BlockSpec(memory_space=pltpu.MemorySpace.VMEM)] * len(inputs),
        out_specs=pl.BlockSpec(memory_space=pltpu.MemorySpace.VMEM),
    )(*inputs)


# --------------------------------------------------------------------------
# Pure-JAX reference (for correctness check of the Pallas lowering).
# --------------------------------------------------------------------------
def gru_layer_ref(x_tm, p):
    H = p["wh"].shape[0]
    B = x_tm.shape[1]

    def step(h, x_t):
        gi = x_t @ p["wi"] + p["bi"]
        gh = h @ p["wh"] + p["bh"]
        r = jax.nn.sigmoid(gi[:, :H] + gh[:, :H])
        z = jax.nn.sigmoid(gi[:, H:2 * H] + gh[:, H:2 * H])
        n = jnp.tanh(gi[:, 2 * H:] + r * gh[:, 2 * H:])
        h_new = (1.0 - z) * n + z * h
        return h_new, h_new

    _, ys = lax.scan(step, jnp.zeros((B, H), jnp.float32), x_tm)
    return ys


def birnn_forward_ref(token_ids, params, num_layers=2):
    emb = jnp.take(params["embedding"], token_ids, axis=0)
    x = jnp.transpose(emb, (1, 0, 2)).astype(jnp.float32)
    for layer in range(num_layers):
        fwd = gru_layer_ref(x, params["gru"][layer]["fwd"])
        bwd = jnp.flip(gru_layer_ref(jnp.flip(x, axis=0), params["gru"][layer]["bwd"]), axis=0)
        x = jnp.concatenate([fwd, bwd], axis=-1)
    h = x[-1]
    p = params["cls"]
    h = _selu((h @ p["w1"] + p["b1"]) * p["s1"] + p["t1"])
    h = _selu((h @ p["w2"] + p["b2"]) * p["s2"] + p["t2"])
    return jax.nn.sigmoid(h @ p["w3"] + p["b3"])


# --------------------------------------------------------------------------
# Deterministic parameter construction (mirrors PyTorch module's shapes).
# --------------------------------------------------------------------------
def make_gru_dir_params(key, d_in, H):
    ks = jax.random.split(key, 4)
    k = 1.0 / jnp.sqrt(jnp.float32(H))
    w_ih = jax.random.uniform(ks[0], (3 * H, d_in), jnp.float32, -k, k)   # rows [r; z; n]
    w_hh = jax.random.uniform(ks[1], (3 * H, H), jnp.float32, -k, k)
    b_ih = jax.random.uniform(ks[2], (3 * H,), jnp.float32, -k, k)
    b_hh = jax.random.uniform(ks[3], (3 * H,), jnp.float32, -k, k)
    return {
        "wi": w_ih.T,                   # (d_in, 3H), column blocks [r|z|n]
        "wh": w_hh.T,                   # (H, 3H)
        "bi": b_ih.reshape(1, 3 * H),
        "bh": b_hh.reshape(1, 3 * H),
    }


def make_linear(key, d_in, d_out):
    k1, k2 = jax.random.split(key)
    k = 1.0 / jnp.sqrt(jnp.float32(d_in))
    w = jax.random.uniform(k1, (d_out, d_in), jnp.float32, -k, k)
    b = jax.random.uniform(k2, (d_out,), jnp.float32, -k, k)
    return w.T, b.reshape(1, d_out)


def make_bn(key, d):
    k1, k2 = jax.random.split(key)
    gamma = jax.random.uniform(k1, (d,), jnp.float32, 0.5, 1.5)
    beta = 0.1 * jax.random.normal(k2, (d,), jnp.float32)
    # eval-mode BN with running_mean=0, running_var=1 folded into scale/shift
    scale = gamma / jnp.sqrt(1.0 + BN_EPS)
    return scale.reshape(1, d), beta.reshape(1, d)


def make_params(key, vocab, E, H, num_layers):
    keys = jax.random.split(key, 2 + 2 * num_layers + 5)
    params = {"embedding": jax.random.normal(keys[0], (vocab, E), jnp.float32)}

    gru = []
    kidx = 1
    d_in = E
    for _ in range(num_layers):
        fwd = make_gru_dir_params(keys[kidx], d_in, H)
        bwd = make_gru_dir_params(keys[kidx + 1], d_in, H)
        kidx += 2
        gru.append({"fwd": fwd, "bwd": bwd})
        d_in = 2 * H
    params["gru"] = gru

    w1, b1 = make_linear(keys[kidx], 2 * H, 128)
    s1, t1 = make_bn(keys[kidx + 1], 128)
    w2, b2 = make_linear(keys[kidx + 2], 128, 16)
    s2, t2 = make_bn(keys[kidx + 3], 16)
    w3, b3 = make_linear(keys[kidx + 4], 16, 2)
    params["cls"] = {"w1": w1, "b1": b1, "s1": s1, "t1": t1,
                     "w2": w2, "b2": b2, "s2": s2, "t2": t2,
                     "w3": w3, "b3": b3}
    return params


if __name__ == "__main__":
    # Small shapes: batch=2, seq=8, vocab=50, embedding_dim=32, hidden_dim=32, num_layers=2.
    B, T, VOCAB, E, H, NUM_LAYERS = 2, 8, 50, 32, 32, 2

    root = jax.random.PRNGKey(0)
    k_params, k_tokens = jax.random.split(root)
    params = make_params(k_params, VOCAB, E, H, NUM_LAYERS)
    token_ids = jax.random.randint(k_tokens, (B, T), 0, VOCAB, dtype=jnp.int32)

    out = birnn_forward(token_ids, params, num_layers=NUM_LAYERS)
    out = jax.block_until_ready(out)

    ref = birnn_forward_ref(token_ids, params, num_layers=NUM_LAYERS)
    assert out.shape == (B, 2) and out.dtype == jnp.float32
    assert jnp.allclose(out, ref, rtol=1e-4, atol=1e-4), (out, ref)

    # TODO(synk): training-mode dropout / batch-stat BatchNorm are intentionally
    # not modeled (inference semantics only).
    print("KERNEL_OK")
</pallas_src>

<mosaic_0001>
module attributes {stable_mosaic.version = 11 : i64} {
  func.func @birnn_kernel(%arg0: memref<16x1xi32, #tpu.memory_space<vmem>>, %arg1: memref<50x32xf32, #tpu.memory_space<vmem>>, %arg2: memref<32x96xf32, #tpu.memory_space<vmem>>, %arg3: memref<1x96xf32, #tpu.memory_space<vmem>>, %arg4: memref<32x96xf32, #tpu.memory_space<vmem>>, %arg5: memref<1x96xf32, #tpu.memory_space<vmem>>, %arg6: memref<32x96xf32, #tpu.memory_space<vmem>>, %arg7: memref<1x96xf32, #tpu.memory_space<vmem>>, %arg8: memref<32x96xf32, #tpu.memory_space<vmem>>, %arg9: memref<1x96xf32, #tpu.memory_space<vmem>>, %arg10: memref<64x96xf32, #tpu.memory_space<vmem>>, %arg11: memref<1x96xf32, #tpu.memory_space<vmem>>, %arg12: memref<32x96xf32, #tpu.memory_space<vmem>>, %arg13: memref<1x96xf32, #tpu.memory_space<vmem>>, %arg14: memref<64x96xf32, #tpu.memory_space<vmem>>, %arg15: memref<1x96xf32, #tpu.memory_space<vmem>>, %arg16: memref<32x96xf32, #tpu.memory_space<vmem>>, %arg17: memref<1x96xf32, #tpu.memory_space<vmem>>, %arg18: memref<64x128xf32, #tpu.memory_space<vmem>>, %arg19: memref<1x128xf32, #tpu.memory_space<vmem>>, %arg20: memref<1x128xf32, #tpu.memory_space<vmem>>, %arg21: memref<1x128xf32, #tpu.memory_space<vmem>>, %arg22: memref<128x16xf32, #tpu.memory_space<vmem>>, %arg23: memref<1x16xf32, #tpu.memory_space<vmem>>, %arg24: memref<1x16xf32, #tpu.memory_space<vmem>>, %arg25: memref<1x16xf32, #tpu.memory_space<vmem>>, %arg26: memref<16x2xf32, #tpu.memory_space<vmem>>, %arg27: memref<1x2xf32, #tpu.memory_space<vmem>>, %arg28: memref<2x2xf32, #tpu.memory_space<vmem>>) attributes {dimension_semantics = [], scalar_prefetch = 0 : i64, scratch_operands = 0 : i64, tpu.core_type = #tpu.core_type<tc>} {
    %c0 = arith.constant 0 : index
    %c0_0 = arith.constant 0 : index
    %0 = vector.load %arg0[%c0, %c0_0] : memref<16x1xi32, #tpu.memory_space<vmem>>, vector<16x1xi32>
    %1 = tpu.iota {dimensions = array<i32: 1>} : vector<16x50xi32>
    %2 = vector.broadcast %0 : vector<16x1xi32> to vector<16x50xi32>
    %3 = arith.cmpi eq, %2, %1 : vector<16x50xi32>
    %4 = arith.extui %3 : vector<16x50xi1> to vector<16x50xi32>
    %5 = arith.sitofp %4 : vector<16x50xi32> to vector<16x50xf32>
    %c0_1 = arith.constant 0 : index
    %c0_2 = arith.constant 0 : index
    %6 = vector.load %arg1[%c0_1, %c0_2] : memref<50x32xf32, #tpu.memory_space<vmem>>, vector<50x32xf32>
    %cst = arith.constant dense<0.000000e+00> : vector<16x32xf32>
    %7 = tpu.matmul %5, %6, %cst {dimension_numbers = #tpu.dot_dimension_numbers<[1], [0], [0], [1], [0, 0, 1, 1], [], []>} : vector<16x50xf32>, vector<50x32xf32>, vector<16x32xf32> -> vector<16x32xf32>
    %c0_3 = arith.constant 0 : index
    %c0_4 = arith.constant 0 : index
    %8 = vector.load %arg2[%c0_3, %c0_4] : memref<32x96xf32, #tpu.memory_space<vmem>>, vector<32x96xf32>
    %c0_5 = arith.constant 0 : index
    %c0_6 = arith.constant 0 : index
    %9 = vector.load %arg3[%c0_5, %c0_6] : memref<1x96xf32, #tpu.memory_space<vmem>>, vector<1x96xf32>
    %c0_7 = arith.constant 0 : index
    %c0_8 = arith.constant 0 : index
    %10 = vector.load %arg4[%c0_7, %c0_8] : memref<32x96xf32, #tpu.memory_space<vmem>>, vector<32x96xf32>
    %c0_9 = arith.constant 0 : index
    %c0_10 = arith.constant 0 : index
    %11 = vector.load %arg5[%c0_9, %c0_10] : memref<1x96xf32, #tpu.memory_space<vmem>>, vector<1x96xf32>
    %cst_11 = arith.constant dense<0.000000e+00> : vector<16x96xf32>
    %12 = tpu.matmul %7, %8, %cst_11 {dimension_numbers = #tpu.dot_dimension_numbers<[1], [0], [0], [1], [0, 0, 1, 1], [], []>} : vector<16x32xf32>, vector<32x96xf32>, vector<16x96xf32> -> vector<16x96xf32>
    %13 = vector.broadcast %9 : vector<1x96xf32> to vector<16x96xf32>
    %14 = arith.addf %12, %13 : vector<16x96xf32>
    %cst_12 = arith.constant 0.000000e+00 : f32
    %15 = vector.broadcast %cst_12 : f32 to vector<2x32xf32>
    %16 = vector.extract_strided_slice %14 {offsets = [0, 0], sizes = [2, 96], strides = [1, 1]} : vector<16x96xf32> to vector<2x96xf32>
    %cst_13 = arith.constant dense<0.000000e+00> : vector<2x96xf32>
    %17 = tpu.matmul %15, %10, %cst_13 {dimension_numbers = #tpu.dot_dimension_numbers<[1], [0], [0], [1], [0, 0, 1, 1], [], []>} : vector<2x32xf32>, vector<32x96xf32>, vector<2x96xf32> -> vector<2x96xf32>
    %18 = vector.broadcast %11 : vector<1x96xf32> to vector<2x96xf32>
    %19 = arith.addf %17, %18 : vector<2x96xf32>
    %20 = vector.extract_strided_slice %16 {offsets = [0, 0], sizes = [2, 32], strides = [1, 1]} : vector<2x96xf32> to vector<2x32xf32>
    %21 = vector.extract_strided_slice %19 {offsets = [0, 0], sizes = [2, 32], strides = [1, 1]} : vector<2x96xf32> to vector<2x32xf32>
    %22 = arith.addf %20, %21 : vector<2x32xf32>
    %cst_14 = arith.constant 5.000000e-01 : f32
    %23 = vector.broadcast %cst_14 : f32 to vector<2x32xf32>
    %24 = arith.mulf %23, %22 : vector<2x32xf32>
    %25 = math.tanh %24 : vector<2x32xf32>
    %cst_15 = arith.constant 1.000000e+00 : f32
    %26 = vector.broadcast %cst_15 : f32 to vector<2x32xf32>
    %27 = arith.addf %25, %26 : vector<2x32xf32>
    %cst_16 = arith.constant 5.000000e-01 : f32
    %28 = vector.broadcast %cst_16 : f32 to vector<2x32xf32>
    %29 = arith.mulf %28, %27 : vector<2x32xf32>
    %30 = vector.extract_strided_slice %16 {offsets = [0, 32], sizes = [2, 32], strides = [1, 1]} : vector<2x96xf32> to vector<2x32xf32>
    %31 = vector.extract_strided_slice %19 {offsets = [0, 32], sizes = [2, 32], strides = [1, 1]} : vector<2x96xf32> to vector<2x32xf32>
    %32 = arith.addf %30, %31 : vector<2x32xf32>
    %cst_17 = arith.constant 5.000000e-01 : f32
    %33 = vector.broadcast %cst_17 : f32 to vector<2x32xf32>
    %34 = arith.mulf %33, %32 : vector<2x32xf32>
    %35 = math.tanh %34 : vector<2x32xf32>
    %cst_18 = arith.constant 1.000000e+00 : f32
    %36 = vector.broadcast %cst_18 : f32 to vector<2x32xf32>
    %37 = arith.addf %35, %36 : vector<2x32xf32>
    %cst_19 = arith.constant 5.000000e-01 : f32
    %38 = vector.broadcast %cst_19 : f32 to vector<2x32xf32>
    %39 = arith.mulf %38, %37 : vector<2x32xf32>
    %40 = vector.extract_strided_slice %16 {offsets = [0, 64], sizes = [2, 32], strides = [1, 1]} : vector<2x96xf32> to vector<2x32xf32>
    %41 = vector.extract_strided_slice %19 {offsets = [0, 64], sizes = [2, 32], strides = [1, 1]} : vector<2x96xf32> to vector<2x32xf32>
    %42 = arith.mulf %29, %41 : vector<2x32xf32>
    %43 = arith.addf %40, %42 : vector<2x32xf32>
    %44 = math.tanh %43 : vector<2x32xf32>
    %cst_20 = arith.constant 1.000000e+00 : f32
    %45 = vector.broadcast %cst_20 : f32 to vector<2x32xf32>
    %46 = arith.subf %45, %39 : vector<2x32xf32>
    %47 = arith.mulf %46, %44 : vector<2x32xf32>
    %48 = arith.mulf %39, %15 : vector<2x32xf32>
    %49 = arith.addf %47, %48 : vector<2x32xf32>
    %50 = vector.extract_strided_slice %14 {offsets = [2, 0], sizes = [2, 96], strides = [1, 1]} : vector<16x96xf32> to vector<2x96xf32>
    %cst_21 = arith.constant dense<0.000000e+00> : vector<2x96xf32>
    %51 = tpu.matmul %49, %10, %cst_21 {dimension_numbers = #tpu.dot_dimension_numbers<[1], [0], [0], [1], [0, 0, 1, 1], [], []>} : vector<2x32xf32>, vector<32x96xf32>, vector<2x96xf32> -> vector<2x96xf32>
    %52 = vector.broadcast %11 : vector<1x96xf32> to vector<2x96xf32>
    %53 = arith.addf %51, %52 : vector<2x96xf32>
    %54 = vector.extract_strided_slice %50 {offsets = [0, 0], sizes = [2, 32], strides = [1, 1]} : vector<2x96xf32> to vector<2x32xf32>
    %55 = vector.extract_strided_slice %53 {offsets = [0, 0], sizes = [2, 32], strides = [1, 1]} : vector<2x96xf32> to vector<2x32xf32>
    %56 = arith.addf %54, %55 : vector<2x32xf32>
    %cst_22 = arith.constant 5.000000e-01 : f32
    %57 = vector.broadcast %cst_22 : f32 to vector<2x32xf32>
    %58 = arith.mulf %57, %56 : vector<2x32xf32>
    %59 = math.tanh %58 : vector<2x32xf32>
    %cst_23 = arith.constant 1.000000e+00 : f32
    %60 = vector.broadcast %cst_23 : f32 to vector<2x32xf32>
    %61 = arith.addf %59, %60 : vector<2x32xf32>
    %cst_24 = arith.constant 5.000000e-01 : f32
    %62 = vector.broadcast %cst_24 : f32 to vector<2x32xf32>
    %63 = arith.mulf %62, %61 : vector<2x32xf32>
    %64 = vector.extract_strided_slice %50 {offsets = [0, 32], sizes = [2, 32], strides = [1, 1]} : vector<2x96xf32> to vector<2x32xf32>
    %65 = vector.extract_strided_slice %53 {offsets = [0, 32], sizes = [2, 32], strides = [1, 1]} : vector<2x96xf32> to vector<2x32xf32>
    %66 = arith.addf %64, %65 : vector<2x32xf32>
    %cst_25 = arith.constant 5.000000e-01 : f32
    %67 = vector.broadcast %cst_25 : f32 to vector<2x32xf32>
    %68 = arith.mulf %67, %66 : vector<2x32xf32>
    %69 = math.tanh %68 : vector<2x32xf32>
    %cst_26 = arith.constant 1.000000e+00 : f32
    %70 = vector.broadcast %cst_26 : f32 to vector<2x32xf32>
    %71 = arith.addf %69, %70 : vector<2x32xf32>
    %cst_27 = arith.constant 5.000000e-01 : f32
    %72 = vector.broadcast %cst_27 : f32 to vector<2x32xf32>
    %73 = arith.mulf %72, %71 : vector<2x32xf32>
    %74 = vector.extract_strided_slice %50 {offsets = [0, 64], sizes = [2, 32], strides = [1, 1]} : vector<2x96xf32> to vector<2x32xf32>
    %75 = vector.extract_strided_slice %53 {offsets = [0, 64], sizes = [2, 32], strides = [1, 1]} : vector<2x96xf32> to vector<2x32xf32>
    %76 = arith.mulf %63, %75 : vector<2x32xf32>
    %77 = arith.addf %74, %76 : vector<2x32xf32>
    %78 = math.tanh %77 : vector<2x32xf32>
    %cst_28 = arith.constant 1.000000e+00 : f32
    %79 = vector.broadcast %cst_28 : f32 to vector<2x32xf32>
    %80 = arith.subf %79, %73 : vector<2x32xf32>
    %81 = arith.mulf %80, %78 : vector<2x32xf32>
    %82 = arith.mulf %73, %49 : vector<2x32xf32>
    %83 = arith.addf %81, %82 : vector<2x32xf32>
    %84 = vector.extract_strided_slice %14 {offsets = [4, 0], sizes = [2, 96], strides = [1, 1]} : vector<16x96xf32> to vector<2x96xf32>
    %cst_29 = arith.constant dense<0.000000e+00> : vector<2x96xf32>
    %85 = tpu.matmul %83, %10, %cst_29 {dimension_numbers = #tpu.dot_dimension_numbers<[1], [0], [0], [1], [0, 0, 1, 1], [], []>} : vector<2x32xf32>, vector<32x96xf32>, vector<2x96xf32> -> vector<2x96xf32>
    %86 = vector.broadcast %11 : vector<1x96xf32> to vector<2x96xf32>
    %87 = arith.addf %85, %86 : vector<2x96xf32>
    %88 = vector.extract_strided_slice %84 {offsets = [0, 0], sizes = [2, 32], strides = [1, 1]} : vector<2x96xf32> to vector<2x32xf32>
    %89 = vector.extract_strided_slice %87 {offsets = [0, 0], sizes = [2, 32], strides = [1, 1]} : vector<2x96xf32> to vector<2x32xf32>
    %90 = arith.addf %88, %89 : vector<2x32xf32>
    %cst_30 = arith.constant 5.000000e-01 : f32
    %91 = vector.broadcast %cst_30 : f32 to vector<2x32xf32>
    %92 = arith.mulf %91, %90 : vector<2x32xf32>
    %93 = math.tanh %92 : vector<2x32xf32>
    %cst_31 = arith.constant 1.000000e+00 : f32
    %94 = vector.broadcast %cst_31 : f32 to vector<2x32xf32>
    %95 = arith.addf %93, %94 : vector<2x32xf32>
    %cst_32 = arith.constant 5.000000e-01 : f32
    %96 = vector.broadcast %cst_32 : f32 to vector<2x32xf32>
    %97 = arith.mulf %96, %95 : vector<2x32xf32>
    %98 = vector.extract_strided_slice %84 {offsets = [0, 32], sizes = [2, 32], strides = [1, 1]} : vector<2x96xf32> to vector<2x32xf32>
    %99 = vector.extract_strided_slice %87 {offsets = [0, 32], sizes = [2, 32], strides = [1, 1]} : vector<2x96xf32> to vector<2x32xf32>
    %100 = arith.addf %98, %99 : vector<2x32xf32>
    %cst_33 = arith.constant 5.000000e-01 : f32
    %101 = vector.broadcast %cst_33 : f32 to vector<2x32xf32>
    %102 = arith.mulf %101, %100 : vector<2x32xf32>
    %103 = math.tanh %102 : vector<2x32xf32>
    %cst_34 = arith.constant 1.000000e+00 : f32
    %104 = vector.broadcast %cst_34 : f32 to vector<2x32xf32>
    %105 = arith.addf %103, %104 : vector<2x32xf32>
    %cst_35 = arith.constant 5.000000e-01 : f32
    %106 = vector.broadcast %cst_35 : f32 to vector<2x32xf32>
    %107 = arith.mulf %106, %105 : vector<2x32xf32>
    %108 = vector.extract_strided_slice %84 {offsets = [0, 64], sizes = [2, 32], strides = [1, 1]} : vector<2x96xf32> to vector<2x32xf32>
    %109 = vector.extract_strided_slice %87 {offsets = [0, 64], sizes = [2, 32], strides = [1, 1]} : vector<2x96xf32> to vector<2x32xf32>
    %110 = arith.mulf %97, %109 : vector<2x32xf32>
    %111 = arith.addf %108, %110 : vector<2x32xf32>
    %112 = math.tanh %111 : vector<2x32xf32>
    %cst_36 = arith.constant 1.000000e+00 : f32
    %113 = vector.broadcast %cst_36 : f32 to vector<2x32xf32>
    %114 = arith.subf %113, %107 : vector<2x32xf32>
    %115 = arith.mulf %114, %112 : vector<2x32xf32>
    %116 = arith.mulf %107, %83 : vector<2x32xf32>
    %117 = arith.addf %115, %116 : vector<2x32xf32>
    %118 = vector.extract_strided_slice %14 {offsets = [6, 0], sizes = [2, 96], strides = [1, 1]} : vector<16x96xf32> to vector<2x96xf32>
    %cst_37 = arith.constant dense<0.000000e+00> : vector<2x96xf32>
    %119 = tpu.matmul %117, %10, %cst_37 {dimension_numbers = #tpu.dot_dimension_numbers<[1], [0], [0], [1], [0, 0, 1, 1], [], []>} : vector<2x32xf32>, vector<32x96xf32>, vector<2x96xf32> -> vector<2x96xf32>
    %120 = vector.broadcast %11 : vector<1x96xf32> to vector<2x96xf32>
    %121 = arith.addf %119, %120 : vector<2x96xf32>
    %122 = vector.extract_strided_slice %118 {offsets = [0, 0], sizes = [2, 32], strides = [1, 1]} : vector<2x96xf32> to vector<2x32xf32>
    %123 = vector.extract_strided_slice %121 {offsets = [0, 0], sizes = [2, 32], strides = [1, 1]} : vector<2x96xf32> to vector<2x32xf32>
    %124 = arith.addf %122, %123 : vector<2x32xf32>
    %cst_38 = arith.constant 5.000000e-01 : f32
    %125 = vector.broadcast %cst_38 : f32 to vector<2x32xf32>
    %126 = arith.mulf %125, %124 : vector<2x32xf32>
    %127 = math.tanh %126 : vector<2x32xf32>
    %cst_39 = arith.constant 1.000000e+00 : f32
    %128 = vector.broadcast %cst_39 : f32 to vector<2x32xf32>
    %129 = arith.addf %127, %128 : vector<2x32xf32>
    %cst_40 = arith.constant 5.000000e-01 : f32
    %130 = vector.broadcast %cst_40 : f32 to vector<2x32xf32>
    %131 = arith.mulf %130, %129 : vector<2x32xf32>
    %132 = vector.extract_strided_slice %118 {offsets = [0, 32], sizes = [2, 32], strides = [1, 1]} : vector<2x96xf32> to vector<2x32xf32>
    %133 = vector.extract_strided_slice %121 {offsets = [0, 32], sizes = [2, 32], strides = [1, 1]} : vector<2x96xf32> to vector<2x32xf32>
    %134 = arith.addf %132, %133 : vector<2x32xf32>
    %cst_41 = arith.constant 5.000000e-01 : f32
    %135 = vector.broadcast %cst_41 : f32 to vector<2x32xf32>
    %136 = arith.mulf %135, %134 : vector<2x32xf32>
    %137 = math.tanh %136 : vector<2x32xf32>
    %cst_42 = arith.constant 1.000000e+00 : f32
    %138 = vector.broadcast %cst_42 : f32 to vector<2x32xf32>
    %139 = arith.addf %137, %138 : vector<2x32xf32>
    %cst_43 = arith.constant 5.000000e-01 : f32
    %140 = vector.broadcast %cst_43 : f32 to vector<2x32xf32>
    %141 = arith.mulf %140, %139 : vector<2x32xf32>
    %142 = vector.extract_strided_slice %118 {offsets = [0, 64], sizes = [2, 32], strides = [1, 1]} : vector<2x96xf32> to vector<2x32xf32>
    %143 = vector.extract_strided_slice %121 {offsets = [0, 64], sizes = [2, 32], strides = [1, 1]} : vector<2x96xf32> to vector<2x32xf32>
    %144 = arith.mulf %131, %143 : vector<2x32xf32>
    %145 = arith.addf %142, %144 : vector<2x32xf32>
    %146 = math.tanh %145 : vector<2x32xf32>
    %cst_44 = arith.constant 1.000000e+00 : f32
    %147 = vector.broadcast %cst_44 : f32 to vector<2x32xf32>
    %148 = arith.subf %147, %141 : vector<2x32xf32>
    %149 = arith.mulf %148, %146 : vector<2x32xf32>
    %150 = arith.mulf %141, %117 : vector<2x32xf32>
    %151 = arith.addf %149, %150 : vector<2x32xf32>
    %152 = vector.extract_strided_slice %14 {offsets = [8, 0], sizes = [2, 96], strides = [1, 1]} : vector<16x96xf32> to vector<2x96xf32>
    %cst_45 = arith.constant dense<0.000000e+00> : vector<2x96xf32>
    %153 = tpu.matmul %151, %10, %cst_45 {dimension_numbers = #tpu.dot_dimension_numbers<[1], [0], [0], [1], [0, 0, 1, 1], [], []>} : vector<2x32xf32>, vector<32x96xf32>, vector<2x96xf32> -> vector<2x96xf32>
    %154 = vector.broadcast %11 : vector<1x96xf32> to vector<2x96xf32>
    %155 = arith.addf %153, %154 : vector<2x96xf32>
    %156 = vector.extract_strided_slice %152 {offsets = [0, 0], sizes = [2, 32], strides = [1, 1]} : vector<2x96xf32> to vector<2x32xf32>
    %157 = vector.extract_strided_slice %155 {offsets = [0, 0], sizes = [2, 32], strides = [1, 1]} : vector<2x96xf32> to vector<2x32xf32>
    %158 = arith.addf %156, %157 : vector<2x32xf32>
    %cst_46 = arith.constant 5.000000e-01 : f32
    %159 = vector.broadcast %cst_46 : f32 to vector<2x32xf32>
    %160 = arith.mulf %159, %158 : vector<2x32xf32>
    %161 = math.tanh %160 : vector<2x32xf32>
    %cst_47 = arith.constant 1.000000e+00 : f32
    %162 = vector.broadcast %cst_47 : f32 to vector<2x32xf32>
    %163 = arith.addf %161, %162 : vector<2x32xf32>
    %cst_48 = arith.constant 5.000000e-01 : f32
    %164 = vector.broadcast %cst_48 : f32 to vector<2x32xf32>
    %165 = arith.mulf %164, %163 : vector<2x32xf32>
    %166 = vector.extract_strided_slice %152 {offsets = [0, 32], sizes = [2, 32], strides = [1, 1]} : vector<2x96xf32> to vector<2x32xf32>
    %167 = vector.extract_strided_slice %155 {offsets = [0, 32], sizes = [2, 32], strides = [1, 1]} : vector<2x96xf32> to vector<2x32xf32>
    %168 = arith.addf %166, %167 : vector<2x32xf32>
    %cst_49 = arith.constant 5.000000e-01 : f32
    %169 = vector.broadcast %cst_49 : f32 to vector<2x32xf32>
    %170 = arith.mulf %169, %168 : vector<2x32xf32>
    %171 = math.tanh %170 : vector<2x32xf32>
    %cst_50 = arith.constant 1.000000e+00 : f32
    %172 = vector.broadcast %cst_50 : f32 to vector<2x32xf32>
    %173 = arith.addf %171, %172 : vector<2x32xf32>
    %cst_51 = arith.constant 5.000000e-01 : f32
    %174 = vector.broadcast %cst_51 : f32 to vector<2x32xf32>
    %175 = arith.mulf %174, %173 : vector<2x32xf32>
    %176 = vector.extract_strided_slice %152 {offsets = [0, 64], sizes = [2, 32], strides = [1, 1]} : vector<2x96xf32> to vector<2x32xf32>
    %177 = vector.extract_strided_slice %155 {offsets = [0, 64], sizes = [2, 32], strides = [1, 1]} : vector<2x96xf32> to vector<2x32xf32>
    %178 = arith.mulf %165, %177 : vector<2x32xf32>
    %179 = arith.addf %176, %178 : vector<2x32xf32>
    %180 = math.tanh %179 : vector<2x32xf32>
    %cst_52 = arith.constant 1.000000e+00 : f32
    %181 = vector.broadcast %cst_52 : f32 to vector<2x32xf32>
    %182 = arith.subf %181, %175 : vector<2x32xf32>
    %183 = arith.mulf %182, %180 : vector<2x32xf32>
    %184 = arith.mulf %175, %151 : vector<2x32xf32>
    %185 = arith.addf %183, %184 : vector<2x32xf32>
    %186 = vector.extract_strided_slice %14 {offsets = [10, 0], sizes = [2, 96], strides = [1, 1]} : vector<16x96xf32> to vector<2x96xf32>
    %cst_53 = arith.constant dense<0.000000e+00> : vector<2x96xf32>
    %187 = tpu.matmul %185, %10, %cst_53 {dimension_numbers = #tpu.dot_dimension_numbers<[1], [0], [0], [1], [0, 0, 1, 1], [], []>} : vector<2x32xf32>, vector<32x96xf32>, vector<2x96xf32> -> vector<2x96xf32>
    %188 = vector.broadcast %11 : vector<1x96xf32> to vector<2x96xf32>
    %189 = arith.addf %187, %188 : vector<2x96xf32>
    %190 = vector.extract_strided_slice %186 {offsets = [0, 0], sizes = [2, 32], strides = [1, 1]} : vector<2x96xf32> to vector<2x32xf32>
    %191 = vector.extract_strided_slice %189 {offsets = [0, 0], sizes = [2, 32], strides = [1, 1]} : vector<2x96xf32> to vector<2x32xf32>
    %192 = arith.addf %190, %191 : vector<2x32xf32>
    %cst_54 = arith.constant 5.000000e-01 : f32
    %193 = vector.broadcast %cst_54 : f32 to vector<2x32xf32>
    %194 = arith.mulf %193, %192 : vector<2x32xf32>
    %195 = math.tanh %194 : vector<2x32xf32>
    %cst_55 = arith.constant 1.000000e+00 : f32
    %196 = vector.broadcast %cst_55 : f32 to vector<2x32xf32>
    %197 = arith.addf %195, %196 : vector<2x32xf32>
    %cst_56 = arith.constant 5.000000e-01 : f32
    %198 = vector.broadcast %cst_56 : f32 to vector<2x32xf32>
    %199 = arith.mulf %198, %197 : vector<2x32xf32>
    %200 = vector.extract_strided_slice %186 {offsets = [0, 32], sizes = [2, 32], strides = [1, 1]} : vector<2x96xf32> to vector<2x32xf32>
    %201 = vector.extract_strided_slice %189 {offsets = [0, 32], sizes = [2, 32], strides = [1, 1]} : vector<2x96xf32> to vector<2x32xf32>
    %202 = arith.addf %200, %201 : vector<2x32xf32>
    %cst_57 = arith.constant 5.000000e-01 : f32
    %203 = vector.broadcast %cst_57 : f32 to vector<2x32xf32>
    %204 = arith.mulf %203, %202 : vector<2x32xf32>
    %205 = math.tanh %204 : vector<2x32xf32>
    %cst_58 = arith.constant 1.000000e+00 : f32
    %206 = vector.broadcast %cst_58 : f32 to vector<2x32xf32>
    %207 = arith.addf %205, %206 : vector<2x32xf32>
    %cst_59 = arith.constant 5.000000e-01 : f32
    %208 = vector.broadcast %cst_59 : f32 to vector<2x32xf32>
    %209 = arith.mulf %208, %207 : vector<2x32xf32>
    %210 = vector.extract_strided_slice %186 {offsets = [0, 64], sizes = [2, 32], strides = [1, 1]} : vector<2x96xf32> to vector<2x32xf32>
    %211 = vector.extract_strided_slice %189 {offsets = [0, 64], sizes = [2, 32], strides = [1, 1]} : vector<2x96xf32> to vector<2x32xf32>
    %212 = arith.mulf %199, %211 : vector<2x32xf32>
    %213 = arith.addf %210, %212 : vector<2x32xf32>
    %214 = math.tanh %213 : vector<2x32xf32>
    %cst_60 = arith.constant 1.000000e+00 : f32
    %215 = vector.broadcast %cst_60 : f32 to vector<2x32xf32>
    %216 = arith.subf %215, %209 : vector<2x32xf32>
    %217 = arith.mulf %216, %214 : vector<2x32xf32>
    %218 = arith.mulf %209, %185 : vector<2x32xf32>
    %219 = arith.addf %217, %218 : vector<2x32xf32>
    %220 = vector.extract_strided_slice %14 {offsets = [12, 0], sizes = [2, 96], strides = [1, 1]} : vector<16x96xf32> to vector<2x96xf32>
    %cst_61 = arith.constant dense<0.000000e+00> : vector<2x96xf32>
    %221 = tpu.matmul %219, %10, %cst_61 {dimension_numbers = #tpu.dot_dimension_numbers<[1], [0], [0], [1], [0, 0, 1, 1], [], []>} : vector<2x32xf32>, vector<32x96xf32>, vector<2x96xf32> -> vector<2x96xf32>
    %222 = vector.broadcast %11 : vector<1x96xf32> to vector<2x96xf32>
    %223 = arith.addf %221, %222 : vector<2x96xf32>
    %224 = vector.extract_strided_slice %220 {offsets = [0, 0], sizes = [2, 32], strides = [1, 1]} : vector<2x96xf32> to vector<2x32xf32>
    %225 = vector.extract_strided_slice %223 {offsets = [0, 0], sizes = [2, 32], strides = [1, 1]} : vector<2x96xf32> to vector<2x32xf32>
    %226 = arith.addf %224, %225 : vector<2x32xf32>
    %cst_62 = arith.constant 5.000000e-01 : f32
    %227 = vector.broadcast %cst_62 : f32 to vector<2x32xf32>
    %228 = arith.mulf %227, %226 : vector<2x32xf32>
    %229 = math.tanh %228 : vector<2x32xf32>
    %cst_63 = arith.constant 1.000000e+00 : f32
    %230 = vector.broadcast %cst_63 : f32 to vector<2x32xf32>
    %231 = arith.addf %229, %230 : vector<2x32xf32>
    %cst_64 = arith.constant 5.000000e-01 : f32
    %232 = vector.broadcast %cst_64 : f32 to vector<2x32xf32>
    %233 = arith.mulf %232, %231 : vector<2x32xf32>
    %234 = vector.extract_strided_slice %220 {offsets = [0, 32], sizes = [2, 32], strides = [1, 1]} : vector<2x96xf32> to vector<2x32xf32>
    %235 = vector.extract_strided_slice %223 {offsets = [0, 32], sizes = [2, 32], strides = [1, 1]} : vector<2x96xf32> to vector<2x32xf32>
    %236 = arith.addf %234, %235 : vector<2x32xf32>
    %cst_65 = arith.constant 5.000000e-01 : f32
    %237 = vector.broadcast %cst_65 : f32 to vector<2x32xf32>
    %238 = arith.mulf %237, %236 : vector<2x32xf32>
    %239 = math.tanh %238 : vector<2x32xf32>
    %cst_66 = arith.constant 1.000000e+00 : f32
    %240 = vector.broadcast %cst_66 : f32 to vector<2x32xf32>
    %241 = arith.addf %239, %240 : vector<2x32xf32>
    %cst_67 = arith.constant 5.000000e-01 : f32
    %242 = vector.broadcast %cst_67 : f32 to vector<2x32xf32>
    %243 = arith.mulf %242, %241 : vector<2x32xf32>
    %244 = vector.extract_strided_slice %220 {offsets = [0, 64], sizes = [2, 32], strides = [1, 1]} : vector<2x96xf32> to vector<2x32xf32>
    %245 = vector.extract_strided_slice %223 {offsets = [0, 64], sizes = [2, 32], strides = [1, 1]} : vector<2x96xf32> to vector<2x32xf32>
    %246 = arith.mulf %233, %245 : vector<2x32xf32>
    %247 = arith.addf %244, %246 : vector<2x32xf32>
    %248 = math.tanh %247 : vector<2x32xf32>
    %cst_68 = arith.constant 1.000000e+00 : f32
    %249 = vector.broadcast %cst_68 : f32 to vector<2x32xf32>
    %250 = arith.subf %249, %243 : vector<2x32xf32>
    %251 = arith.mulf %250, %248 : vector<2x32xf32>
    %252 = arith.mulf %243, %219 : vector<2x32xf32>
    %253 = arith.addf %251, %252 : vector<2x32xf32>
    %254 = vector.extract_strided_slice %14 {offsets = [14, 0], sizes = [2, 96], strides = [1, 1]} : vector<16x96xf32> to vector<2x96xf32>
    %cst_69 = arith.constant dense<0.000000e+00> : vector<2x96xf32>
    %255 = tpu.matmul %253, %10, %cst_69 {dimension_numbers = #tpu.dot_dimension_numbers<[1], [0], [0], [1], [0, 0, 1, 1], [], []>} : vector<2x32xf32>, vector<32x96xf32>, vector<2x96xf32> -> vector<2x96xf32>
    %256 = vector.broadcast %11 : vector<1x96xf32> to vector<2x96xf32>
    %257 = arith.addf %255, %256 : vector<2x96xf32>
    %258 = vector.extract_strided_slice %254 {offsets = [0, 0], sizes = [2, 32], strides = [1, 1]} : vector<2x96xf32> to vector<2x32xf32>
    %259 = vector.extract_strided_slice %257 {offsets = [0, 0], sizes = [2, 32], strides = [1, 1]} : vector<2x96xf32> to vector<2x32xf32>
    %260 = arith.addf %258, %259 : vector<2x32xf32>
    %cst_70 = arith.constant 5.000000e-01 : f32
    %261 = vector.broadcast %cst_70 : f32 to vector<2x32xf32>
    %262 = arith.mulf %261, %260 : vector<2x32xf32>
    %263 = math.tanh %262 : vector<2x32xf32>
    %cst_71 = arith.constant 1.000000e+00 : f32
    %264 = vector.broadcast %cst_71 : f32 to vector<2x32xf32>
    %265 = arith.addf %263, %264 : vector<2x32xf32>
    %cst_72 = arith.constant 5.000000e-01 : f32
    %266 = vector.broadcast %cst_72 : f32 to vector<2x32xf32>
    %267 = arith.mulf %266, %265 : vector<2x32xf32>
    %268 = vector.extract_strided_slice %254 {offsets = [0, 32], sizes = [2, 32], strides = [1, 1]} : vector<2x96xf32> to vector<2x32xf32>
    %269 = vector.extract_strided_slice %257 {offsets = [0, 32], sizes = [2, 32], strides = [1, 1]} : vector<2x96xf32> to vector<2x32xf32>
    %270 = arith.addf %268, %269 : vector<2x32xf32>
    %cst_73 = arith.constant 5.000000e-01 : f32
    %271 = vector.broadcast %cst_73 : f32 to vector<2x32xf32>
    %272 = arith.mulf %271, %270 : vector<2x32xf32>
    %273 = math.tanh %272 : vector<2x32xf32>
    %cst_74 = arith.constant 1.000000e+00 : f32
    %274 = vector.broadcast %cst_74 : f32 to vector<2x32xf32>
    %275 = arith.addf %273, %274 : vector<2x32xf32>
    %cst_75 = arith.constant 5.000000e-01 : f32
    %276 = vector.broadcast %cst_75 : f32 to vector<2x32xf32>
    %277 = arith.mulf %276, %275 : vector<2x32xf32>
    %278 = vector.extract_strided_slice %254 {offsets = [0, 64], sizes = [2, 32], strides = [1, 1]} : vector<2x96xf32> to vector<2x32xf32>
    %279 = vector.extract_strided_slice %257 {offsets = [0, 64], sizes = [2, 32], strides = [1, 1]} : vector<2x96xf32> to vector<2x32xf32>
    %280 = arith.mulf %267, %279 : vector<2x32xf32>
    %281 = arith.addf %278, %280 : vector<2x32xf32>
    %282 = math.tanh %281 : vector<2x32xf32>
    %cst_76 = arith.constant 1.000000e+00 : f32
    %283 = vector.broadcast %cst_76 : f32 to vector<2x32xf32>
    %284 = arith.subf %283, %277 : vector<2x32xf32>
    %285 = arith.mulf %284, %282 : vector<2x32xf32>
    %286 = arith.mulf %277, %253 : vector<2x32xf32>
    %287 = arith.addf %285, %286 : vector<2x32xf32>
    %c0_77 = arith.constant 0 : index
    %c0_78 = arith.constant 0 : index
    %288 = vector.load %arg6[%c0_77, %c0_78] : memref<32x96xf32, #tpu.memory_space<vmem>>, vector<32x96xf32>
    %c0_79 = arith.constant 0 : index
    %c0_80 = arith.constant 0 : index
    %289 = vector.load %arg7[%c0_79, %c0_80] : memref<1x96xf32, #tpu.memory_space<vmem>>, vector<1x96xf32>
    %c0_81 = arith.constant 0 : index
    %c0_82 = arith.constant 0 : index
    %290 = vector.load %arg8[%c0_81, %c0_82] : memref<32x96xf32, #tpu.memory_space<vmem>>, vector<32x96xf32>
    %c0_83 = arith.constant 0 : index
    %c0_84 = arith.constant 0 : index
    %291 = vector.load %arg9[%c0_83, %c0_84] : memref<1x96xf32, #tpu.memory_space<vmem>>, vector<1x96xf32>
    %cst_85 = arith.constant dense<0.000000e+00> : vector<16x96xf32>
    %292 = tpu.matmul %7, %288, %cst_85 {dimension_numbers = #tpu.dot_dimension_numbers<[1], [0], [0], [1], [0, 0, 1, 1], [], []>} : vector<16x32xf32>, vector<32x96xf32>, vector<16x96xf32> -> vector<16x96xf32>
    %293 = vector.broadcast %289 : vector<1x96xf32> to vector<16x96xf32>
    %294 = arith.addf %292, %293 : vector<16x96xf32>
    %cst_86 = arith.constant 0.000000e+00 : f32
    %295 = vector.broadcast %cst_86 : f32 to vector<2x32xf32>
    %296 = vector.extract_strided_slice %294 {offsets = [14, 0], sizes = [2, 96], strides = [1, 1]} : vector<16x96xf32> to vector<2x96xf32>
    %cst_87 = arith.constant dense<0.000000e+00> : vector<2x96xf32>
    %297 = tpu.matmul %295, %290, %cst_87 {dimension_numbers = #tpu.dot_dimension_numbers<[1], [0], [0], [1], [0, 0, 1, 1], [], []>} : vector<2x32xf32>, vector<32x96xf32>, vector<2x96xf32> -> vector<2x96xf32>
    %298 = vector.broadcast %291 : vector<1x96xf32> to vector<2x96xf32>
    %299 = arith.addf %297, %298 : vector<2x96xf32>
    %300 = vector.extract_strided_slice %296 {offsets = [0, 0], sizes = [2, 32], strides = [1, 1]} : vector<2x96xf32> to vector<2x32xf32>
    %301 = vector.extract_strided_slice %299 {offsets = [0, 0], sizes = [2, 32], strides = [1, 1]} : vector<2x96xf32> to vector<2x32xf32>
    %302 = arith.addf %300, %301 : vector<2x32xf32>
    %cst_88 = arith.constant 5.000000e-01 : f32
    %303 = vector.broadcast %cst_88 : f32 to vector<2x32xf32>
    %304 = arith.mulf %303, %302 : vector<2x32xf32>
    %305 = math.tanh %304 : vector<2x32xf32>
    %cst_89 = arith.constant 1.000000e+00 : f32
    %306 = vector.broadcast %cst_89 : f32 to vector<2x32xf32>
    %307 = arith.addf %305, %306 : vector<2x32xf32>
    %cst_90 = arith.constant 5.000000e-01 : f32
    %308 = vector.broadcast %cst_90 : f32 to vector<2x32xf32>
    %309 = arith.mulf %308, %307 : vector<2x32xf32>
    %310 = vector.extract_strided_slice %296 {offsets = [0, 32], sizes = [2, 32], strides = [1, 1]} : vector<2x96xf32> to vector<2x32xf32>
    %311 = vector.extract_strided_slice %299 {offsets = [0, 32], sizes = [2, 32], strides = [1, 1]} : vector<2x96xf32> to vector<2x32xf32>
    %312 = arith.addf %310, %311 : vector<2x32xf32>
    %cst_91 = arith.constant 5.000000e-01 : f32
    %313 = vector.broadcast %cst_91 : f32 to vector<2x32xf32>
    %314 = arith.mulf %313, %312 : vector<2x32xf32>
    %315 = math.tanh %314 : vector<2x32xf32>
    %cst_92 = arith.constant 1.000000e+00 : f32
    %316 = vector.broadcast %cst_92 : f32 to vector<2x32xf32>
    %317 = arith.addf %315, %316 : vector<2x32xf32>
    %cst_93 = arith.constant 5.000000e-01 : f32
    %318 = vector.broadcast %cst_93 : f32 to vector<2x32xf32>
    %319 = arith.mulf %318, %317 : vector<2x32xf32>
    %320 = vector.extract_strided_slice %296 {offsets = [0, 64], sizes = [2, 32], strides = [1, 1]} : vector<2x96xf32> to vector<2x32xf32>
    %321 = vector.extract_strided_slice %299 {offsets = [0, 64], sizes = [2, 32], strides = [1, 1]} : vector<2x96xf32> to vector<2x32xf32>
    %322 = arith.mulf %309, %321 : vector<2x32xf32>
    %323 = arith.addf %320, %322 : vector<2x32xf32>
    %324 = math.tanh %323 : vector<2x32xf32>
    %cst_94 = arith.constant 1.000000e+00 : f32
    %325 = vector.broadcast %cst_94 : f32 to vector<2x32xf32>
    %326 = arith.subf %325, %319 : vector<2x32xf32>
    %327 = arith.mulf %326, %324 : vector<2x32xf32>
    %328 = arith.mulf %319, %295 : vector<2x32xf32>
    %329 = arith.addf %327, %328 : vector<2x32xf32>
    %330 = vector.extract_strided_slice %294 {offsets = [12, 0], sizes = [2, 96], strides = [1, 1]} : vector<16x96xf32> to vector<2x96xf32>
    %cst_95 = arith.constant dense<0.000000e+00> : vector<2x96xf32>
    %331 = tpu.matmul %329, %290, %cst_95 {dimension_numbers = #tpu.dot_dimension_numbers<[1], [0], [0], [1], [0, 0, 1, 1], [], []>} : vector<2x32xf32>, vector<32x96xf32>, vector<2x96xf32> -> vector<2x96xf32>
    %332 = vector.broadcast %291 : vector<1x96xf32> to vector<2x96xf32>
    %333 = arith.addf %331, %332 : vector<2x96xf32>
    %334 = vector.extract_strided_slice %330 {offsets = [0, 0], sizes = [2, 32], strides = [1, 1]} : vector<2x96xf32> to vector<2x32xf32>
    %335 = vector.extract_strided_slice %333 {offsets = [0, 0], sizes = [2, 32], strides = [1, 1]} : vector<2x96xf32> to vector<2x32xf32>
    %336 = arith.addf %334, %335 : vector<2x32xf32>
    %cst_96 = arith.constant 5.000000e-01 : f32
    %337 = vector.broadcast %cst_96 : f32 to vector<2x32xf32>
    %338 = arith.mulf %337, %336 : vector<2x32xf32>
    %339 = math.tanh %338 : vector<2x32xf32>
    %cst_97 = arith.constant 1.000000e+00 : f32
    %340 = vector.broadcast %cst_97 : f32 to vector<2x32xf32>
    %341 = arith.addf %339, %340 : vector<2x32xf32>
    %cst_98 = arith.constant 5.000000e-01 : f32
    %342 = vector.broadcast %cst_98 : f32 to vector<2x32xf32>
    %343 = arith.mulf %342, %341 : vector<2x32xf32>
    %344 = vector.extract_strided_slice %330 {offsets = [0, 32], sizes = [2, 32], strides = [1, 1]} : vector<2x96xf32> to vector<2x32xf32>
    %345 = vector.extract_strided_slice %333 {offsets = [0, 32], sizes = [2, 32], strides = [1, 1]} : vector<2x96xf32> to vector<2x32xf32>
    %346 = arith.addf %344, %345 : vector<2x32xf32>
    %cst_99 = arith.constant 5.000000e-01 : f32
    %347 = vector.broadcast %cst_99 : f32 to vector<2x32xf32>
    %348 = arith.mulf %347, %346 : vector<2x32xf32>
    %349 = math.tanh %348 : vector<2x32xf32>
    %cst_100 = arith.constant 1.000000e+00 : f32
    %350 = vector.broadcast %cst_100 : f32 to vector<2x32xf32>
    %351 = arith.addf %349, %350 : vector<2x32xf32>
    %cst_101 = arith.constant 5.000000e-01 : f32
    %352 = vector.broadcast %cst_101 : f32 to vector<2x32xf32>
    %353 = arith.mulf %352, %351 : vector<2x32xf32>
    %354 = vector.extract_strided_slice %330 {offsets = [0, 64], sizes = [2, 32], strides = [1, 1]} : vector<2x96xf32> to vector<2x32xf32>
    %355 = vector.extract_strided_slice %333 {offsets = [0, 64], sizes = [2, 32], strides = [1, 1]} : vector<2x96xf32> to vector<2x32xf32>
    %356 = arith.mulf %343, %355 : vector<2x32xf32>
    %357 = arith.addf %354, %356 : vector<2x32xf32>
    %358 = math.tanh %357 : vector<2x32xf32>
    %cst_102 = arith.constant 1.000000e+00 : f32
    %359 = vector.broadcast %cst_102 : f32 to vector<2x32xf32>
    %360 = arith.subf %359, %353 : vector<2x32xf32>
    %361 = arith.mulf %360, %358 : vector<2x32xf32>
    %362 = arith.mulf %353, %329 : vector<2x32xf32>
    %363 = arith.addf %361, %362 : vector<2x32xf32>
    %364 = vector.extract_strided_slice %294 {offsets = [10, 0], sizes = [2, 96], strides = [1, 1]} : vector<16x96xf32> to vector<2x96xf32>
    %cst_103 = arith.constant dense<0.000000e+00> : vector<2x96xf32>
    %365 = tpu.matmul %363, %290, %cst_103 {dimension_numbers = #tpu.dot_dimension_numbers<[1], [0], [0], [1], [0, 0, 1, 1], [], []>} : vector<2x32xf32>, vector<32x96xf32>, vector<2x96xf32> -> vector<2x96xf32>
    %366 = vector.broadcast %291 : vector<1x96xf32> to vector<2x96xf32>
    %367 = arith.addf %365, %366 : vector<2x96xf32>
    %368 = vector.extract_strided_slice %364 {offsets = [0, 0], sizes = [2, 32], strides = [1, 1]} : vector<2x96xf32> to vector<2x32xf32>
    %369 = vector.extract_strided_slice %367 {offsets = [0, 0], sizes = [2, 32], strides = [1, 1]} : vector<2x96xf32> to vector<2x32xf32>
    %370 = arith.addf %368, %369 : vector<2x32xf32>
    %cst_104 = arith.constant 5.000000e-01 : f32
    %371 = vector.broadcast %cst_104 : f32 to vector<2x32xf32>
    %372 = arith.mulf %371, %370 : vector<2x32xf32>
    %373 = math.tanh %372 : vector<2x32xf32>
    %cst_105 = arith.constant 1.000000e+00 : f32
    %374 = vector.broadcast %cst_105 : f32 to vector<2x32xf32>
    %375 = arith.addf %373, %374 : vector<2x32xf32>
    %cst_106 = arith.constant 5.000000e-01 : f32
    %376 = vector.broadcast %cst_106 : f32 to vector<2x32xf32>
    %377 = arith.mulf %376, %375 : vector<2x32xf32>
    %378 = vector.extract_strided_slice %364 {offsets = [0, 32], sizes = [2, 32], strides = [1, 1]} : vector<2x96xf32> to vector<2x32xf32>
    %379 = vector.extract_strided_slice %367 {offsets = [0, 32], sizes = [2, 32], strides = [1, 1]} : vector<2x96xf32> to vector<2x32xf32>
    %380 = arith.addf %378, %379 : vector<2x32xf32>
    %cst_107 = arith.constant 5.000000e-01 : f32
    %381 = vector.broadcast %cst_107 : f32 to vector<2x32xf32>
    %382 = arith.mulf %381, %380 : vector<2x32xf32>
    %383 = math.tanh %382 : vector<2x32xf32>
    %cst_108 = arith.constant 1.000000e+00 : f32
    %384 = vector.broadcast %cst_108 : f32 to vector<2x32xf32>
    %385 = arith.addf %383, %384 : vector<2x32xf32>
    %cst_109 = arith.constant 5.000000e-01 : f32
    %386 = vector.broadcast %cst_109 : f32 to vector<2x32xf32>
    %387 = arith.mulf %386, %385 : vector<2x32xf32>
    %388 = vector.extract_strided_slice %364 {offsets = [0, 64], sizes = [2, 32], strides = [1, 1]} : vector<2x96xf32> to vector<2x32xf32>
    %389 = vector.extract_strided_slice %367 {offsets = [0, 64], sizes = [2, 32], strides = [1, 1]} : vector<2x96xf32> to vector<2x32xf32>
    %390 = arith.mulf %377, %389 : vector<2x32xf32>
    %391 = arith.addf %388, %390 : vector<2x32xf32>
    %392 = math.tanh %391 : vector<2x32xf32>
    %cst_110 = arith.constant 1.000000e+00 : f32
    %393 = vector.broadcast %cst_110 : f32 to vector<2x32xf32>
    %394 = arith.subf %393, %387 : vector<2x32xf32>
    %395 = arith.mulf %394, %392 : vector<2x32xf32>
    %396 = arith.mulf %387, %363 : vector<2x32xf32>
    %397 = arith.addf %395, %396 : vector<2x32xf32>
    %398 = vector.extract_strided_slice %294 {offsets = [8, 0], sizes = [2, 96], strides = [1, 1]} : vector<16x96xf32> to vector<2x96xf32>
    %cst_111 = arith.constant dense<0.000000e+00> : vector<2x96xf32>
    %399 = tpu.matmul %397, %290, %cst_111 {dimension_numbers = #tpu.dot_dimension_numbers<[1], [0], [0], [1], [0, 0, 1, 1], [], []>} : vector<2x32xf32>, vector<32x96xf32>, vector<2x96xf32> -> vector<2x96xf32>
    %400 = vector.broadcast %291 : vector<1x96xf32> to vector<2x96xf32>
    %401 = arith.addf %399, %400 : vector<2x96xf32>
    %402 = vector.extract_strided_slice %398 {offsets = [0, 0], sizes = [2, 32], strides = [1, 1]} : vector<2x96xf32> to vector<2x32xf32>
    %403 = vector.extract_strided_slice %401 {offsets = [0, 0], sizes = [2, 32], strides = [1, 1]} : vector<2x96xf32> to vector<2x32xf32>
    %404 = arith.addf %402, %403 : vector<2x32xf32>
    %cst_112 = arith.constant 5.000000e-01 : f32
    %405 = vector.broadcast %cst_112 : f32 to vector<2x32xf32>
    %406 = arith.mulf %405, %404 : vector<2x32xf32>
    %407 = math.tanh %406 : vector<2x32xf32>
    %cst_113 = arith.constant 1.000000e+00 : f32
    %408 = vector.broadcast %cst_113 : f32 to vector<2x32xf32>
    %409 = arith.addf %407, %408 : vector<2x32xf32>
    %cst_114 = arith.constant 5.000000e-01 : f32
    %410 = vector.broadcast %cst_114 : f32 to vector<2x32xf32>
    %411 = arith.mulf %410, %409 : vector<2x32xf32>
    %412 = vector.extract_strided_slice %398 {offsets = [0, 32], sizes = [2, 32], strides = [1, 1]} : vector<2x96xf32> to vector<2x32xf32>
    %413 = vector.extract_strided_slice %401 {offsets = [0, 32], sizes = [2, 32], strides = [1, 1]} : vector<2x96xf32> to vector<2x32xf32>
    %414 = arith.addf %412, %413 : vector<2x32xf32>
    %cst_115 = arith.constant 5.000000e-01 : f32
    %415 = vector.broadcast %cst_115 : f32 to vector<2x32xf32>
    %416 = arith.mulf %415, %414 : vector<2x32xf32>
    %417 = math.tanh %416 : vector<2x32xf32>
    %cst_116 = arith.constant 1.000000e+00 : f32
    %418 = vector.broadcast %cst_116 : f32 to vector<2x32xf32>
    %419 = arith.addf %417, %418 : vector<2x32xf32>
    %cst_117 = arith.constant 5.000000e-01 : f32
    %420 = vector.broadcast %cst_117 : f32 to vector<2x32xf32>
    %421 = arith.mulf %420, %419 : vector<2x32xf32>
    %422 = vector.extract_strided_slice %398 {offsets = [0, 64], sizes = [2, 32], strides = [1, 1]} : vector<2x96xf32> to vector<2x32xf32>
    %423 = vector.extract_strided_slice %401 {offsets = [0, 64], sizes = [2, 32], strides = [1, 1]} : vector<2x96xf32> to vector<2x32xf32>
    %424 = arith.mulf %411, %423 : vector<2x32xf32>
    %425 = arith.addf %422, %424 : vector<2x32xf32>
    %426 = math.tanh %425 : vector<2x32xf32>
    %cst_118 = arith.constant 1.000000e+00 : f32
    %427 = vector.broadcast %cst_118 : f32 to vector<2x32xf32>
    %428 = arith.subf %427, %421 : vector<2x32xf32>
    %429 = arith.mulf %428, %426 : vector<2x32xf32>
    %430 = arith.mulf %421, %397 : vector<2x32xf32>
    %431 = arith.addf %429, %430 : vector<2x32xf32>
    %432 = vector.extract_strided_slice %294 {offsets = [6, 0], sizes = [2, 96], strides = [1, 1]} : vector<16x96xf32> to vector<2x96xf32>
    %cst_119 = arith.constant dense<0.000000e+00> : vector<2x96xf32>
    %433 = tpu.matmul %431, %290, %cst_119 {dimension_numbers = #tpu.dot_dimension_numbers<[1], [0], [0], [1], [0, 0, 1, 1], [], []>} : vector<2x32xf32>, vector<32x96xf32>, vector<2x96xf32> -> vector<2x96xf32>
    %434 = vector.broadcast %291 : vector<1x96xf32> to vector<2x96xf32>
    %435 = arith.addf %433, %434 : vector<2x96xf32>
    %436 = vector.extract_strided_slice %432 {offsets = [0, 0], sizes = [2, 32], strides = [1, 1]} : vector<2x96xf32> to vector<2x32xf32>
    %437 = vector.extract_strided_slice %435 {offsets = [0, 0], sizes = [2, 32], strides = [1, 1]} : vector<2x96xf32> to vector<2x32xf32>
    %438 = arith.addf %436, %437 : vector<2x32xf32>
    %cst_120 = arith.constant 5.000000e-01 : f32
    %439 = vector.broadcast %cst_120 : f32 to vector<2x32xf32>
    %440 = arith.mulf %439, %438 : vector<2x32xf32>
    %441 = math.tanh %440 : vector<2x32xf32>
    %cst_121 = arith.constant 1.000000e+00 : f32
    %442 = vector.broadcast %cst_121 : f32 to vector<2x32xf32>
    %443 = arith.addf %441, %442 : vector<2x32xf32>
    %cst_122 = arith.constant 5.000000e-01 : f32
    %444 = vector.broadcast %cst_122 : f32 to vector<2x32xf32>
    %445 = arith.mulf %444, %443 : vector<2x32xf32>
    %446 = vector.extract_strided_slice %432 {offsets = [0, 32], sizes = [2, 32], strides = [1, 1]} : vector<2x96xf32> to vector<2x32xf32>
    %447 = vector.extract_strided_slice %435 {offsets = [0, 32], sizes = [2, 32], strides = [1, 1]} : vector<2x96xf32> to vector<2x32xf32>
    %448 = arith.addf %446, %447 : vector<2x32xf32>
    %cst_123 = arith.constant 5.000000e-01 : f32
    %449 = vector.broadcast %cst_123 : f32 to vector<2x32xf32>
    %450 = arith.mulf %449, %448 : vector<2x32xf32>
    %451 = math.tanh %450 : vector<2x32xf32>
    %cst_124 = arith.constant 1.000000e+00 : f32
    %452 = vector.broadcast %cst_124 : f32 to vector<2x32xf32>
    %453 = arith.addf %451, %452 : vector<2x32xf32>
    %cst_125 = arith.constant 5.000000e-01 : f32
    %454 = vector.broadcast %cst_125 : f32 to vector<2x32xf32>
    %455 = arith.mulf %454, %453 : vector<2x32xf32>
    %456 = vector.extract_strided_slice %432 {offsets = [0, 64], sizes = [2, 32], strides = [1, 1]} : vector<2x96xf32> to vector<2x32xf32>
    %457 = vector.extract_strided_slice %435 {offsets = [0, 64], sizes = [2, 32], strides = [1, 1]} : vector<2x96xf32> to vector<2x32xf32>
    %458 = arith.mulf %445, %457 : vector<2x32xf32>
    %459 = arith.addf %456, %458 : vector<2x32xf32>
    %460 = math.tanh %459 : vector<2x32xf32>
    %cst_126 = arith.constant 1.000000e+00 : f32
    %461 = vector.broadcast %cst_126 : f32 to vector<2x32xf32>
    %462 = arith.subf %461, %455 : vector<2x32xf32>
    %463 = arith.mulf %462, %460 : vector<2x32xf32>
    %464 = arith.mulf %455, %431 : vector<2x32xf32>
    %465 = arith.addf %463, %464 : vector<2x32xf32>
    %466 = vector.extract_strided_slice %294 {offsets = [4, 0], sizes = [2, 96], strides = [1, 1]} : vector<16x96xf32> to vector<2x96xf32>
    %cst_127 = arith.constant dense<0.000000e+00> : vector<2x96xf32>
    %467 = tpu.matmul %465, %290, %cst_127 {dimension_numbers = #tpu.dot_dimension_numbers<[1], [0], [0], [1], [0, 0, 1, 1], [], []>} : vector<2x32xf32>, vector<32x96xf32>, vector<2x96xf32> -> vector<2x96xf32>
    %468 = vector.broadcast %291 : vector<1x96xf32> to vector<2x96xf32>
    %469 = arith.addf %467, %468 : vector<2x96xf32>
    %470 = vector.extract_strided_slice %466 {offsets = [0, 0], sizes = [2, 32], strides = [1, 1]} : vector<2x96xf32> to vector<2x32xf32>
    %471 = vector.extract_strided_slice %469 {offsets = [0, 0], sizes = [2, 32], strides = [1, 1]} : vector<2x96xf32> to vector<2x32xf32>
    %472 = arith.addf %470, %471 : vector<2x32xf32>
    %cst_128 = arith.constant 5.000000e-01 : f32
    %473 = vector.broadcast %cst_128 : f32 to vector<2x32xf32>
    %474 = arith.mulf %473, %472 : vector<2x32xf32>
    %475 = math.tanh %474 : vector<2x32xf32>
    %cst_129 = arith.constant 1.000000e+00 : f32
    %476 = vector.broadcast %cst_129 : f32 to vector<2x32xf32>
    %477 = arith.addf %475, %476 : vector<2x32xf32>
    %cst_130 = arith.constant 5.000000e-01 : f32
    %478 = vector.broadcast %cst_130 : f32 to vector<2x32xf32>
    %479 = arith.mulf %478, %477 : vector<2x32xf32>
    %480 = vector.extract_strided_slice %466 {offsets = [0, 32], sizes = [2, 32], strides = [1, 1]} : vector<2x96xf32> to vector<2x32xf32>
    %481 = vector.extract_strided_slice %469 {offsets = [0, 32], sizes = [2, 32], strides = [1, 1]} : vector<2x96xf32> to vector<2x32xf32>
    %482 = arith.addf %480, %481 : vector<2x32xf32>
    %cst_131 = arith.constant 5.000000e-01 : f32
    %483 = vector.broadcast %cst_131 : f32 to vector<2x32xf32>
    %484 = arith.mulf %483, %482 : vector<2x32xf32>
    %485 = math.tanh %484 : vector<2x32xf32>
    %cst_132 = arith.constant 1.000000e+00 : f32
    %486 = vector.broadcast %cst_132 : f32 to vector<2x32xf32>
    %487 = arith.addf %485, %486 : vector<2x32xf32>
    %cst_133 = arith.constant 5.000000e-01 : f32
    %488 = vector.broadcast %cst_133 : f32 to vector<2x32xf32>
    %489 = arith.mulf %488, %487 : vector<2x32xf32>
    %490 = vector.extract_strided_slice %466 {offsets = [0, 64], sizes = [2, 32], strides = [1, 1]} : vector<2x96xf32> to vector<2x32xf32>
    %491 = vector.extract_strided_slice %469 {offsets = [0, 64], sizes = [2, 32], strides = [1, 1]} : vector<2x96xf32> to vector<2x32xf32>
    %492 = arith.mulf %479, %491 : vector<2x32xf32>
    %493 = arith.addf %490, %492 : vector<2x32xf32>
    %494 = math.tanh %493 : vector<2x32xf32>
    %cst_134 = arith.constant 1.000000e+00 : f32
    %495 = vector.broadcast %cst_134 : f32 to vector<2x32xf32>
    %496 = arith.subf %495, %489 : vector<2x32xf32>
    %497 = arith.mulf %496, %494 : vector<2x32xf32>
    %498 = arith.mulf %489, %465 : vector<2x32xf32>
    %499 = arith.addf %497, %498 : vector<2x32xf32>
    %500 = vector.extract_strided_slice %294 {offsets = [2, 0], sizes = [2, 96], strides = [1, 1]} : vector<16x96xf32> to vector<2x96xf32>
    %cst_135 = arith.constant dense<0.000000e+00> : vector<2x96xf32>
    %501 = tpu.matmul %499, %290, %cst_135 {dimension_numbers = #tpu.dot_dimension_numbers<[1], [0], [0], [1], [0, 0, 1, 1], [], []>} : vector<2x32xf32>, vector<32x96xf32>, vector<2x96xf32> -> vector<2x96xf32>
    %502 = vector.broadcast %291 : vector<1x96xf32> to vector<2x96xf32>
    %503 = arith.addf %501, %502 : vector<2x96xf32>
    %504 = vector.extract_strided_slice %500 {offsets = [0, 0], sizes = [2, 32], strides = [1, 1]} : vector<2x96xf32> to vector<2x32xf32>
    %505 = vector.extract_strided_slice %503 {offsets = [0, 0], sizes = [2, 32], strides = [1, 1]} : vector<2x96xf32> to vector<2x32xf32>
    %506 = arith.addf %504, %505 : vector<2x32xf32>
    %cst_136 = arith.constant 5.000000e-01 : f32
    %507 = vector.broadcast %cst_136 : f32 to vector<2x32xf32>
    %508 = arith.mulf %507, %506 : vector<2x32xf32>
    %509 = math.tanh %508 : vector<2x32xf32>
    %cst_137 = arith.constant 1.000000e+00 : f32
    %510 = vector.broadcast %cst_137 : f32 to vector<2x32xf32>
    %511 = arith.addf %509, %510 : vector<2x32xf32>
    %cst_138 = arith.constant 5.000000e-01 : f32
    %512 = vector.broadcast %cst_138 : f32 to vector<2x32xf32>
    %513 = arith.mulf %512, %511 : vector<2x32xf32>
    %514 = vector.extract_strided_slice %500 {offsets = [0, 32], sizes = [2, 32], strides = [1, 1]} : vector<2x96xf32> to vector<2x32xf32>
    %515 = vector.extract_strided_slice %503 {offsets = [0, 32], sizes = [2, 32], strides = [1, 1]} : vector<2x96xf32> to vector<2x32xf32>
    %516 = arith.addf %514, %515 : vector<2x32xf32>
    %cst_139 = arith.constant 5.000000e-01 : f32
    %517 = vector.broadcast %cst_139 : f32 to vector<2x32xf32>
    %518 = arith.mulf %517, %516 : vector<2x32xf32>
    %519 = math.tanh %518 : vector<2x32xf32>
    %cst_140 = arith.constant 1.000000e+00 : f32
    %520 = vector.broadcast %cst_140 : f32 to vector<2x32xf32>
    %521 = arith.addf %519, %520 : vector<2x32xf32>
    %cst_141 = arith.constant 5.000000e-01 : f32
    %522 = vector.broadcast %cst_141 : f32 to vector<2x32xf32>
    %523 = arith.mulf %522, %521 : vector<2x32xf32>
    %524 = vector.extract_strided_slice %500 {offsets = [0, 64], sizes = [2, 32], strides = [1, 1]} : vector<2x96xf32> to vector<2x32xf32>
    %525 = vector.extract_strided_slice %503 {offsets = [0, 64], sizes = [2, 32], strides = [1, 1]} : vector<2x96xf32> to vector<2x32xf32>
    %526 = arith.mulf %513, %525 : vector<2x32xf32>
    %527 = arith.addf %524, %526 : vector<2x32xf32>
    %528 = math.tanh %527 : vector<2x32xf32>
    %cst_142 = arith.constant 1.000000e+00 : f32
    %529 = vector.broadcast %cst_142 : f32 to vector<2x32xf32>
    %530 = arith.subf %529, %523 : vector<2x32xf32>
    %531 = arith.mulf %530, %528 : vector<2x32xf32>
    %532 = arith.mulf %523, %499 : vector<2x32xf32>
    %533 = arith.addf %531, %532 : vector<2x32xf32>
    %534 = vector.extract_strided_slice %294 {offsets = [0, 0], sizes = [2, 96], strides = [1, 1]} : vector<16x96xf32> to vector<2x96xf32>
    %cst_143 = arith.constant dense<0.000000e+00> : vector<2x96xf32>
    %535 = tpu.matmul %533, %290, %cst_143 {dimension_numbers = #tpu.dot_dimension_numbers<[1], [0], [0], [1], [0, 0, 1, 1], [], []>} : vector<2x32xf32>, vector<32x96xf32>, vector<2x96xf32> -> vector<2x96xf32>
    %536 = vector.broadcast %291 : vector<1x96xf32> to vector<2x96xf32>
    %537 = arith.addf %535, %536 : vector<2x96xf32>
    %538 = vector.extract_strided_slice %534 {offsets = [0, 0], sizes = [2, 32], strides = [1, 1]} : vector<2x96xf32> to vector<2x32xf32>
    %539 = vector.extract_strided_slice %537 {offsets = [0, 0], sizes = [2, 32], strides = [1, 1]} : vector<2x96xf32> to vector<2x32xf32>
    %540 = arith.addf %538, %539 : vector<2x32xf32>
    %cst_144 = arith.constant 5.000000e-01 : f32
    %541 = vector.broadcast %cst_144 : f32 to vector<2x32xf32>
    %542 = arith.mulf %541, %540 : vector<2x32xf32>
    %543 = math.tanh %542 : vector<2x32xf32>
    %cst_145 = arith.constant 1.000000e+00 : f32
    %544 = vector.broadcast %cst_145 : f32 to vector<2x32xf32>
    %545 = arith.addf %543, %544 : vector<2x32xf32>
    %cst_146 = arith.constant 5.000000e-01 : f32
    %546 = vector.broadcast %cst_146 : f32 to vector<2x32xf32>
    %547 = arith.mulf %546, %545 : vector<2x32xf32>
    %548 = vector.extract_strided_slice %534 {offsets = [0, 32], sizes = [2, 32], strides = [1, 1]} : vector<2x96xf32> to vector<2x32xf32>
    %549 = vector.extract_strided_slice %537 {offsets = [0, 32], sizes = [2, 32], strides = [1, 1]} : vector<2x96xf32> to vector<2x32xf32>
    %550 = arith.addf %548, %549 : vector<2x32xf32>
    %cst_147 = arith.constant 5.000000e-01 : f32
    %551 = vector.broadcast %cst_147 : f32 to vector<2x32xf32>
    %552 = arith.mulf %551, %550 : vector<2x32xf32>
    %553 = math.tanh %552 : vector<2x32xf32>
    %cst_148 = arith.constant 1.000000e+00 : f32
    %554 = vector.broadcast %cst_148 : f32 to vector<2x32xf32>
    %555 = arith.addf %553, %554 : vector<2x32xf32>
    %cst_149 = arith.constant 5.000000e-01 : f32
    %556 = vector.broadcast %cst_149 : f32 to vector<2x32xf32>
    %557 = arith.mulf %556, %555 : vector<2x32xf32>
    %558 = vector.extract_strided_slice %534 {offsets = [0, 64], sizes = [2, 32], strides = [1, 1]} : vector<2x96xf32> to vector<2x32xf32>
    %559 = vector.extract_strided_slice %537 {offsets = [0, 64], sizes = [2, 32], strides = [1, 1]} : vector<2x96xf32> to vector<2x32xf32>
    %560 = arith.mulf %547, %559 : vector<2x32xf32>
    %561 = arith.addf %558, %560 : vector<2x32xf32>
    %562 = math.tanh %561 : vector<2x32xf32>
    %cst_150 = arith.constant 1.000000e+00 : f32
    %563 = vector.broadcast %cst_150 : f32 to vector<2x32xf32>
    %564 = arith.subf %563, %557 : vector<2x32xf32>
    %565 = arith.mulf %564, %562 : vector<2x32xf32>
    %566 = arith.mulf %557, %533 : vector<2x32xf32>
    %567 = arith.addf %565, %566 : vector<2x32xf32>
    %568 = tpu.concatenate %49, %83, %117, %151, %185, %219, %253, %287 in 0 : vector<2x32xf32>, vector<2x32xf32>, vector<2x32xf32>, vector<2x32xf32>, vector<2x32xf32>, vector<2x32xf32>, vector<2x32xf32>, vector<2x32xf32> -> vector<16x32xf32>
    %569 = tpu.concatenate %567, %533, %499, %465, %431, %397, %363, %329 in 0 : vector<2x32xf32>, vector<2x32xf32>, vector<2x32xf32>, vector<2x32xf32>, vector<2x32xf32>, vector<2x32xf32>, vector<2x32xf32>, vector<2x32xf32> -> vector<16x32xf32>
    %570 = tpu.concatenate %568, %569 in 1 : vector<16x32xf32>, vector<16x32xf32> -> vector<16x64xf32>
    %c0_151 = arith.constant 0 : index
    %c0_152 = arith.constant 0 : index
    %571 = vector.load %arg10[%c0_151, %c0_152] : memref<64x96xf32, #tpu.memory_space<vmem>>, vector<64x96xf32>
    %c0_153 = arith.constant 0 : index
    %c0_154 = arith.constant 0 : index
    %572 = vector.load %arg11[%c0_153, %c0_154] : memref<1x96xf32, #tpu.memory_space<vmem>>, vector<1x96xf32>
    %c0_155 = arith.constant 0 : index
    %c0_156 = arith.constant 0 : index
    %573 = vector.load %arg12[%c0_155, %c0_156] : memref<32x96xf32, #tpu.memory_space<vmem>>, vector<32x96xf32>
    %c0_157 = arith.constant 0 : index
    %c0_158 = arith.constant 0 : index
    %574 = vector.load %arg13[%c0_157, %c0_158] : memref<1x96xf32, #tpu.memory_space<vmem>>, vector<1x96xf32>
    %cst_159 = arith.constant dense<0.000000e+00> : vector<16x96xf32>
    %575 = tpu.matmul %570, %571, %cst_159 {dimension_numbers = #tpu.dot_dimension_numbers<[1], [0], [0], [1], [0, 0, 1, 1], [], []>} : vector<16x64xf32>, vector<64x96xf32>, vector<16x96xf32> -> vector<16x96xf32>
    %576 = vector.broadcast %572 : vector<1x96xf32> to vector<16x96xf32>
    %577 = arith.addf %575, %576 : vector<16x96xf32>
    %cst_160 = arith.constant 0.000000e+00 : f32
    %578 = vector.broadcast %cst_160 : f32 to vector<2x32xf32>
    %579 = vector.extract_strided_slice %577 {offsets = [0, 0], sizes = [2, 96], strides = [1, 1]} : vector<16x96xf32> to vector<2x96xf32>
    %cst_161 = arith.constant dense<0.000000e+00> : vector<2x96xf32>
    %580 = tpu.matmul %578, %573, %cst_161 {dimension_numbers = #tpu.dot_dimension_numbers<[1], [0], [0], [1], [0, 0, 1, 1], [], []>} : vector<2x32xf32>, vector<32x96xf32>, vector<2x96xf32> -> vector<2x96xf32>
    %581 = vector.broadcast %574 : vector<1x96xf32> to vector<2x96xf32>
    %582 = arith.addf %580, %581 : vector<2x96xf32>
    %583 = vector.extract_strided_slice %579 {offsets = [0, 0], sizes = [2, 32], strides = [1, 1]} : vector<2x96xf32> to vector<2x32xf32>
    %584 = vector.extract_strided_slice %582 {offsets = [0, 0], sizes = [2, 32], strides = [1, 1]} : vector<2x96xf32> to vector<2x32xf32>
    %585 = arith.addf %583, %584 : vector<2x32xf32>
    %cst_162 = arith.constant 5.000000e-01 : f32
    %586 = vector.broadcast %cst_162 : f32 to vector<2x32xf32>
    %587 = arith.mulf %586, %585 : vector<2x32xf32>
    %588 = math.tanh %587 : vector<2x32xf32>
    %cst_163 = arith.constant 1.000000e+00 : f32
    %589 = vector.broadcast %cst_163 : f32 to vector<2x32xf32>
    %590 = arith.addf %588, %589 : vector<2x32xf32>
    %cst_164 = arith.constant 5.000000e-01 : f32
    %591 = vector.broadcast %cst_164 : f32 to vector<2x32xf32>
    %592 = arith.mulf %591, %590 : vector<2x32xf32>
    %593 = vector.extract_strided_slice %579 {offsets = [0, 32], sizes = [2, 32], strides = [1, 1]} : vector<2x96xf32> to vector<2x32xf32>
    %594 = vector.extract_strided_slice %582 {offsets = [0, 32], sizes = [2, 32], strides = [1, 1]} : vector<2x96xf32> to vector<2x32xf32>
    %595 = arith.addf %593, %594 : vector<2x32xf32>
    %cst_165 = arith.constant 5.000000e-01 : f32
    %596 = vector.broadcast %cst_165 : f32 to vector<2x32xf32>
    %597 = arith.mulf %596, %595 : vector<2x32xf32>
    %598 = math.tanh %597 : vector<2x32xf32>
    %cst_166 = arith.constant 1.000000e+00 : f32
    %599 = vector.broadcast %cst_166 : f32 to vector<2x32xf32>
    %600 = arith.addf %598, %599 : vector<2x32xf32>
    %cst_167 = arith.constant 5.000000e-01 : f32
    %601 = vector.broadcast %cst_167 : f32 to vector<2x32xf32>
    %602 = arith.mulf %601, %600 : vector<2x32xf32>
    %603 = vector.extract_strided_slice %579 {offsets = [0, 64], sizes = [2, 32], strides = [1, 1]} : vector<2x96xf32> to vector<2x32xf32>
    %604 = vector.extract_strided_slice %582 {offsets = [0, 64], sizes = [2, 32], strides = [1, 1]} : vector<2x96xf32> to vector<2x32xf32>
    %605 = arith.mulf %592, %604 : vector<2x32xf32>
    %606 = arith.addf %603, %605 : vector<2x32xf32>
    %607 = math.tanh %606 : vector<2x32xf32>
    %cst_168 = arith.constant 1.000000e+00 : f32
    %608 = vector.broadcast %cst_168 : f32 to vector<2x32xf32>
    %609 = arith.subf %608, %602 : vector<2x32xf32>
    %610 = arith.mulf %609, %607 : vector<2x32xf32>
    %611 = arith.mulf %602, %578 : vector<2x32xf32>
    %612 = arith.addf %610, %611 : vector<2x32xf32>
    %613 = vector.extract_strided_slice %577 {offsets = [2, 0], sizes = [2, 96], strides = [1, 1]} : vector<16x96xf32> to vector<2x96xf32>
    %cst_169 = arith.constant dense<0.000000e+00> : vector<2x96xf32>
    %614 = tpu.matmul %612, %573, %cst_169 {dimension_numbers = #tpu.dot_dimension_numbers<[1], [0], [0], [1], [0, 0, 1, 1], [], []>} : vector<2x32xf32>, vector<32x96xf32>, vector<2x96xf32> -> vector<2x96xf32>
    %615 = vector.broadcast %574 : vector<1x96xf32> to vector<2x96xf32>
    %616 = arith.addf %614, %615 : vector<2x96xf32>
    %617 = vector.extract_strided_slice %613 {offsets = [0, 0], sizes = [2, 32], strides = [1, 1]} : vector<2x96xf32> to vector<2x32xf32>
    %618 = vector.extract_strided_slice %616 {offsets = [0, 0], sizes = [2, 32], strides = [1, 1]} : vector<2x96xf32> to vector<2x32xf32>
    %619 = arith.addf %617, %618 : vector<2x32xf32>
    %cst_170 = arith.constant 5.000000e-01 : f32
    %620 = vector.broadcast %cst_170 : f32 to vector<2x32xf32>
    %621 = arith.mulf %620, %619 : vector<2x32xf32>
    %622 = math.tanh %621 : vector<2x32xf32>
    %cst_171 = arith.constant 1.000000e+00 : f32
    %623 = vector.broadcast %cst_171 : f32 to vector<2x32xf32>
    %624 = arith.addf %622, %623 : vector<2x32xf32>
    %cst_172 = arith.constant 5.000000e-01 : f32
    %625 = vector.broadcast %cst_172 : f32 to vector<2x32xf32>
    %626 = arith.mulf %625, %624 : vector<2x32xf32>
    %627 = vector.extract_strided_slice %613 {offsets = [0, 32], sizes = [2, 32], strides = [1, 1]} : vector<2x96xf32> to vector<2x32xf32>
    %628 = vector.extract_strided_slice %616 {offsets = [0, 32], sizes = [2, 32], strides = [1, 1]} : vector<2x96xf32> to vector<2x32xf32>
    %629 = arith.addf %627, %628 : vector<2x32xf32>
    %cst_173 = arith.constant 5.000000e-01 : f32
    %630 = vector.broadcast %cst_173 : f32 to vector<2x32xf32>
    %631 = arith.mulf %630, %629 : vector<2x32xf32>
    %632 = math.tanh %631 : vector<2x32xf32>
    %cst_174 = arith.constant 1.000000e+00 : f32
    %633 = vector.broadcast %cst_174 : f32 to vector<2x32xf32>
    %634 = arith.addf %632, %633 : vector<2x32xf32>
    %cst_175 = arith.constant 5.000000e-01 : f32
    %635 = vector.broadcast %cst_175 : f32 to vector<2x32xf32>
    %636 = arith.mulf %635, %634 : vector<2x32xf32>
    %637 = vector.extract_strided_slice %613 {offsets = [0, 64], sizes = [2, 32], strides = [1, 1]} : vector<2x96xf32> to vector<2x32xf32>
    %638 = vector.extract_strided_slice %616 {offsets = [0, 64], sizes = [2, 32], strides = [1, 1]} : vector<2x96xf32> to vector<2x32xf32>
    %639 = arith.mulf %626, %638 : vector<2x32xf32>
    %640 = arith.addf %637, %639 : vector<2x32xf32>
    %641 = math.tanh %640 : vector<2x32xf32>
    %cst_176 = arith.constant 1.000000e+00 : f32
    %642 = vector.broadcast %cst_176 : f32 to vector<2x32xf32>
    %643 = arith.subf %642, %636 : vector<2x32xf32>
    %644 = arith.mulf %643, %641 : vector<2x32xf32>
    %645 = arith.mulf %636, %612 : vector<2x32xf32>
    %646 = arith.addf %644, %645 : vector<2x32xf32>
    %647 = vector.extract_strided_slice %577 {offsets = [4, 0], sizes = [2, 96], strides = [1, 1]} : vector<16x96xf32> to vector<2x96xf32>
    %cst_177 = arith.constant dense<0.000000e+00> : vector<2x96xf32>
    %648 = tpu.matmul %646, %573, %cst_177 {dimension_numbers = #tpu.dot_dimension_numbers<[1], [0], [0], [1], [0, 0, 1, 1], [], []>} : vector<2x32xf32>, vector<32x96xf32>, vector<2x96xf32> -> vector<2x96xf32>
    %649 = vector.broadcast %574 : vector<1x96xf32> to vector<2x96xf32>
    %650 = arith.addf %648, %649 : vector<2x96xf32>
    %651 = vector.extract_strided_slice %647 {offsets = [0, 0], sizes = [2, 32], strides = [1, 1]} : vector<2x96xf32> to vector<2x32xf32>
    %652 = vector.extract_strided_slice %650 {offsets = [0, 0], sizes = [2, 32], strides = [1, 1]} : vector<2x96xf32> to vector<2x32xf32>
    %653 = arith.addf %651, %652 : vector<2x32xf32>
    %cst_178 = arith.constant 5.000000e-01 : f32
    %654 = vector.broadcast %cst_178 : f32 to vector<2x32xf32>
    %655 = arith.mulf %654, %653 : vector<2x32xf32>
    %656 = math.tanh %655 : vector<2x32xf32>
    %cst_179 = arith.constant 1.000000e+00 : f32
    %657 = vector.broadcast %cst_179 : f32 to vector<2x32xf32>
    %658 = arith.addf %656, %657 : vector<2x32xf32>
    %cst_180 = arith.constant 5.000000e-01 : f32
    %659 = vector.broadcast %cst_180 : f32 to vector<2x32xf32>
    %660 = arith.mulf %659, %658 : vector<2x32xf32>
    %661 = vector.extract_strided_slice %647 {offsets = [0, 32], sizes = [2, 32], strides = [1, 1]} : vector<2x96xf32> to vector<2x32xf32>
    %662 = vector.extract_strided_slice %650 {offsets = [0, 32], sizes = [2, 32], strides = [1, 1]} : vector<2x96xf32> to vector<2x32xf32>
    %663 = arith.addf %661, %662 : vector<2x32xf32>
    %cst_181 = arith.constant 5.000000e-01 : f32
    %664 = vector.broadcast %cst_181 : f32 to vector<2x32xf32>
    %665 = arith.mulf %664, %663 : vector<2x32xf32>
    %666 = math.tanh %665 : vector<2x32xf32>
    %cst_182 = arith.constant 1.000000e+00 : f32
    %667 = vector.broadcast %cst_182 : f32 to vector<2x32xf32>
    %668 = arith.addf %666, %667 : vector<2x32xf32>
    %cst_183 = arith.constant 5.000000e-01 : f32
    %669 = vector.broadcast %cst_183 : f32 to vector<2x32xf32>
    %670 = arith.mulf %669, %668 : vector<2x32xf32>
    %671 = vector.extract_strided_slice %647 {offsets = [0, 64], sizes = [2, 32], strides = [1, 1]} : vector<2x96xf32> to vector<2x32xf32>
    %672 = vector.extract_strided_slice %650 {offsets = [0, 64], sizes = [2, 32], strides = [1, 1]} : vector<2x96xf32> to vector<2x32xf32>
    %673 = arith.mulf %660, %672 : vector<2x32xf32>
    %674 = arith.addf %671, %673 : vector<2x32xf32>
    %675 = math.tanh %674 : vector<2x32xf32>
    %cst_184 = arith.constant 1.000000e+00 : f32
    %676 = vector.broadcast %cst_184 : f32 to vector<2x32xf32>
    %677 = arith.subf %676, %670 : vector<2x32xf32>
    %678 = arith.mulf %677, %675 : vector<2x32xf32>
    %679 = arith.mulf %670, %646 : vector<2x32xf32>
    %680 = arith.addf %678, %679 : vector<2x32xf32>
    %681 = vector.extract_strided_slice %577 {offsets = [6, 0], sizes = [2, 96], strides = [1, 1]} : vector<16x96xf32> to vector<2x96xf32>
    %cst_185 = arith.constant dense<0.000000e+00> : vector<2x96xf32>
    %682 = tpu.matmul %680, %573, %cst_185 {dimension_numbers = #tpu.dot_dimension_numbers<[1], [0], [0], [1], [0, 0, 1, 1], [], []>} : vector<2x32xf32>, vector<32x96xf32>, vector<2x96xf32> -> vector<2x96xf32>
    %683 = vector.broadcast %574 : vector<1x96xf32> to vector<2x96xf32>
    %684 = arith.addf %682, %683 : vector<2x96xf32>
    %685 = vector.extract_strided_slice %681 {offsets = [0, 0], sizes = [2, 32], strides = [1, 1]} : vector<2x96xf32> to vector<2x32xf32>
    %686 = vector.extract_strided_slice %684 {offsets = [0, 0], sizes = [2, 32], strides = [1, 1]} : vector<2x96xf32> to vector<2x32xf32>
    %687 = arith.addf %685, %686 : vector<2x32xf32>
    %cst_186 = arith.constant 5.000000e-01 : f32
    %688 = vector.broadcast %cst_186 : f32 to vector<2x32xf32>
    %689 = arith.mulf %688, %687 : vector<2x32xf32>
    %690 = math.tanh %689 : vector<2x32xf32>
    %cst_187 = arith.constant 1.000000e+00 : f32
    %691 = vector.broadcast %cst_187 : f32 to vector<2x32xf32>
    %692 = arith.addf %690, %691 : vector<2x32xf32>
    %cst_188 = arith.constant 5.000000e-01 : f32
    %693 = vector.broadcast %cst_188 : f32 to vector<2x32xf32>
    %694 = arith.mulf %693, %692 : vector<2x32xf32>
    %695 = vector.extract_strided_slice %681 {offsets = [0, 32], sizes = [2, 32], strides = [1, 1]} : vector<2x96xf32> to vector<2x32xf32>
    %696 = vector.extract_strided_slice %684 {offsets = [0, 32], sizes = [2, 32], strides = [1, 1]} : vector<2x96xf32> to vector<2x32xf32>
    %697 = arith.addf %695, %696 : vector<2x32xf32>
    %cst_189 = arith.constant 5.000000e-01 : f32
    %698 = vector.broadcast %cst_189 : f32 to vector<2x32xf32>
    %699 = arith.mulf %698, %697 : vector<2x32xf32>
    %700 = math.tanh %699 : vector<2x32xf32>
    %cst_190 = arith.constant 1.000000e+00 : f32
    %701 = vector.broadcast %cst_190 : f32 to vector<2x32xf32>
    %702 = arith.addf %700, %701 : vector<2x32xf32>
    %cst_191 = arith.constant 5.000000e-01 : f32
    %703 = vector.broadcast %cst_191 : f32 to vector<2x32xf32>
    %704 = arith.mulf %703, %702 : vector<2x32xf32>
    %705 = vector.extract_strided_slice %681 {offsets = [0, 64], sizes = [2, 32], strides = [1, 1]} : vector<2x96xf32> to vector<2x32xf32>
    %706 = vector.extract_strided_slice %684 {offsets = [0, 64], sizes = [2, 32], strides = [1, 1]} : vector<2x96xf32> to vector<2x32xf32>
    %707 = arith.mulf %694, %706 : vector<2x32xf32>
    %708 = arith.addf %705, %707 : vector<2x32xf32>
    %709 = math.tanh %708 : vector<2x32xf32>
    %cst_192 = arith.constant 1.000000e+00 : f32
    %710 = vector.broadcast %cst_192 : f32 to vector<2x32xf32>
    %711 = arith.subf %710, %704 : vector<2x32xf32>
    %712 = arith.mulf %711, %709 : vector<2x32xf32>
    %713 = arith.mulf %704, %680 : vector<2x32xf32>
    %714 = arith.addf %712, %713 : vector<2x32xf32>
    %715 = vector.extract_strided_slice %577 {offsets = [8, 0], sizes = [2, 96], strides = [1, 1]} : vector<16x96xf32> to vector<2x96xf32>
    %cst_193 = arith.constant dense<0.000000e+00> : vector<2x96xf32>
    %716 = tpu.matmul %714, %573, %cst_193 {dimension_numbers = #tpu.dot_dimension_numbers<[1], [0], [0], [1], [0, 0, 1, 1], [], []>} : vector<2x32xf32>, vector<32x96xf32>, vector<2x96xf32> -> vector<2x96xf32>
    %717 = vector.broadcast %574 : vector<1x96xf32> to vector<2x96xf32>
    %718 = arith.addf %716, %717 : vector<2x96xf32>
    %719 = vector.extract_strided_slice %715 {offsets = [0, 0], sizes = [2, 32], strides = [1, 1]} : vector<2x96xf32> to vector<2x32xf32>
    %720 = vector.extract_strided_slice %718 {offsets = [0, 0], sizes = [2, 32], strides = [1, 1]} : vector<2x96xf32> to vector<2x32xf32>
    %721 = arith.addf %719, %720 : vector<2x32xf32>
    %cst_194 = arith.constant 5.000000e-01 : f32
    %722 = vector.broadcast %cst_194 : f32 to vector<2x32xf32>
    %723 = arith.mulf %722, %721 : vector<2x32xf32>
    %724 = math.tanh %723 : vector<2x32xf32>
    %cst_195 = arith.constant 1.000000e+00 : f32
    %725 = vector.broadcast %cst_195 : f32 to vector<2x32xf32>
    %726 = arith.addf %724, %725 : vector<2x32xf32>
    %cst_196 = arith.constant 5.000000e-01 : f32
    %727 = vector.broadcast %cst_196 : f32 to vector<2x32xf32>
    %728 = arith.mulf %727, %726 : vector<2x32xf32>
    %729 = vector.extract_strided_slice %715 {offsets = [0, 32], sizes = [2, 32], strides = [1, 1]} : vector<2x96xf32> to vector<2x32xf32>
    %730 = vector.extract_strided_slice %718 {offsets = [0, 32], sizes = [2, 32], strides = [1, 1]} : vector<2x96xf32> to vector<2x32xf32>
    %731 = arith.addf %729, %730 : vector<2x32xf32>
    %cst_197 = arith.constant 5.000000e-01 : f32
    %732 = vector.broadcast %cst_197 : f32 to vector<2x32xf32>
    %733 = arith.mulf %732, %731 : vector<2x32xf32>
    %734 = math.tanh %733 : vector<2x32xf32>
    %cst_198 = arith.constant 1.000000e+00 : f32
    %735 = vector.broadcast %cst_198 : f32 to vector<2x32xf32>
    %736 = arith.addf %734, %735 : vector<2x32xf32>
    %cst_199 = arith.constant 5.000000e-01 : f32
    %737 = vector.broadcast %cst_199 : f32 to vector<2x32xf32>
    %738 = arith.mulf %737, %736 : vector<2x32xf32>
    %739 = vector.extract_strided_slice %715 {offsets = [0, 64], sizes = [2, 32], strides = [1, 1]} : vector<2x96xf32> to vector<2x32xf32>
    %740 = vector.extract_strided_slice %718 {offsets = [0, 64], sizes = [2, 32], strides = [1, 1]} : vector<2x96xf32> to vector<2x32xf32>
    %741 = arith.mulf %728, %740 : vector<2x32xf32>
    %742 = arith.addf %739, %741 : vector<2x32xf32>
    %743 = math.tanh %742 : vector<2x32xf32>
    %cst_200 = arith.constant 1.000000e+00 : f32
    %744 = vector.broadcast %cst_200 : f32 to vector<2x32xf32>
    %745 = arith.subf %744, %738 : vector<2x32xf32>
    %746 = arith.mulf %745, %743 : vector<2x32xf32>
    %747 = arith.mulf %738, %714 : vector<2x32xf32>
    %748 = arith.addf %746, %747 : vector<2x32xf32>
    %749 = vector.extract_strided_slice %577 {offsets = [10, 0], sizes = [2, 96], strides = [1, 1]} : vector<16x96xf32> to vector<2x96xf32>
    %cst_201 = arith.constant dense<0.000000e+00> : vector<2x96xf32>
    %750 = tpu.matmul %748, %573, %cst_201 {dimension_numbers = #tpu.dot_dimension_numbers<[1], [0], [0], [1], [0, 0, 1, 1], [], []>} : vector<2x32xf32>, vector<32x96xf32>, vector<2x96xf32> -> vector<2x96xf32>
    %751 = vector.broadcast %574 : vector<1x96xf32> to vector<2x96xf32>
    %752 = arith.addf %750, %751 : vector<2x96xf32>
    %753 = vector.extract_strided_slice %749 {offsets = [0, 0], sizes = [2, 32], strides = [1, 1]} : vector<2x96xf32> to vector<2x32xf32>
    %754 = vector.extract_strided_slice %752 {offsets = [0, 0], sizes = [2, 32], strides = [1, 1]} : vector<2x96xf32> to vector<2x32xf32>
    %755 = arith.addf %753, %754 : vector<2x32xf32>
    %cst_202 = arith.constant 5.000000e-01 : f32
    %756 = vector.broadcast %cst_202 : f32 to vector<2x32xf32>
    %757 = arith.mulf %756, %755 : vector<2x32xf32>
    %758 = math.tanh %757 : vector<2x32xf32>
    %cst_203 = arith.constant 1.000000e+00 : f32
    %759 = vector.broadcast %cst_203 : f32 to vector<2x32xf32>
    %760 = arith.addf %758, %759 : vector<2x32xf32>
    %cst_204 = arith.constant 5.000000e-01 : f32
    %761 = vector.broadcast %cst_204 : f32 to vector<2x32xf32>
    %762 = arith.mulf %761, %760 : vector<2x32xf32>
    %763 = vector.extract_strided_slice %749 {offsets = [0, 32], sizes = [2, 32], strides = [1, 1]} : vector<2x96xf32> to vector<2x32xf32>
    %764 = vector.extract_strided_slice %752 {offsets = [0, 32], sizes = [2, 32], strides = [1, 1]} : vector<2x96xf32> to vector<2x32xf32>
    %765 = arith.addf %763, %764 : vector<2x32xf32>
    %cst_205 = arith.constant 5.000000e-01 : f32
    %766 = vector.broadcast %cst_205 : f32 to vector<2x32xf32>
    %767 = arith.mulf %766, %765 : vector<2x32xf32>
    %768 = math.tanh %767 : vector<2x32xf32>
    %cst_206 = arith.constant 1.000000e+00 : f32
    %769 = vector.broadcast %cst_206 : f32 to vector<2x32xf32>
    %770 = arith.addf %768, %769 : vector<2x32xf32>
    %cst_207 = arith.constant 5.000000e-01 : f32
    %771 = vector.broadcast %cst_207 : f32 to vector<2x32xf32>
    %772 = arith.mulf %771, %770 : vector<2x32xf32>
    %773 = vector.extract_strided_slice %749 {offsets = [0, 64], sizes = [2, 32], strides = [1, 1]} : vector<2x96xf32> to vector<2x32xf32>
    %774 = vector.extract_strided_slice %752 {offsets = [0, 64], sizes = [2, 32], strides = [1, 1]} : vector<2x96xf32> to vector<2x32xf32>
    %775 = arith.mulf %762, %774 : vector<2x32xf32>
    %776 = arith.addf %773, %775 : vector<2x32xf32>
    %777 = math.tanh %776 : vector<2x32xf32>
    %cst_208 = arith.constant 1.000000e+00 : f32
    %778 = vector.broadcast %cst_208 : f32 to vector<2x32xf32>
    %779 = arith.subf %778, %772 : vector<2x32xf32>
    %780 = arith.mulf %779, %777 : vector<2x32xf32>
    %781 = arith.mulf %772, %748 : vector<2x32xf32>
    %782 = arith.addf %780, %781 : vector<2x32xf32>
    %783 = vector.extract_strided_slice %577 {offsets = [12, 0], sizes = [2, 96], strides = [1, 1]} : vector<16x96xf32> to vector<2x96xf32>
    %cst_209 = arith.constant dense<0.000000e+00> : vector<2x96xf32>
    %784 = tpu.matmul %782, %573, %cst_209 {dimension_numbers = #tpu.dot_dimension_numbers<[1], [0], [0], [1], [0, 0, 1, 1], [], []>} : vector<2x32xf32>, vector<32x96xf32>, vector<2x96xf32> -> vector<2x96xf32>
    %785 = vector.broadcast %574 : vector<1x96xf32> to vector<2x96xf32>
    %786 = arith.addf %784, %785 : vector<2x96xf32>
    %787 = vector.extract_strided_slice %783 {offsets = [0, 0], sizes = [2, 32], strides = [1, 1]} : vector<2x96xf32> to vector<2x32xf32>
    %788 = vector.extract_strided_slice %786 {offsets = [0, 0], sizes = [2, 32], strides = [1, 1]} : vector<2x96xf32> to vector<2x32xf32>
    %789 = arith.addf %787, %788 : vector<2x32xf32>
    %cst_210 = arith.constant 5.000000e-01 : f32
    %790 = vector.broadcast %cst_210 : f32 to vector<2x32xf32>
    %791 = arith.mulf %790, %789 : vector<2x32xf32>
    %792 = math.tanh %791 : vector<2x32xf32>
    %cst_211 = arith.constant 1.000000e+00 : f32
    %793 = vector.broadcast %cst_211 : f32 to vector<2x32xf32>
    %794 = arith.addf %792, %793 : vector<2x32xf32>
    %cst_212 = arith.constant 5.000000e-01 : f32
    %795 = vector.broadcast %cst_212 : f32 to vector<2x32xf32>
    %796 = arith.mulf %795, %794 : vector<2x32xf32>
    %797 = vector.extract_strided_slice %783 {offsets = [0, 32], sizes = [2, 32], strides = [1, 1]} : vector<2x96xf32> to vector<2x32xf32>
    %798 = vector.extract_strided_slice %786 {offsets = [0, 32], sizes = [2, 32], strides = [1, 1]} : vector<2x96xf32> to vector<2x32xf32>
    %799 = arith.addf %797, %798 : vector<2x32xf32>
    %cst_213 = arith.constant 5.000000e-01 : f32
    %800 = vector.broadcast %cst_213 : f32 to vector<2x32xf32>
    %801 = arith.mulf %800, %799 : vector<2x32xf32>
    %802 = math.tanh %801 : vector<2x32xf32>
    %cst_214 = arith.constant 1.000000e+00 : f32
    %803 = vector.broadcast %cst_214 : f32 to vector<2x32xf32>
    %804 = arith.addf %802, %803 : vector<2x32xf32>
    %cst_215 = arith.constant 5.000000e-01 : f32
    %805 = vector.broadcast %cst_215 : f32 to vector<2x32xf32>
    %806 = arith.mulf %805, %804 : vector<2x32xf32>
    %807 = vector.extract_strided_slice %783 {offsets = [0, 64], sizes = [2, 32], strides = [1, 1]} : vector<2x96xf32> to vector<2x32xf32>
    %808 = vector.extract_strided_slice %786 {offsets = [0, 64], sizes = [2, 32], strides = [1, 1]} : vector<2x96xf32> to vector<2x32xf32>
    %809 = arith.mulf %796, %808 : vector<2x32xf32>
    %810 = arith.addf %807, %809 : vector<2x32xf32>
    %811 = math.tanh %810 : vector<2x32xf32>
    %cst_216 = arith.constant 1.000000e+00 : f32
    %812 = vector.broadcast %cst_216 : f32 to vector<2x32xf32>
    %813 = arith.subf %812, %806 : vector<2x32xf32>
    %814 = arith.mulf %813, %811 : vector<2x32xf32>
    %815 = arith.mulf %806, %782 : vector<2x32xf32>
    %816 = arith.addf %814, %815 : vector<2x32xf32>
    %817 = vector.extract_strided_slice %577 {offsets = [14, 0], sizes = [2, 96], strides = [1, 1]} : vector<16x96xf32> to vector<2x96xf32>
    %cst_217 = arith.constant dense<0.000000e+00> : vector<2x96xf32>
    %818 = tpu.matmul %816, %573, %cst_217 {dimension_numbers = #tpu.dot_dimension_numbers<[1], [0], [0], [1], [0, 0, 1, 1], [], []>} : vector<2x32xf32>, vector<32x96xf32>, vector<2x96xf32> -> vector<2x96xf32>
    %819 = vector.broadcast %574 : vector<1x96xf32> to vector<2x96xf32>
    %820 = arith.addf %818, %819 : vector<2x96xf32>
    %821 = vector.extract_strided_slice %817 {offsets = [0, 0], sizes = [2, 32], strides = [1, 1]} : vector<2x96xf32> to vector<2x32xf32>
    %822 = vector.extract_strided_slice %820 {offsets = [0, 0], sizes = [2, 32], strides = [1, 1]} : vector<2x96xf32> to vector<2x32xf32>
    %823 = arith.addf %821, %822 : vector<2x32xf32>
    %cst_218 = arith.constant 5.000000e-01 : f32
    %824 = vector.broadcast %cst_218 : f32 to vector<2x32xf32>
    %825 = arith.mulf %824, %823 : vector<2x32xf32>
    %826 = math.tanh %825 : vector<2x32xf32>
    %cst_219 = arith.constant 1.000000e+00 : f32
    %827 = vector.broadcast %cst_219 : f32 to vector<2x32xf32>
    %828 = arith.addf %826, %827 : vector<2x32xf32>
    %cst_220 = arith.constant 5.000000e-01 : f32
    %829 = vector.broadcast %cst_220 : f32 to vector<2x32xf32>
    %830 = arith.mulf %829, %828 : vector<2x32xf32>
    %831 = vector.extract_strided_slice %817 {offsets = [0, 32], sizes = [2, 32], strides = [1, 1]} : vector<2x96xf32> to vector<2x32xf32>
    %832 = vector.extract_strided_slice %820 {offsets = [0, 32], sizes = [2, 32], strides = [1, 1]} : vector<2x96xf32> to vector<2x32xf32>
    %833 = arith.addf %831, %832 : vector<2x32xf32>
    %cst_221 = arith.constant 5.000000e-01 : f32
    %834 = vector.broadcast %cst_221 : f32 to vector<2x32xf32>
    %835 = arith.mulf %834, %833 : vector<2x32xf32>
    %836 = math.tanh %835 : vector<2x32xf32>
    %cst_222 = arith.constant 1.000000e+00 : f32
    %837 = vector.broadcast %cst_222 : f32 to vector<2x32xf32>
    %838 = arith.addf %836, %837 : vector<2x32xf32>
    %cst_223 = arith.constant 5.000000e-01 : f32
    %839 = vector.broadcast %cst_223 : f32 to vector<2x32xf32>
    %840 = arith.mulf %839, %838 : vector<2x32xf32>
    %841 = vector.extract_strided_slice %817 {offsets = [0, 64], sizes = [2, 32], strides = [1, 1]} : vector<2x96xf32> to vector<2x32xf32>
    %842 = vector.extract_strided_slice %820 {offsets = [0, 64], sizes = [2, 32], strides = [1, 1]} : vector<2x96xf32> to vector<2x32xf32>
    %843 = arith.mulf %830, %842 : vector<2x32xf32>
    %844 = arith.addf %841, %843 : vector<2x32xf32>
    %845 = math.tanh %844 : vector<2x32xf32>
    %cst_224 = arith.constant 1.000000e+00 : f32
    %846 = vector.broadcast %cst_224 : f32 to vector<2x32xf32>
    %847 = arith.subf %846, %840 : vector<2x32xf32>
    %848 = arith.mulf %847, %845 : vector<2x32xf32>
    %849 = arith.mulf %840, %816 : vector<2x32xf32>
    %850 = arith.addf %848, %849 : vector<2x32xf32>
    %c0_225 = arith.constant 0 : index
    %c0_226 = arith.constant 0 : index
    %851 = vector.load %arg14[%c0_225, %c0_226] : memref<64x96xf32, #tpu.memory_space<vmem>>, vector<64x96xf32>
    %c0_227 = arith.constant 0 : index
    %c0_228 = arith.constant 0 : index
    %852 = vector.load %arg15[%c0_227, %c0_228] : memref<1x96xf32, #tpu.memory_space<vmem>>, vector<1x96xf32>
    %c0_229 = arith.constant 0 : index
    %c0_230 = arith.constant 0 : index
    %853 = vector.load %arg16[%c0_229, %c0_230] : memref<32x96xf32, #tpu.memory_space<vmem>>, vector<32x96xf32>
    %c0_231 = arith.constant 0 : index
    %c0_232 = arith.constant 0 : index
    %854 = vector.load %arg17[%c0_231, %c0_232] : memref<1x96xf32, #tpu.memory_space<vmem>>, vector<1x96xf32>
    %cst_233 = arith.constant dense<0.000000e+00> : vector<16x96xf32>
    %855 = tpu.matmul %570, %851, %cst_233 {dimension_numbers = #tpu.dot_dimension_numbers<[1], [0], [0], [1], [0, 0, 1, 1], [], []>} : vector<16x64xf32>, vector<64x96xf32>, vector<16x96xf32> -> vector<16x96xf32>
    %856 = vector.broadcast %852 : vector<1x96xf32> to vector<16x96xf32>
    %857 = arith.addf %855, %856 : vector<16x96xf32>
    %cst_234 = arith.constant 0.000000e+00 : f32
    %858 = vector.broadcast %cst_234 : f32 to vector<2x32xf32>
    %859 = vector.extract_strided_slice %857 {offsets = [14, 0], sizes = [2, 96], strides = [1, 1]} : vector<16x96xf32> to vector<2x96xf32>
    %cst_235 = arith.constant dense<0.000000e+00> : vector<2x96xf32>
    %860 = tpu.matmul %858, %853, %cst_235 {dimension_numbers = #tpu.dot_dimension_numbers<[1], [0], [0], [1], [0, 0, 1, 1], [], []>} : vector<2x32xf32>, vector<32x96xf32>, vector<2x96xf32> -> vector<2x96xf32>
    %861 = vector.broadcast %854 : vector<1x96xf32> to vector<2x96xf32>
    %862 = arith.addf %860, %861 : vector<2x96xf32>
    %863 = vector.extract_strided_slice %859 {offsets = [0, 0], sizes = [2, 32], strides = [1, 1]} : vector<2x96xf32> to vector<2x32xf32>
    %864 = vector.extract_strided_slice %862 {offsets = [0, 0], sizes = [2, 32], strides = [1, 1]} : vector<2x96xf32> to vector<2x32xf32>
    %865 = arith.addf %863, %864 : vector<2x32xf32>
    %cst_236 = arith.constant 5.000000e-01 : f32
    %866 = vector.broadcast %cst_236 : f32 to vector<2x32xf32>
    %867 = arith.mulf %866, %865 : vector<2x32xf32>
    %868 = math.tanh %867 : vector<2x32xf32>
    %cst_237 = arith.constant 1.000000e+00 : f32
    %869 = vector.broadcast %cst_237 : f32 to vector<2x32xf32>
    %870 = arith.addf %868, %869 : vector<2x32xf32>
    %cst_238 = arith.constant 5.000000e-01 : f32
    %871 = vector.broadcast %cst_238 : f32 to vector<2x32xf32>
    %872 = arith.mulf %871, %870 : vector<2x32xf32>
    %873 = vector.extract_strided_slice %859 {offsets = [0, 32], sizes = [2, 32], strides = [1, 1]} : vector<2x96xf32> to vector<2x32xf32>
    %874 = vector.extract_strided_slice %862 {offsets = [0, 32], sizes = [2, 32], strides = [1, 1]} : vector<2x96xf32> to vector<2x32xf32>
    %875 = arith.addf %873, %874 : vector<2x32xf32>
    %cst_239 = arith.constant 5.000000e-01 : f32
    %876 = vector.broadcast %cst_239 : f32 to vector<2x32xf32>
    %877 = arith.mulf %876, %875 : vector<2x32xf32>
    %878 = math.tanh %877 : vector<2x32xf32>
    %cst_240 = arith.constant 1.000000e+00 : f32
    %879 = vector.broadcast %cst_240 : f32 to vector<2x32xf32>
    %880 = arith.addf %878, %879 : vector<2x32xf32>
    %cst_241 = arith.constant 5.000000e-01 : f32
    %881 = vector.broadcast %cst_241 : f32 to vector<2x32xf32>
    %882 = arith.mulf %881, %880 : vector<2x32xf32>
    %883 = vector.extract_strided_slice %859 {offsets = [0, 64], sizes = [2, 32], strides = [1, 1]} : vector<2x96xf32> to vector<2x32xf32>
    %884 = vector.extract_strided_slice %862 {offsets = [0, 64], sizes = [2, 32], strides = [1, 1]} : vector<2x96xf32> to vector<2x32xf32>
    %885 = arith.mulf %872, %884 : vector<2x32xf32>
    %886 = arith.addf %883, %885 : vector<2x32xf32>
    %887 = math.tanh %886 : vector<2x32xf32>
    %cst_242 = arith.constant 1.000000e+00 : f32
    %888 = vector.broadcast %cst_242 : f32 to vector<2x32xf32>
    %889 = arith.subf %888, %882 : vector<2x32xf32>
    %890 = arith.mulf %889, %887 : vector<2x32xf32>
    %891 = arith.mulf %882, %858 : vector<2x32xf32>
    %892 = arith.addf %890, %891 : vector<2x32xf32>
    %893 = tpu.concatenate %850, %892 in 1 : vector<2x32xf32>, vector<2x32xf32> -> vector<2x64xf32>
    %c0_243 = arith.constant 0 : index
    %c0_244 = arith.constant 0 : index
    %894 = vector.load %arg18[%c0_243, %c0_244] : memref<64x128xf32, #tpu.memory_space<vmem>>, vector<64x128xf32>
    %cst_245 = arith.constant dense<0.000000e+00> : vector<2x128xf32>
    %895 = tpu.matmul %893, %894, %cst_245 {dimension_numbers = #tpu.dot_dimension_numbers<[1], [0], [0], [1], [0, 0, 1, 1], [], []>} : vector<2x64xf32>, vector<64x128xf32>, vector<2x128xf32> -> vector<2x128xf32>
    %c0_246 = arith.constant 0 : index
    %c0_247 = arith.constant 0 : index
    %896 = vector.load %arg19[%c0_246, %c0_247] : memref<1x128xf32, #tpu.memory_space<vmem>>, vector<1x128xf32>
    %897 = vector.broadcast %896 : vector<1x128xf32> to vector<2x128xf32>
    %898 = arith.addf %895, %897 : vector<2x128xf32>
    %c0_248 = arith.constant 0 : index
    %c0_249 = arith.constant 0 : index
    %899 = vector.load %arg20[%c0_248, %c0_249] : memref<1x128xf32, #tpu.memory_space<vmem>>, vector<1x128xf32>
    %900 = vector.broadcast %899 : vector<1x128xf32> to vector<2x128xf32>
    %901 = arith.mulf %898, %900 : vector<2x128xf32>
    %c0_250 = arith.constant 0 : index
    %c0_251 = arith.constant 0 : index
    %902 = vector.load %arg21[%c0_250, %c0_251] : memref<1x128xf32, #tpu.memory_space<vmem>>, vector<1x128xf32>
    %903 = vector.broadcast %902 : vector<1x128xf32> to vector<2x128xf32>
    %904 = arith.addf %901, %903 : vector<2x128xf32>
    %cst_252 = arith.constant 0.000000e+00 : f32
    %905 = vector.broadcast %cst_252 : f32 to vector<2x128xf32>
    %906 = arith.cmpf ogt, %904, %905 : vector<2x128xf32>
    %907 = math.exp %904 : vector<2x128xf32>
    %cst_253 = arith.constant 1.000000e+00 : f32
    %908 = vector.broadcast %cst_253 : f32 to vector<2x128xf32>
    %909 = arith.subf %907, %908 : vector<2x128xf32>
    %cst_254 = arith.constant 1.67326319 : f32
    %910 = vector.broadcast %cst_254 : f32 to vector<2x128xf32>
    %911 = arith.mulf %910, %909 : vector<2x128xf32>
    %912 = arith.select %906, %904, %911 : vector<2x128xi1>, vector<2x128xf32>
    %cst_255 = arith.constant 1.05070102 : f32
    %913 = vector.broadcast %cst_255 : f32 to vector<2x128xf32>
    %914 = arith.mulf %913, %912 : vector<2x128xf32>
    %c0_256 = arith.constant 0 : index
    %c0_257 = arith.constant 0 : index
    %915 = vector.load %arg22[%c0_256, %c0_257] : memref<128x16xf32, #tpu.memory_space<vmem>>, vector<128x16xf32>
    %cst_258 = arith.constant dense<0.000000e+00> : vector<2x16xf32>
    %916 = tpu.matmul %914, %915, %cst_258 {dimension_numbers = #tpu.dot_dimension_numbers<[1], [0], [0], [1], [0, 0, 1, 1], [], []>} : vector<2x128xf32>, vector<128x16xf32>, vector<2x16xf32> -> vector<2x16xf32>
    %c0_259 = arith.constant 0 : index
    %c0_260 = arith.constant 0 : index
    %917 = vector.load %arg23[%c0_259, %c0_260] : memref<1x16xf32, #tpu.memory_space<vmem>>, vector<1x16xf32>
    %918 = vector.broadcast %917 : vector<1x16xf32> to vector<2x16xf32>
    %919 = arith.addf %916, %918 : vector<2x16xf32>
    %c0_261 = arith.constant 0 : index
    %c0_262 = arith.constant 0 : index
    %920 = vector.load %arg24[%c0_261, %c0_262] : memref<1x16xf32, #tpu.memory_space<vmem>>, vector<1x16xf32>
    %921 = vector.broadcast %920 : vector<1x16xf32> to vector<2x16xf32>
    %922 = arith.mulf %919, %921 : vector<2x16xf32>
    %c0_263 = arith.constant 0 : index
    %c0_264 = arith.constant 0 : index
    %923 = vector.load %arg25[%c0_263, %c0_264] : memref<1x16xf32, #tpu.memory_space<vmem>>, vector<1x16xf32>
    %924 = vector.broadcast %923 : vector<1x16xf32> to vector<2x16xf32>
    %925 = arith.addf %922, %924 : vector<2x16xf32>
    %cst_265 = arith.constant 0.000000e+00 : f32
    %926 = vector.broadcast %cst_265 : f32 to vector<2x16xf32>
    %927 = arith.cmpf ogt, %925, %926 : vector<2x16xf32>
    %928 = math.exp %925 : vector<2x16xf32>
    %cst_266 = arith.constant 1.000000e+00 : f32
    %929 = vector.broadcast %cst_266 : f32 to vector<2x16xf32>
    %930 = arith.subf %928, %929 : vector<2x16xf32>
    %cst_267 = arith.constant 1.67326319 : f32
    %931 = vector.broadcast %cst_267 : f32 to vector<2x16xf32>
    %932 = arith.mulf %931, %930 : vector<2x16xf32>
    %933 = arith.select %927, %925, %932 : vector<2x16xi1>, vector<2x16xf32>
    %cst_268 = arith.constant 1.05070102 : f32
    %934 = vector.broadcast %cst_268 : f32 to vector<2x16xf32>
    %935 = arith.mulf %934, %933 : vector<2x16xf32>
    %c0_269 = arith.constant 0 : index
    %c0_270 = arith.constant 0 : index
    %936 = vector.load %arg26[%c0_269, %c0_270] : memref<16x2xf32, #tpu.memory_space<vmem>>, vector<16x2xf32>
    %cst_271 = arith.constant dense<0.000000e+00> : vector<2x2xf32>
    %937 = tpu.matmul %935, %936, %cst_271 {dimension_numbers = #tpu.dot_dimension_numbers<[1], [0], [0], [1], [0, 0, 1, 1], [], []>} : vector<2x16xf32>, vector<16x2xf32>, vector<2x2xf32> -> vector<2x2xf32>
    %c0_272 = arith.constant 0 : index
    %c0_273 = arith.constant 0 : index
    %938 = vector.load %arg27[%c0_272, %c0_273] : memref<1x2xf32, #tpu.memory_space<vmem>>, vector<1x2xf32>
    %939 = vector.broadcast %938 : vector<1x2xf32> to vector<2x2xf32>
    %940 = arith.addf %937, %939 : vector<2x2xf32>
    %cst_274 = arith.constant 5.000000e-01 : f32
    %941 = vector.broadcast %cst_274 : f32 to vector<2x2xf32>
    %942 = arith.mulf %941, %940 : vector<2x2xf32>
    %943 = math.tanh %942 : vector<2x2xf32>
    %cst_275 = arith.constant 1.000000e+00 : f32
    %944 = vector.broadcast %cst_275 : f32 to vector<2x2xf32>
    %945 = arith.addf %943, %944 : vector<2x2xf32>
    %cst_276 = arith.constant 5.000000e-01 : f32
    %946 = vector.broadcast %cst_276 : f32 to vector<2x2xf32>
    %947 = arith.mulf %946, %945 : vector<2x2xf32>
    %c0_277 = arith.constant 0 : index
    %c0_278 = arith.constant 0 : index
    %948 = vector.load %arg28[%c0_277, %c0_278] : memref<2x2xf32, #tpu.memory_space<vmem>>, vector<2x2xf32>
    tpu.vector_store %arg28[%c0_277, %c0_278], %947 {strides = array<i32>} : memref<2x2xf32, #tpu.memory_space<vmem>>, vector<2x2xf32>,
    return
  }
}

</mosaic_0001>

<bundles_post_ra>
// kernel: birnn_forward.1
= control target key start
LH: loop header
LB: loop body
LE: loop exit
PB: predicated region body
PF: predicated region fallthrough
CT: control target
= control target key end

     0   :  { %s6062_s0 = inlined_call_operand.vmem [shape: s32[16,1], index: 0, kind: input, shape index: {}]   ;;  %s6063_s1 = inlined_call_operand.vmem [shape: f32[50,32], index: 1, kind: input, shape index: {}]   ;;  %s6064_s2 = inlined_call_operand.vmem [shape: f32[32,96], index: 2, kind: input, shape index: {}]   ;;  %s6065_s3 = inlined_call_operand.hbm [shape: f32[1,96], index: 3, kind: input, shape index: {}]   ;;  %s6066_s4 = inlined_call_operand.vmem [shape: f32[32,96], index: 4, kind: input, shape index: {}]   ;;  %s6067_s5 = inlined_call_operand.hbm [shape: f32[1,96], index: 5, kind: input, shape index: {}]   ;;  %s6068_s6 = inlined_call_operand.vmem [shape: f32[32,96], index: 6, kind: input, shape index: {}]   ;;  %s6069_s7 = inlined_call_operand.hbm [shape: f32[1,96], index: 7, kind: input, shape index: {}]   ;;  %s6070_s8 = inlined_call_operand.vmem [shape: f32[32,96], index: 8, kind: input, shape index: {}]   ;;  %s6071_s9 = inlined_call_operand.hbm [shape: f32[1,96], index: 9, kind: input, shape index: {}]   ;;  %s6072_s10 = inlined_call_operand.vmem [shape: f32[64,96], index: 10, kind: input, shape index: {}]   ;;  %s6073_s11 = inlined_call_operand.vmem [shape: f32[1,96], index: 11, kind: input, shape index: {}]   ;;  %s6074_s12 = inlined_call_operand.vmem [shape: f32[32,96], index: 12, kind: input, shape index: {}]   ;;  %s6075_s13 = inlined_call_operand.vmem [shape: f32[1,96], index: 13, kind: input, shape index: {}]   ;;  %s6076_s14 = inlined_call_operand.vmem [shape: f32[64,96], index: 14, kind: input, shape index: {}]   ;;  %s6077_s15 = inlined_call_operand.vmem [shape: f32[1,96], index: 15, kind: input, shape index: {}]   ;;  %s6078_s16 = inlined_call_operand.hbm [shape: f32[32,96], index: 16, kind: input, shape index: {}]   ;;  %s6079_s17 = inlined_call_operand.vmem [shape: f32[1,96], index: 17, kind: input, shape index: {}]   ;;  %s6080_s18 = inlined_call_operand.vmem [shape: f32[64,128], index: 18, kind: input, shape index: {}]   ;;  %s6081_s19 = inlined_call_operand.hbm [shape: f32[1,128], index: 19, kind: input, shape index: {}]   ;;  %s6082_s20 = inlined_call_operand.hbm [shape: f32[1,128], index: 20, kind: input, shape index: {}]   ;;  %s6083_s21 = inlined_call_operand.hbm [shape: f32[1,128], index: 21, kind: input, shape index: {}]   ;;  %s6084_s22 = inlined_call_operand.vmem [shape: f32[128,16], index: 22, kind: input, shape index: {}]   ;;  %s6085_s23 = inlined_call_operand.hbm [shape: f32[1,16], index: 23, kind: input, shape index: {}]   ;;  %s6086_s24 = inlined_call_operand.hbm [shape: f32[1,16], index: 24, kind: input, shape index: {}]   ;;  %s6087_s25 = inlined_call_operand.hbm [shape: f32[1,16], index: 25, kind: input, shape index: {}]   ;;  %s6088_s26 = inlined_call_operand.vmem [shape: f32[16,2], index: 26, kind: input, shape index: {}]   ;;  %s6089_s27 = inlined_call_operand.hbm [shape: f32[1,2], index: 27, kind: input, shape index: {}]   ;;  %s6090_s28 = inlined_call_operand.hbm [shape: f32[2,2], index: 28, kind: output, shape index: {}]  }
   0x1   :  { %6103 = sst [smem:[#allocation31_spill]] %s6062_s0 }
   0x2   :  { %6104 = sst [smem:[#allocation32_spill]] %s6063_s1 }
   0x3   :  { %6105 = sst [smem:[#allocation33_spill]] %s6064_s2 }
   0x4   :  { %6106 = sst [smem:[#allocation34_spill]] %s6065_s3 }
   0x5   :  { %6107 = sst [smem:[#allocation35_spill]] %s6066_s4 }
   0x6   :  { %6108 = sst [smem:[#allocation36_spill]] %s6067_s5 }
   0x7   :  { %6109 = sst [smem:[#allocation37_spill]] %s6068_s6 }
   0x8   :  { %6110 = sst [smem:[#allocation38_spill]] %s6069_s7 }
   0x9   :  { %6111 = sst [smem:[#allocation39_spill]] %s6070_s8 }
   0xa   :  { %6112 = sst [smem:[#allocation40_spill]] %s6071_s9 }
   0xb   :  { %6113 = sst [smem:[#allocation41_spill]] %s6072_s10 }
   0xc   :  { %6114 = sst [smem:[#allocation42_spill]] %s6073_s11 }
   0xd   :  { %6115 = sst [smem:[#allocation43_spill]] %s6074_s12 }
   0xe   :  { %33 = vsyncpa [#allocation3], 0 }
   0xf   :  { %34 = vsyncpa [#allocation6], 0 }
  0x10   :  { %35 = vsyncpa [#allocation9], 0 }
  0x11   :  { %36 = vsyncpa [#allocation12], 0 }
  0x12   :  { %37 = vsyncpa [#allocation15], 0 }
  0x13   :  { %38 = vsyncpa [#allocation18], 0 }
  0x14   :  { %39 = vsyncpa [#allocation21], 0 }
  0x15   :  { %40 = vsyncpa [#allocation4], 0  ;;  %s5006_s8 = smov [#allocation5]   ;;  %s5007_s9 = smov [#allocation8]  }
  0x16   :  { %s65_s5 = sshll.u32 %s5006_s8, 4  ;;  %s89_s30 = sshll.u32 %s5007_s9, 4  ;;  %s66_s5 = int_to_ptr.vmem [resolvable:$true] %s65_s5  ;;  %s90_s30 = int_to_ptr.vmem [resolvable:$true] %s89_s30 }
  0x17   :  { %s6116_s10 = sld [smem:[#allocation36_spill]] }
  0x1d   :  { %s4704_s0 = scalar_lea.hbm %s6116_s10, 16 }
  0x1e   :  { %p4705_p0 = scmp.ne.s32.totalorder %s6116_s10, %s4704_s0  ;;  %p4708_p1 = scmp.lt.u32.totalorder %s4704_s0, %s6116_s10 }
  0x20   :  { %p4710_p2 = pnand %p4708_p1, %p4705_p0 }
  0x22   :  { %4713 = shalt.err (!%p4710_p2)
}
  0x23   :  { %s4714_s12 = scalar_lea.vmem %s66_s5, 16  ;;  %s4718_s1 = scalar_lea.vmem %s66_s5, 32 }
  0x24   :  { %p4715_p3 = scmp.ne.s32.totalorder %s66_s5, %s4714_s12  ;;  %p4719_p4 = scmp.lt.s32.totalorder %s66_s5, %s66_s5 }
  0x25   :  { %p4720_p5 = scmp.lt.s32.totalorder %s4718_s1, %s4714_s12 }
  0x27   :  { %p4721_p6 = por %p4720_p5, %p4719_p4 }
  0x29   :  { %p4722_p7 = pnand %p4721_p6, %p4715_p3 }
  0x2b   :  { %4725 = shalt.err (!%p4722_p7)
}
  0x2c   :  { %68 = dma.hbm_to_vmem [thread:$0]  %s6116_s10, 16, %s66_s5, [#allocation6]  }
  0x2d   :  { %s6117_s6 = sld [smem:[#allocation40_spill]] }
  0x33   :  { %s4726_s11 = scalar_lea.hbm %s6117_s6, 16 }
  0x34   :  { %p4727_p8 = scmp.ne.s32.totalorder %s6117_s6, %s4726_s11  ;;  %p4730_p9 = scmp.lt.u32.totalorder %s4726_s11, %s6117_s6 }
  0x36   :  { %p4732_p10 = pnand %p4730_p9, %p4727_p8 }
  0x38   :  { %4735 = shalt.err (!%p4732_p10)
}
  0x39   :  { %s4736_s12 = scalar_lea.vmem %s90_s30, 16  ;;  %s4740_s1 = scalar_lea.vmem %s90_s30, 32 }
  0x3a   :  { %p4737_p11 = scmp.ne.s32.totalorder %s90_s30, %s4736_s12  ;;  %p4741_p12 = scmp.lt.s32.totalorder %s90_s30, %s90_s30 }
  0x3b   :  { %p4742_p13 = scmp.lt.s32.totalorder %s4740_s1, %s4736_s12 }
  0x3d   :  { %p4743_p0 = por %p4742_p13, %p4741_p12 }
  0x3f   :  { %p4744_p1 = pnand %p4743_p0, %p4737_p11 }
  0x41   :  { %4747 = shalt.err (!%p4744_p1)
}
  0x42   :  { %92 = dma.hbm_to_vmem [thread:$0]  %s6117_s6, 16, %s90_s30, [#allocation9]  }
  0x43   :  { %s5008_s4 = smov [#allocation11]   ;;  %s5009_s9 = smov [#allocation14]  }
  0x44   :  { %s127_s8 = sshll.u32 %s5008_s4, 4  ;;  %s147_s3 = sshll.u32 %s5009_s9, 4  ;;  %s128_s8 = int_to_ptr.vmem [resolvable:$true] %s127_s8  ;;  %s148_s3 = int_to_ptr.vmem [resolvable:$true] %s147_s3 }
  0x45   :  { %s4748_s0 = scalar_lea.hbm %s6081_s19, 16 }
  0x46   :  { %p4749_p2 = scmp.ne.s32.totalorder %s6081_s19, %s4748_s0  ;;  %p4752_p3 = scmp.lt.u32.totalorder %s4748_s0, %s6081_s19 }
  0x48   :  { %p4754_p4 = pnand %p4752_p3, %p4749_p2 }
  0x4a   :  { %4757 = shalt.err (!%p4754_p4)
}
  0x4b   :  { %s4758_s30 = scalar_lea.vmem %s128_s8, 16  ;;  %s4762_s6 = scalar_lea.vmem %s128_s8, 32 }
  0x4c   :  { %p4759_p5 = scmp.ne.s32.totalorder %s128_s8, %s4758_s30  ;;  %p4763_p6 = scmp.lt.s32.totalorder %s128_s8, %s128_s8 }
  0x4d   :  { %p4764_p7 = scmp.lt.s32.totalorder %s4762_s6, %s4758_s30 }
  0x4f   :  { %p4765_p8 = por %p4764_p7, %p4763_p6 }
  0x51   :  { %p4766_p9 = pnand %p4765_p8, %p4759_p5 }
  0x53   :  { %4769 = shalt.err (!%p4766_p9)
}
  0x54   :  { %130 = dma.hbm_to_vmem [thread:$0]  %s6081_s19, 16, %s128_s8, [#allocation12]  }
  0x55   :  { %s4770_s11 = scalar_lea.hbm %s6083_s21, 16 }
  0x56   :  { %p4771_p10 = scmp.ne.s32.totalorder %s6083_s21, %s4770_s11  ;;  %p4774_p11 = scmp.lt.u32.totalorder %s4770_s11, %s6083_s21 }
  0x58   :  { %p4776_p12 = pnand %p4774_p11, %p4771_p10 }
  0x5a   :  { %4779 = shalt.err (!%p4776_p12)
}
  0x5b   :  { %s4780_s12 = scalar_lea.vmem %s148_s3, 16  ;;  %s4784_s1 = scalar_lea.vmem %s148_s3, 32 }
  0x5c   :  { %p4781_p13 = scmp.ne.s32.totalorder %s148_s3, %s4780_s12  ;;  %p4785_p0 = scmp.lt.s32.totalorder %s148_s3, %s148_s3 }
  0x5d   :  { %p4786_p1 = scmp.lt.s32.totalorder %s4784_s1, %s4780_s12 }
  0x5f   :  { %p4787_p2 = por %p4786_p1, %p4785_p0 }
  0x61   :  { %p4788_p3 = pnand %p4787_p2, %p4781_p13 }
  0x63   :  { %4791 = shalt.err (!%p4788_p3)
}
  0x64   :  { %150 = dma.hbm_to_vmem [thread:$0]  %s6083_s21, 16, %s148_s3, [#allocation15]  }
  0x65   :  { %s5010_s30 = smov [#allocation17]   ;;  %s5011_s5 = smov [#allocation2]  }
  0x66   :  { %s169_s6 = sshll.u32 %s5010_s30, 4  ;;  %s53_s10 = sshll.u32 %s5011_s5, 4  ;;  %s170_s6 = int_to_ptr.vmem [resolvable:$true] %s169_s6  ;;  %s54_s10 = int_to_ptr.vmem [resolvable:$true] %s53_s10 }
  0x67   :  { %s4792_s11 = scalar_lea.hbm %s6086_s24, 16 }
  0x68   :  { %p4793_p4 = scmp.ne.s32.totalorder %s6086_s24, %s4792_s11  ;;  %p4796_p5 = scmp.lt.u32.totalorder %s4792_s11, %s6086_s24 }
  0x6a   :  { %p4798_p6 = pnand %p4796_p5, %p4793_p4 }
  0x6c   :  { %4801 = shalt.err (!%p4798_p6)
}
  0x6d   :  { %s4802_s21 = scalar_lea.vmem %s170_s6, 16  ;;  %s4806_s3 = scalar_lea.vmem %s170_s6, 32 }
  0x6e   :  { %p4803_p7 = scmp.ne.s32.totalorder %s170_s6, %s4802_s21  ;;  %p4807_p8 = scmp.lt.s32.totalorder %s170_s6, %s170_s6 }
  0x6f   :  { %p4808_p9 = scmp.lt.s32.totalorder %s4806_s3, %s4802_s21 }
  0x71   :  { %p4809_p10 = por %p4808_p9, %p4807_p8 }
  0x73   :  { %p4810_p11 = pnand %p4809_p10, %p4803_p7 }
  0x75   :  { %4813 = shalt.err (!%p4810_p11)
}
  0x76   :  { %172 = dma.hbm_to_vmem [thread:$0]  %s6086_s24, 16, %s170_s6, [#allocation18]  }
  0x77   :  { %s6118_s30 = sld [smem:[#allocation34_spill]] }
  0x7d   :  { %s4814_s5 = scalar_lea.hbm %s6118_s30, 16 }
  0x7e   :  { %p4815_p12 = scmp.ne.s32.totalorder %s6118_s30, %s4814_s5  ;;  %p4818_p13 = scmp.lt.u32.totalorder %s4814_s5, %s6118_s30 }
  0x80   :  { %p4820_p0 = pnand %p4818_p13, %p4815_p12 }
  0x82   :  { %4823 = shalt.err (!%p4820_p0)
}
  0x83   :  { %s4824_s0 = scalar_lea.vmem %s54_s10, 16  ;;  %s4828_s2 = scalar_lea.vmem %s54_s10, 32 }
  0x84   :  { %p4825_p1 = scmp.ne.s32.totalorder %s54_s10, %s4824_s0  ;;  %p4829_p2 = scmp.lt.s32.totalorder %s54_s10, %s54_s10 }
  0x85   :  { %p4830_p3 = scmp.lt.s32.totalorder %s4828_s2, %s4824_s0 }
  0x87   :  { %p4831_p4 = por %p4830_p3, %p4829_p2 }
  0x89   :  { %p4832_p5 = pnand %p4831_p4, %p4825_p1 }
  0x8b   :  { %4835 = shalt.err (!%p4832_p5)
}
  0x8c   :  { %56 = dma.hbm_to_vmem [thread:$0]  %s6118_s30, 16, %s54_s10, [#allocation3]  }
  0x8d   :  { %s5012_s7 = smov [#allocation7]   ;;  %s5013_s3 = smov [#allocation10]  }
  0x8e   :  { %s77_s21 = sshll.u32 %s5012_s7, 4  ;;  %s110_s12 = sshll.u32 %s5013_s3, 4  ;;  %s78_s21 = int_to_ptr.vmem [resolvable:$true] %s77_s21  ;;  %s5244_s12 = int_to_ptr.vmem [resolvable:$true] %s110_s12 }
  0x8f   :  { %s6119_s8 = sld [smem:[#allocation38_spill]] }
  0x95   :  { %s4836_s5 = scalar_lea.hbm %s6119_s8, 16 }
  0x96   :  { %p4837_p6 = scmp.ne.s32.totalorder %s6119_s8, %s4836_s5  ;;  %p4840_p7 = scmp.lt.u32.totalorder %s4836_s5, %s6119_s8 }
  0x98   :  { %p4842_p8 = pnand %p4840_p7, %p4837_p6 }
  0x9a   :  { %4845 = shalt.err (!%p4842_p8)
}
  0x9b   :  { %s4846_s10 = scalar_lea.vmem %s78_s21, 16  ;;  %s4850_s30 = scalar_lea.vmem %s78_s21, 32 }
  0x9c   :  { %p4847_p9 = scmp.ne.s32.totalorder %s78_s21, %s4846_s10  ;;  %p4851_p10 = scmp.lt.s32.totalorder %s78_s21, %s78_s21 }
  0x9d   :  { %p4852_p11 = scmp.lt.s32.totalorder %s4850_s30, %s4846_s10 }
  0x9f   :  { %p4853_p12 = por %p4852_p11, %p4851_p10 }
  0xa1   :  { %p4854_p13 = pnand %p4853_p12, %p4847_p9 }
  0xa3   :  { %4857 = shalt.err (!%p4854_p13)
}
  0xa4   :  { %80 = dma.hbm_to_vmem [thread:$0]  %s6119_s8, 16, %s78_s21, [#allocation6]  }
  0xa5   :  { %s4858_s7 = scalar_lea.hbm %s6078_s16, 512 }
  0xa6   :  { %p4859_p0 = scmp.ne.s32.totalorder %s6078_s16, %s4858_s7  ;;  %p4862_p1 = scmp.lt.u32.totalorder %s4858_s7, %s6078_s16 }
  0xa8   :  { %p4864_p2 = pnand %p4862_p1, %p4859_p0 }
  0xaa   :  { %4867 = shalt.err (!%p4864_p2)
}
  0xab   :  { %s4868_s4 = scalar_lea.vmem %s5244_s12, 512  ;;  %p4873_p4 = scmp.lt.s32.totalorder %s5244_s12, %s5244_s12 }
  0xac   :  { %p4869_p3 = scmp.ne.s32.totalorder %s5244_s12, %s4868_s4  ;;  %p4874_p5 = scmp.lt.s32.totalorder %s4868_s4, %s4868_s4 }
  0xae   :  { %p4875_p6 = por %p4874_p5, %p4873_p4 }
  0xb0   :  { %p4876_p7 = pnand %p4875_p6, %p4869_p3 }
  0xb2   :  { %4879 = shalt.err (!%p4876_p7)
}
  0xb3   :  { %s5014_s21 = smov 128   ;;  %s5015_s8 = smov 8  }
  0xb4   :  { %116 = dma.hbm_to_vmem [thread:$0]  %s6078_s16, 512, %s5244_s12, [#allocation9], %s5014_s21, %s5014_s21, %s5015_s8  }
  0xb5   :  { %s5016_s29 = smov [#allocation13]   ;;  %s5017_s30 = smov [#allocation16]  }
  0xb6   :  { %s137_s10 = sshll.u32 %s5016_s29, 4  ;;  %s159_s0 = sshll.u32 %s5017_s30, 4  ;;  %s138_s10 = int_to_ptr.vmem [resolvable:$true] %s137_s10  ;;  %s160_s0 = int_to_ptr.vmem [resolvable:$true] %s159_s0 }
  0xb7   :  { %s4880_s6 = scalar_lea.hbm %s6082_s20, 16 }
  0xb8   :  { %p4881_p8 = scmp.ne.s32.totalorder %s6082_s20, %s4880_s6  ;;  %p4884_p9 = scmp.lt.u32.totalorder %s4880_s6, %s6082_s20 }
  0xba   :  { %p4886_p10 = pnand %p4884_p9, %p4881_p8 }
  0xbc   :  { %4889 = shalt.err (!%p4886_p10)
}
  0xbd   :  { %s4890_s16 = scalar_lea.vmem %s138_s10, 16  ;;  %s4894_s12 = scalar_lea.vmem %s138_s10, 32 }
  0xbe   :  { %p4891_p11 = scmp.ne.s32.totalorder %s138_s10, %s4890_s16  ;;  %p4895_p12 = scmp.lt.s32.totalorder %s138_s10, %s138_s10 }
  0xbf   :  { %p4896_p13 = scmp.lt.s32.totalorder %s4894_s12, %s4890_s16 }
  0xc1   :  { %p4897_p0 = por %p4896_p13, %p4895_p12 }
  0xc3   :  { %p4898_p1 = pnand %p4897_p0, %p4891_p11 }
  0xc5   :  { %4901 = shalt.err (!%p4898_p1)
}
  0xc6   :  { %140 = dma.hbm_to_vmem [thread:$0]  %s6082_s20, 16, %s138_s10, [#allocation12]  }
  0xc7   :  { %s4902_s9 = scalar_lea.hbm %s6085_s23, 16 }
  0xc8   :  { %p4903_p2 = scmp.ne.s32.totalorder %s6085_s23, %s4902_s9  ;;  %p4906_p3 = scmp.lt.u32.totalorder %s4902_s9, %s6085_s23 }
  0xca   :  { %p4908_p4 = pnand %p4906_p3, %p4903_p2 }
  0xcc   :  { %4911 = shalt.err (!%p4908_p4)
}
  0xcd   :  { %s4912_s24 = scalar_lea.vmem %s160_s0, 16  ;;  %s4916_s6 = scalar_lea.vmem %s160_s0, 32 }
  0xce   :  { %p4913_p5 = scmp.ne.s32.totalorder %s160_s0, %s4912_s24  ;;  %p4917_p6 = scmp.lt.s32.totalorder %s160_s0, %s160_s0 }
  0xcf   :  { %p4918_p7 = scmp.lt.s32.totalorder %s4916_s6, %s4912_s24 }
  0xd1   :  { %p4919_p8 = por %p4918_p7, %p4917_p6 }
  0xd3   :  { %p4920_p9 = pnand %p4919_p8, %p4913_p5 }
  0xd5   :  { %4923 = shalt.err (!%p4920_p9)
}
  0xd6   :  { %162 = dma.hbm_to_vmem [thread:$0]  %s6085_s23, 16, %s160_s0, [#allocation15]  }
  0xd7   :  { %s5018_s7 = smov [#allocation19]   ;;  %s5019_s1 = smov [#allocation20]  }
  0xd8   :  { %s179_s3 = sshll.u32 %s5018_s7, 4  ;;  %s191_s19 = sshll.u32 %s5019_s1, 4  ;;  %s180_s3 = int_to_ptr.vmem [resolvable:$true] %s179_s3  ;;  %s192_s19 = int_to_ptr.vmem [resolvable:$true] %s191_s19 }
  0xd9   :  { %s4924_s5 = scalar_lea.hbm %s6087_s25, 16 }
  0xda   :  { %p4925_p10 = scmp.ne.s32.totalorder %s6087_s25, %s4924_s5  ;;  %p4928_p11 = scmp.lt.u32.totalorder %s4924_s5, %s6087_s25 }
  0xdc   :  { %p4930_p12 = pnand %p4928_p11, %p4925_p10 }
  0xde   :  { %4933 = shalt.err (!%p4930_p12)
}
  0xdf   :  { %s4934_s23 = scalar_lea.vmem %s180_s3, 16  ;;  %s4938_s0 = scalar_lea.vmem %s180_s3, 32 }
  0xe0   :  { %p4935_p13 = scmp.ne.s32.totalorder %s180_s3, %s4934_s23  ;;  %p4939_p0 = scmp.lt.s32.totalorder %s180_s3, %s180_s3 }
  0xe1   :  { %p4940_p1 = scmp.lt.s32.totalorder %s4938_s0, %s4934_s23 }
  0xe3   :  { %p4941_p2 = por %p4940_p1, %p4939_p0 }
  0xe5   :  { %p4942_p3 = pnand %p4941_p2, %p4935_p13 }
  0xe7   :  { %4945 = shalt.err (!%p4942_p3)
}
  0xe8   :  { %182 = dma.hbm_to_vmem [thread:$0]  %s6087_s25, 16, %s180_s3, [#allocation18]  }
  0xe9   :  { %s4946_s24 = scalar_lea.hbm %s6089_s27, 16 }
  0xea   :  { %p4947_p4 = scmp.ne.s32.totalorder %s6089_s27, %s4946_s24  ;;  %p4950_p5 = scmp.lt.u32.totalorder %s4946_s24, %s6089_s27 }
  0xec   :  { %p4952_p6 = pnand %p4950_p5, %p4947_p4 }
  0xee   :  { %4955 = shalt.err (!%p4952_p6)
}
  0xef   :  { %s4956_s1 = scalar_lea.vmem %s192_s19, 16  ;;  %s4960_s16 = scalar_lea.vmem %s192_s19, 32 }
  0xf0   :  { %p4957_p7 = scmp.ne.s32.totalorder %s192_s19, %s4956_s1  ;;  %p4961_p8 = scmp.lt.s32.totalorder %s192_s19, %s192_s19 }
  0xf1   :  { %p4962_p9 = scmp.lt.s32.totalorder %s4960_s16, %s4956_s1 }
  0xf3   :  { %p4963_p10 = por %p4962_p9, %p4961_p8 }
  0xf5   :  { %p4964_p11 = pnand %p4963_p10, %p4957_p7 }
  0xf7   :  { %4967 = shalt.err (!%p4964_p11)
}
  0xf8   :  { %194 = dma.hbm_to_vmem [thread:$0]  %s6089_s27, 16, %s192_s19, [#allocation21]  }
  0xf9   :  { %4990 = dma.done.wait [#allocation3], 16  }
  0xfa   :  { %4991 = vsyncadd [#allocation3], 4294967280 }
  0xfb   :  { %4992 = dma.done.wait [#allocation6], 32  }
  0xfc   :  { %4993 = vsyncadd [#allocation6], 4294967264 }
  0xfd   :  { %4994 = dma.done.wait [#allocation9], 528  }
  0xfe   :  { %4995 = vsyncadd [#allocation9], 4294966768 }
  0xff   :  { %4996 = dma.done.wait [#allocation12], 32  }
 0x100   :  { %4997 = vsyncadd [#allocation12], 4294967264 }
 0x101   :  { %4998 = dma.done.wait [#allocation15], 32  }
 0x102   :  { %4999 = vsyncadd [#allocation15], 4294967264 }
 0x103   :  { %5000 = dma.done.wait [#allocation18], 32  }
 0x104   :  { %5001 = vsyncadd [#allocation18], 4294967264 }
 0x105   :  { %5002 = dma.done.wait [#allocation21], 16  }
 0x106   :  { %5003 = vsyncadd [#allocation21], 4294967280  ;;  %v5020_v0 = vmov 0   ;;  %s6120_s4 = sld [smem:[#allocation31_spill]]  ;;  %s6121_s21 = sld [smem:[#allocation32_spill]]  ;;  %vm261_vm0 = vcmask 1041408   ;;  %v233_v19 = vlaneseq }
 0x107   :  { %4597 = vset.pattern.permute.xlu0 %v5020_v0  ;;  %s6122_s16 = sld [smem:[#allocation33_spill]]  ;;  %vm254_vm1 = vcmask 408576   ;;  %v5021_v22 = vmov 0.0   ;;  %s6123_s23 = sld [smem:[#allocation35_spill]]  ;;  %v5022_v29 = vmov 0.0|0.0   ;;  %vm5023_vm4 = vmmov 0  }
 0x108   :  { %v234_v20 = vand.u32 127, %v233_v19  ;;  %vm356_vm5 = vcmask 261120   ;;  %v3671_v35 = vld [vmem:[#allocation2] ss:$0 sm:$0xff]  ;;  %v5413_v39 = vld [vmem:[#allocation5] ss:$0 sm:$0xff] }
 0x109   :  { %s5024_s6 = smov 64   ;;  %s5025_s20 = smov 96   ;;  %vm2179_vm6 = vcmask 1043456   ;;  %vm2181_vm7 = vcmask 1045504   ;;  %vm2222_vm8 = vcmask 523264   ;;  %vm3565_vm11 = vcmask 130048  }
 0x10a   :  { %s6124_s1 = sld [smem:[#allocation37_spill]]  ;;  %s6125_s8 = sld [smem:[#allocation39_spill]]  ;;  %vm3643_vm12 = vcmask 9216  }
 0x10b   :  { %s6126_s24 = sld [smem:[#allocation43_spill]]  ;;  %s6128_s3 = sld [smem:[#allocation42_spill]] }
 0x10c   :  { %v231_v1 = vld [vmem:[%s6120_s4] sm:$0xff]  ;;  %v248_v3 = vld [vmem:[%s6121_s21 + $0x8] sm:$0xff]  ;;  %v249_v4 = vld [vmem:[%s6121_s21 + $0x10] sm:$0xff] }
 0x10d   :  { %v247_v2 = vld [vmem:[%s6121_s21] sm:$0xff]  ;;  %236 = vperm.xlu0 %4597, %v231_v1   ;;  %v250_v5 = vld [vmem:[%s6121_s21 + $0x18] sm:$0xff]  ;;  %v232_v6 = vld [vmem:[%s6120_s4 + $0x8] sm:$0xff]  ;;  %s6127_s4 = sld [smem:[#allocation41_spill]] }
 0x10e   :  { %v4327_v7 = vpack.c.bf16 %v248_v3, %v247_v2  ;;  %v4331_v8 = vpack.c.bf16 %v250_v5, %v249_v4  ;;  %v251_v9 = vld [vmem:[%s6121_s21 + $0x20] sm:$0xff]  ;;  %v252_v10 = vld [vmem:[%s6121_s21 + $0x28] sm:$0xff]  ;;  %v342_v14 = vld [vmem:[%s6122_s16 + $0x10] sm:$0xff] }
 0x10f   :  { %v4335_v11 = vpack.c.bf16 %v252_v10, %v251_v9  ;;  %v340_v12 = vld [vmem:[%s6122_s16] sm:$0xff]  ;;  %v341_v13 = vld [vmem:[%s6122_s16 + $0x8] sm:$0xff]  ;;  %v343_v16 = vld [vmem:[%s6122_s16 + $0x18] sm:$0xff] }
 0x110   :  { %4328 = vmatprep.subr.bf16.mxu0 %v4327_v7  ;;  %v4339_v15 = vpack.c.bf16 %v341_v13, %v340_v12  ;;  %v4343_v17 = vpack.c.bf16 %v343_v16, %v342_v14  ;;  %v253_v18 = vld [vmem:[%s6121_s21 + $0x30] sm:$0x3]  ;;  %v345_v26 = vld [vmem:[%s6123_s23] sm:$0xff]  ;;  %v346_v27 = vld [vmem:[%s6123_s23 + $0x8] sm:$0xff] }
 0x111   :  { %239 = vperm.xlu0 %4597, %v232_v6   ;;  %4330 = vmatpush3.bf16.msra.mxu0 %v4327_v7  ;;  %v5372_v28 = vpack.c.bf16 %v346_v27, %v345_v26  ;;  %v347_v30 = vld [vmem:[%s6123_s23 + $0x10] sm:$0xff]  ;;  %v348_v31 = vld [vmem:[%s6123_s23 + $0x18] sm:$0xff] }
 0x112   :  { %4332 = vmatprep.subr.bf16.mxu0 %v4331_v8  ;;  %4340 = vmatprep.subr.bf16.mxu1 %v4339_v15  ;;  %v5384_v32 = vpack.c.bf16 %v348_v31, %v347_v30 }
 0x113   :  { %4342 = vmatpush3.bf16.msra.mxu1 %v4339_v15 }
 0x114   :  { %4344 = vmatprep.subr.bf16.mxu1 %v4343_v17 }
 0x115   :  { %4334 = vmatpush3.bf16.msra.mxu0 %v4331_v8 }
 0x116   :  { %4336 = vmatprep.subr.bf16.mxu0 %v4335_v11 }
 0x117   :  { %4346 = vmatpush3.bf16.msra.mxu1 %v4343_v17 }
 0x118   :  { %4347 = vmatprep.subr.bf16.mxu1 %v5022_v29 }
 0x119   :  { %4338 = vmatpush3.bf16.msra.mxu0 %v4335_v11 }
 0x11a   :  { %3926 = vmatprep.subr.msk.mxu0 %vm261_vm0, %v253_v18 }
 0x11d   :  { %3927 = vmatpush3.msk.msra.mxu0 %vm261_vm0, %v253_v18 }
 0x11e   :  { %4365 = vmatprep.subr.bf16.mxu0 %v5022_v29 }
 0x18c   :  { %v237_v21 = vpop.permute.xlu0 %236 }
 0x18d   :  { %vm241_vm2 = vcmp.eq.s32.totalorder %v237_v21, %v234_v20 }
 0x18e   :  { %v3666_v23 = vsel %vm241_vm2, 1.0, %v5021_v22 }
 0x18f   :  { %3928 = vmatprep.mubr.msk.f32.mxu0 %vm254_vm1, %v3666_v23 }
 0x190   :  { %v240_v24 = vpop.permute.xlu0 %239 }
 0x191   :  { %vm242_vm3 = vcmp.eq.s32.totalorder %v240_v24, %v234_v20 }
 0x192   :  { %v3667_v25 = vsel %vm242_vm3, 1.0, %v5021_v22 }
 0x193   :  { %3929 = vmatmul.mubr.msk.f32.vlgmr.msra.gmra.mrb[0].mxu0 %vm254_vm1, %v3667_v25 }
 0x194   :  { %4367 = vmatpush3.bf16.msra.mxu0 %v5372_v28  ;;  %3983 = vmatprep.mubr.msk.f32.mxu0 %vm5023_vm4, %v5021_v22 }
 0x195   :  { %4368 = vmatprep.subr.bf16.mxu0 %v5022_v29 }
 0x198   :  { %4370 = vmatpush3.bf16.msra.mxu0 %v5384_v32 }
 0x199   :  { %4377 = vmatprep.subr.bf16.mxu0 %v5022_v29 }
 0x266   :  { %v5390_v33 = vpop.f32.mrb[0].mxu0 }
 0x267   :  { %v5392_v34 = vpop.f32.mrb[1].mxu0 }
 0x268   :  { %3939 = vmatprep.mubr.msk.f32.mxu1 %vm356_vm5, %v5392_v34 }
 0x269   :  { %3940 = vmatmul.mubr.msk.f32.vlgmr.msra.gmra.mrb[0].mxu1 %vm356_vm5, %v5390_v33 }
 0x26a   :  { %4349 = vmatpush3.bf16.msra.mxu1 %v5372_v28  ;;  %3950 = vmatprep.mubr.msk.f32.mxu1 %vm5023_vm4, %v5021_v22 }
 0x26b   :  { %4350 = vmatprep.subr.bf16.mxu1 %v5022_v29 }
 0x26e   :  { %4352 = vmatpush3.bf16.msra.mxu1 %v5384_v32 }
 0x26f   :  { %4353 = vmatprep.subr.bf16.mxu1 %v5022_v29 }
 0x271   :  { %3951 = vmatmul.mubr.f32.vlgmr.msra.gmra.mrb[2].mxu1 %v5021_v22 }
 0x272   :  { %4355 = vmatpush3.bf16.msra.mxu1 %v5372_v28  ;;  %3961 = vmatprep.mubr.msk.f32.mxu1 %vm5023_vm4, %v5021_v22 }
 0x273   :  { %4356 = vmatprep.subr.bf16.mxu1 %v5022_v29 }
 0x276   :  { %4358 = vmatpush3.bf16.msra.mxu1 %v5384_v32 }
 0x277   :  { %4359 = vmatprep.subr.bf16.mxu1 %v5022_v29 }
 0x33c   :  { %v3941_v36 = vpop.f32.mrb[0].mxu1 }
 0x33d   :  { %v5411_v37 = vadd.f32 %v3941_v36, %v3671_v35  ;;  %v429_v38 = vpop.f32.mrb[1].mxu1 }
 0x33e   :  { %v5417_v43 = vadd.f32 %v3671_v35, %v429_v38 }
 0x344   :  { %v513_v40 = vpop.f32.mrb[2].mxu1 }
 0x345   :  { %v514_v41 = vadd.f32 %v5413_v39, %v513_v40  ;;  %v3952_v42 = vpop.f32.mrb[3].mxu1 }
 0x347   :  { %523 = vrot.lane.b32.xlu1 %v514_v41, %s5024_s6  ;;  %v517_v44 = vadd.f32 %v514_v41, %v5417_v43 }
 0x349   :  { %v518_v45 = vmul.f32 0.5, %v517_v44 }
 0x34b   :  { %4598 = vtanh.f32 %v518_v45 }
 0x355   :  { %v4599_v46 = vpop.eup %4598 }
 0x356   :  { %v520_v47 = vadd.f32 1.0, %v4599_v46 }
 0x358   :  { %v521_v48 = vmul.f32 0.5, %v520_v47 }
 0x35a   :  { %v533_v54 = vsub.f32 1.0, %v521_v48  ;;  %v539_v56 = vmul.f32 0.0, %v521_v48 }
 0x3b9   :  { %v524_v49 = vpop.permute.xlu1 %523 }
 0x3ba   :  { %v526_v50 = vmul.f32 %v524_v49, %v521_v48 }
 0x3bc   :  { %528 = vrot.lane.b32.xlu1 %v526_v50, %s5024_s6 }
 0x42e   :  { %v529_v51 = vpop.permute.xlu1 %528 }
 0x42f   :  { %v531_v52 = vadd.f32 %v529_v51, %v5417_v43 }
 0x431   :  { %4600 = vtanh.f32 %v531_v52 }
 0x43b   :  { %v4601_v53 = vpop.eup %4600 }
 0x43c   :  { %535 = vrot.lane.b32.xlu0 %v4601_v53, %s5025_s20 }
 0x4ae   :  { %v536_v55 = vpop.permute.xlu0 %535 }
 0x4af   :  { %v538_v57 = vmul.f32 %v536_v55, %v533_v54 }
 0x4b1   :  { %v5423_v58 = vadd.f32 %v539_v56, %v538_v57 }
 0x4b3   :  { %542 = vrot.lane.b32.xlu1 %v5423_v58, %s5025_s20  ;;  %v640_v11 = vrot.slane %v5423_v58, 6 }
 0x525   :  { %v543_v59 = vpop.permute.xlu1 %542 }
 0x526   :  { %3962 = vmatmul.mubr.msk.f32.vlgmr.msra.gmra.mrb[4].mxu1 %vm356_vm5, %v543_v59 }
 0x527   :  { %4361 = vmatpush3.bf16.msra.mxu1 %v5372_v28  ;;  %3972 = vmatprep.mubr.msk.f32.mxu1 %vm5023_vm4, %v5021_v22 }
 0x528   :  { %4362 = vmatprep.subr.bf16.mxu1 %v5022_v29 }
 0x52b   :  { %4364 = vmatpush3.bf16.msra.mxu1 %v5384_v32 }
 0x52c   :  { %4371 = vmatprep.subr.bf16.mxu1 %v5022_v29 }
 0x5f9   :  { %v612_v60 = vpop.f32.mrb[4].mxu1 }
 0x5fa   :  { %v613_v61 = vadd.f32 %v5413_v39, %v612_v60  ;;  %v3963_v62 = vpop.f32.mrb[5].mxu1 }
 0x5fc   :  { %v617_v63 = vrot.slane %v613_v61, 6 }
 0x5fe   :  { %624 = vrot.lane.b32.xlu0 %v617_v63, %s5024_s6  ;;  %v619_v0 = vadd.f32 %v617_v63, %v5417_v43 }
 0x600   :  { %v620_v1 = vmul.f32 0.5, %v619_v0 }
 0x602   :  { %4602 = vtanh.f32 %v620_v1 }
 0x60c   :  { %v4603_v2 = vpop.eup %4602 }
 0x60d   :  { %v622_v3 = vadd.f32 1.0, %v4603_v2 }
 0x60f   :  { %v623_v4 = vmul.f32 0.5, %v622_v3 }
 0x611   :  { %v634_v10 = vsub.f32 1.0, %v623_v4  ;;  %v642_v14 = vmul.f32 %v640_v11, %v623_v4 }
 0x670   :  { %v625_v5 = vpop.permute.xlu0 %624 }
 0x671   :  { %v627_v6 = vmul.f32 %v625_v5, %v623_v4 }
 0x673   :  { %629 = vrot.lane.b32.xlu1 %v627_v6, %s5024_s6 }
 0x6e5   :  { %v630_v7 = vpop.permute.xlu1 %629 }
 0x6e6   :  { %v632_v8 = vadd.f32 %v630_v7, %v5417_v43 }
 0x6e8   :  { %4604 = vtanh.f32 %v632_v8 }
 0x6f2   :  { %v4605_v9 = vpop.eup %4604 }
 0x6f3   :  { %636 = vrot.lane.b32.xlu0 %v4605_v9, %s5025_s20 }
 0x765   :  { %v637_v12 = vpop.permute.xlu0 %636 }
 0x766   :  { %v639_v13 = vmul.f32 %v637_v12, %v634_v10 }
 0x768   :  { %v643_v15 = vadd.f32 %v642_v14, %v639_v13 }
 0x76a   :  { %v645_v16 = vrot.slane %v643_v15, 2  ;;  %v744_v41 = vrot.slane %v643_v15, 6  ;;  %v2178_v47 = vsel %vm261_vm0, %v5423_v58, %v643_v15 }
 0x76c   :  { %646 = vrot.lane.b32.xlu1 %v645_v16, %s5025_s20 }
 0x7de   :  { %v647_v17 = vpop.permute.xlu1 %646 }
 0x7df   :  { %3973 = vmatmul.mubr.msk.f32.vlgmr.msra.gmra.mrb[6].mxu1 %vm356_vm5, %v647_v17 }
 0x7e0   :  { %4373 = vmatpush3.bf16.msra.mxu1 %v5372_v28  ;;  %3994 = vmatprep.mubr.msk.f32.mxu1 %vm5023_vm4, %v5021_v22 }
 0x7e1   :  { %4374 = vmatprep.subr.bf16.mxu1 %v5022_v29 }
 0x7e4   :  { %4376 = vmatpush3.bf16.msra.mxu1 %v5384_v32 }
 0x7e5   :  { %4383 = vmatprep.subr.bf16.mxu1 %v5022_v29 }
 0x8b2   :  { %v716_v18 = vpop.f32.mrb[6].mxu1 }
 0x8b3   :  { %v717_v19 = vadd.f32 %v5413_v39, %v716_v18  ;;  %v3974_v20 = vpop.f32.mrb[7].mxu1 }
 0x8b5   :  { %v721_v21 = vrot.slane %v717_v19, 4 }
 0x8b7   :  { %728 = vrot.lane.b32.xlu0 %v721_v21, %s5024_s6  ;;  %v723_v23 = vadd.f32 %v721_v21, %v5417_v43 }
 0x8b9   :  { %v724_v24 = vmul.f32 0.5, %v723_v23 }
 0x8bb   :  { %4606 = vtanh.f32 %v724_v24 }
 0x8c5   :  { %v4607_v25 = vpop.eup %4606 }
 0x8c6   :  { %v726_v26 = vadd.f32 1.0, %v4607_v25 }
 0x8c8   :  { %v727_v27 = vmul.f32 0.5, %v726_v26 }
 0x8ca   :  { %v738_v40 = vsub.f32 1.0, %v727_v27  ;;  %v746_v44 = vmul.f32 %v744_v41, %v727_v27 }
 0x929   :  { %v729_v30 = vpop.permute.xlu0 %728 }
 0x92a   :  { %v731_v31 = vmul.f32 %v729_v30, %v727_v27 }
 0x92c   :  { %733 = vrot.lane.b32.xlu1 %v731_v31, %s5024_s6 }
 0x99e   :  { %v734_v35 = vpop.permute.xlu1 %733 }
 0x99f   :  { %v736_v36 = vadd.f32 %v734_v35, %v5417_v43 }
 0x9a1   :  { %4608 = vtanh.f32 %v736_v36 }
 0x9ab   :  { %v4609_v38 = vpop.eup %4608 }
 0x9ac   :  { %740 = vrot.lane.b32.xlu0 %v4609_v38, %s5025_s20 }
 0xa1e   :  { %v741_v42 = vpop.permute.xlu0 %740 }
 0xa1f   :  { %v743_v45 = vmul.f32 %v741_v42, %v738_v40 }
 0xa21   :  { %v747_v46 = vadd.f32 %v746_v44, %v743_v45 }
 0xa23   :  { %v749_v48 = vrot.slane %v747_v46, 4  ;;  %v2180_v49 = vsel %vm2179_vm6, %v2178_v47, %v747_v46  ;;  %v848_v2 = vrot.slane %v747_v46, 6 }
 0xa25   :  { %750 = vrot.lane.b32.xlu1 %v749_v48, %s5025_s20  ;;  %v1264_v48 = vld [vmem:[%s6124_s1] sm:$0xff] }
 0xa97   :  { %v751_v50 = vpop.permute.xlu1 %750 }
 0xa98   :  { %3984 = vmatmul.mubr.msk.f32.vlgmr.msra.gmra.mrb[2].mxu0 %vm356_vm5, %v751_v50 }
 0xa99   :  { %4379 = vmatpush3.bf16.msra.mxu0 %v5372_v28  ;;  %4005 = vmatprep.mubr.msk.f32.mxu0 %vm5023_vm4, %v5021_v22 }
 0xa9a   :  { %4380 = vmatprep.subr.bf16.mxu0 %v5022_v29 }
 0xa9d   :  { %4382 = vmatpush3.bf16.msra.mxu0 %v5384_v32 }
 0xa9e   :  { %4389 = vmatprep.subr.bf16.mxu0 %v5022_v29 }
 0xb6b   :  { %v820_v51 = vpop.f32.mrb[2].mxu0 }
 0xb6c   :  { %v821_v52 = vadd.f32 %v5413_v39, %v820_v51  ;;  %v3985_v53 = vpop.f32.mrb[3].mxu0 }
 0xb6e   :  { %v825_v54 = vrot.slane %v821_v52, 2 }
 0xb70   :  { %832 = vrot.lane.b32.xlu0 %v825_v54, %s5024_s6  ;;  %v827_v55 = vadd.f32 %v825_v54, %v5417_v43 }
 0xb72   :  { %v828_v56 = vmul.f32 0.5, %v827_v55 }
 0xb74   :  { %4610 = vtanh.f32 %v828_v56 }
 0xb7e   :  { %v4611_v57 = vpop.eup %4610 }
 0xb7f   :  { %v830_v58 = vadd.f32 1.0, %v4611_v57 }
 0xb81   :  { %v831_v59 = vmul.f32 0.5, %v830_v58 }
 0xb83   :  { %v842_v1 = vsub.f32 1.0, %v831_v59  ;;  %v850_v4 = vmul.f32 %v848_v2, %v831_v59 }
 0xbe2   :  { %v833_v60 = vpop.permute.xlu0 %832 }
 0xbe3   :  { %v835_v61 = vmul.f32 %v833_v60, %v831_v59  ;;  %v1266_v59 = vld [vmem:[%s6124_s1 + $0x10] sm:$0xff]  ;;  %v1267_v60 = vld [vmem:[%s6124_s1 + $0x18] sm:$0xff] }
 0xbe5   :  { %837 = vrot.lane.b32.xlu1 %v835_v61, %s5024_s6  ;;  %v4399_v61 = vpack.c.bf16 %v1267_v60, %v1266_v59 }
 0xc57   :  { %v838_v62 = vpop.permute.xlu1 %837 }
 0xc58   :  { %v840_v63 = vadd.f32 %v838_v62, %v5417_v43 }
 0xc5a   :  { %4612 = vtanh.f32 %v840_v63 }
 0xc64   :  { %v4613_v0 = vpop.eup %4612 }
 0xc65   :  { %844 = vrot.lane.b32.xlu0 %v4613_v0, %s5025_s20 }
 0xcd7   :  { %v845_v3 = vpop.permute.xlu0 %844 }
 0xcd8   :  { %v847_v5 = vmul.f32 %v845_v3, %v842_v1  ;;  %v3682_v3 = vld [vmem:[#allocation7] ss:$0 sm:$0xff] }
 0xcda   :  { %v851_v6 = vadd.f32 %v850_v4, %v847_v5 }
 0xcdc   :  { %v853_v7 = vrot.slane %v851_v6, 6  ;;  %v5473_v8 = vsel %vm2181_vm7, %v2180_v49, %v851_v6  ;;  %v1265_v49 = vld [vmem:[%s6124_s1 + $0x8] sm:$0xff] }
 0xcdd   :  { %v4395_v50 = vpack.c.bf16 %v1265_v49, %v1264_v48 }
 0xcde   :  { %854 = vrot.lane.b32.xlu1 %v853_v7, %s5025_s20 }
 0xd50   :  { %v855_v9 = vpop.permute.xlu1 %854 }
 0xd51   :  { %3995 = vmatmul.mubr.msk.f32.vlgmr.msra.gmra.mrb[8].mxu1 %vm356_vm5, %v855_v9 }
 0xd52   :  { %4385 = vmatpush3.bf16.msra.mxu1 %v5372_v28  ;;  %4016 = vmatprep.mubr.msk.f32.mxu1 %vm5023_vm4, %v5021_v22 }
 0xd53   :  { %4386 = vmatprep.subr.bf16.mxu1 %v5022_v29 }
 0xd56   :  { %4388 = vmatpush3.bf16.msra.mxu1 %v5384_v32 }
 0xd57   :  { %4396 = vmatprep.subr.bf16.mxu1 %v4395_v50 }
 0xe24   :  { %v924_v43 = vpop.f32.mrb[8].mxu1 }
 0xe25   :  { %v925_v10 = vadd.f32 %v5413_v39, %v924_v43  ;;  %v3996_v11 = vpop.f32.mrb[9].mxu1 }
 0xe27   :  { %934 = vrot.lane.b32.xlu0 %v925_v10, %s5024_s6  ;;  %v928_v12 = vadd.f32 %v925_v10, %v5411_v37 }
 0xe29   :  { %v929_v13 = vmul.f32 0.5, %v928_v12 }
 0xe2b   :  { %4614 = vtanh.f32 %v929_v13 }
 0xe35   :  { %v4615_v14 = vpop.eup %4614 }
 0xe36   :  { %v931_v15 = vadd.f32 1.0, %v4615_v14 }
 0xe38   :  { %v932_v16 = vmul.f32 0.5, %v931_v15  ;;  %v1269_v15 = vld [vmem:[%s6125_s8] sm:$0xff] }
 0xe3a   :  { %v944_v23 = vsub.f32 1.0, %v932_v16  ;;  %v951_v25 = vmul.f32 %v932_v16, %v853_v7 }
 0xe99   :  { %v935_v17 = vpop.permute.xlu0 %934 }
 0xe9a   :  { %v937_v18 = vmul.f32 %v935_v17, %v932_v16  ;;  %v1270_v16 = vld [vmem:[%s6125_s8 + $0x8] sm:$0xff] }
 0xe9b   :  { %v5541_v17 = vpack.c.bf16 %v1270_v16, %v1269_v15 }
 0xe9c   :  { %939 = vrot.lane.b32.xlu1 %v937_v18, %s5024_s6  ;;  %v1271_v18 = vld [vmem:[%s6125_s8 + $0x10] sm:$0xff] }
 0xf0e   :  { %v940_v19 = vpop.permute.xlu1 %939 }
 0xf0f   :  { %v942_v20 = vadd.f32 %v940_v19, %v5411_v37  ;;  %v1272_v19 = vld [vmem:[%s6125_s8 + $0x18] sm:$0xff] }
 0xf11   :  { %4616 = vtanh.f32 %v942_v20  ;;  %v5551_v20 = vpack.c.bf16 %v1272_v19, %v1271_v18 }
 0xf1b   :  { %v4617_v21 = vpop.eup %4616 }
 0xf1c   :  { %946 = vrot.lane.b32.xlu0 %v4617_v21, %s5025_s20 }
 0xf8e   :  { %v947_v24 = vpop.permute.xlu0 %946 }
 0xf8f   :  { %v949_v26 = vmul.f32 %v947_v24, %v944_v23 }
 0xf91   :  { %v5488_v27 = vadd.f32 %v951_v25, %v949_v26 }
 0xf93   :  { %954 = vrot.lane.b32.xlu1 %v5488_v27, %s5025_s20  ;;  %v1052_v53 = vrot.slane %v5488_v27, 6 }
0x1005   :  { %v955_v30 = vpop.permute.xlu1 %954 }
0x1006   :  { %4006 = vmatmul.mubr.msk.f32.vlgmr.msra.gmra.mrb[4].mxu0 %vm356_vm5, %v955_v30 }
0x1007   :  { %4391 = vmatpush3.bf16.msra.mxu0 %v5372_v28  ;;  %4027 = vmatprep.mubr.msk.f32.mxu0 %vm5023_vm4, %v5021_v22 }
0x1008   :  { %4392 = vmatprep.subr.bf16.mxu0 %v5022_v29 }
0x100b   :  { %4394 = vmatpush3.bf16.msra.mxu0 %v5384_v32 }
0x100c   :  { %4403 = vmatprep.subr.bf16.mxu0 %v5022_v29 }
0x10d9   :  { %v1024_v31 = vpop.f32.mrb[4].mxu0 }
0x10da   :  { %v1025_v35 = vadd.f32 %v5413_v39, %v1024_v31  ;;  %v4007_v36 = vpop.f32.mrb[5].mxu0 }
0x10dc   :  { %v1029_v38 = vrot.slane %v1025_v35, 6 }
0x10de   :  { %1036 = vrot.lane.b32.xlu0 %v1029_v38, %s5024_s6  ;;  %v1031_v40 = vadd.f32 %v1029_v38, %v5411_v37 }
0x10e0   :  { %v1032_v41 = vmul.f32 0.5, %v1031_v40 }
0x10e2   :  { %4618 = vtanh.f32 %v1032_v41  ;;  %v5581_v41 = vld [vmem:[#allocation8] ss:$0 sm:$0xff] }
0x10ec   :  { %v4619_v28 = vpop.eup %4618 }
0x10ed   :  { %v1034_v42 = vadd.f32 1.0, %v4619_v28 }
0x10ef   :  { %v1035_v44 = vmul.f32 0.5, %v1034_v42 }
0x10f1   :  { %v1046_v52 = vsub.f32 1.0, %v1035_v44  ;;  %v1054_v56 = vmul.f32 %v1052_v53, %v1035_v44 }
0x1150   :  { %v1037_v45 = vpop.permute.xlu0 %1036 }
0x1151   :  { %v1039_v46 = vmul.f32 %v1037_v45, %v1035_v44 }
0x1153   :  { %1041 = vrot.lane.b32.xlu1 %v1039_v46, %s5024_s6 }
0x11c5   :  { %v1042_v32 = vpop.permute.xlu1 %1041 }
0x11c6   :  { %v1044_v47 = vadd.f32 %v1042_v32, %v5411_v37 }
0x11c8   :  { %4620 = vtanh.f32 %v1044_v47 }
0x11d2   :  { %v4621_v51 = vpop.eup %4620 }
0x11d3   :  { %1048 = vrot.lane.b32.xlu0 %v4621_v51, %s5025_s20 }
0x1245   :  { %v1049_v54 = vpop.permute.xlu0 %1048 }
0x1246   :  { %v1051_v55 = vmul.f32 %v1049_v54, %v1046_v52 }
0x1248   :  { %v1055_v57 = vadd.f32 %v1054_v56, %v1051_v55 }
0x124a   :  { %v1057_v58 = vrot.slane %v1055_v57, 2  ;;  %v1156_v23 = vrot.slane %v1055_v57, 6  ;;  %v2183_v31 = vsel %vm261_vm0, %v5488_v27, %v1055_v57 }
0x124c   :  { %1058 = vrot.lane.b32.xlu1 %v1057_v58, %s5025_s20 }
0x12be   :  { %v1059_v62 = vpop.permute.xlu1 %1058 }
0x12bf   :  { %4017 = vmatmul.mubr.msk.f32.vlgmr.msra.gmra.mrb[10].mxu1 %vm356_vm5, %v1059_v62 }
0x12c0   :  { %4398 = vmatpush3.bf16.msra.mxu1 %v4395_v50  ;;  %4038 = vmatprep.mubr.msk.f32.mxu1 %vm356_vm5, %v5392_v34 }
0x12c1   :  { %4400 = vmatprep.subr.bf16.mxu1 %v4399_v61 }
0x12c4   :  { %4402 = vmatpush3.bf16.msra.mxu1 %v4399_v61 }
0x12c5   :  { %4409 = vmatprep.subr.bf16.mxu1 %v5022_v29 }
0x12c7   :  { %4039 = vmatmul.mubr.msk.f32.vlgmr.msra.gmra.mrb[12].mxu1 %vm356_vm5, %v5390_v33 }
0x12c8   :  { %4060 = vmatprep.mubr.msk.f32.mxu1 %vm5023_vm4, %v5021_v22  ;;  %4411 = vmatpush3.bf16.msra.mxu1 %v5541_v17 }
0x12c9   :  { %4412 = vmatprep.subr.bf16.mxu1 %v5022_v29 }
0x12cc   :  { %4414 = vmatpush3.bf16.msra.mxu1 %v5551_v20 }
0x12cd   :  { %4421 = vmatprep.subr.bf16.mxu1 %v5022_v29 }
0x1392   :  { %v1128_v63 = vpop.f32.mrb[10].mxu1 }
0x1393   :  { %v1129_v0 = vadd.f32 %v5413_v39, %v1128_v63  ;;  %v4018_v1 = vpop.f32.mrb[11].mxu1 }
0x1395   :  { %v1133_v2 = vrot.slane %v1129_v0, 4 }
0x1397   :  { %1140 = vrot.lane.b32.xlu0 %v1133_v2, %s5024_s6  ;;  %v1135_v6 = vadd.f32 %v1133_v2, %v5411_v37 }
0x1399   :  { %v1136_v7 = vmul.f32 0.5, %v1135_v6 }
0x139a   :  { %v4040_v4 = vpop.f32.mrb[12].mxu1 }
0x139b   :  { %v1346_v34 = vpop.f32.mrb[13].mxu1  ;;  %4622 = vtanh.f32 %v1136_v7  ;;  %v5585_v46 = vadd.f32 %v4040_v4, %v3682_v3 }
0x139c   :  { %v5529_v5 = vadd.f32 %v3682_v3, %v1346_v34 }
0x13a5   :  { %v4623_v33 = vpop.eup %4622 }
0x13a6   :  { %v1138_v9 = vadd.f32 1.0, %v4623_v33 }
0x13a8   :  { %v1139_v43 = vmul.f32 0.5, %v1138_v9 }
0x13aa   :  { %v1150_v21 = vsub.f32 1.0, %v1139_v43  ;;  %v1158_v25 = vmul.f32 %v1156_v23, %v1139_v43 }
0x1409   :  { %v1141_v10 = vpop.permute.xlu0 %1140 }
0x140a   :  { %v1143_v11 = vmul.f32 %v1141_v10, %v1139_v43 }
0x140c   :  { %1145 = vrot.lane.b32.xlu1 %v1143_v11, %s5024_s6 }
0x147e   :  { %v1146_v12 = vpop.permute.xlu1 %1145 }
0x147f   :  { %v1148_v13 = vadd.f32 %v1146_v12, %v5411_v37 }
0x1481   :  { %4624 = vtanh.f32 %v1148_v13 }
0x148b   :  { %v4625_v14 = vpop.eup %4624 }
0x148c   :  { %1152 = vrot.lane.b32.xlu0 %v4625_v14, %s5025_s20 }
0x14fe   :  { %v1153_v24 = vpop.permute.xlu0 %1152 }
0x14ff   :  { %v1155_v26 = vmul.f32 %v1153_v24, %v1150_v21 }
0x1501   :  { %v5555_v30 = vadd.f32 %v1158_v25, %v1155_v26 }
0x1503   :  { %v1161_v35 = vrot.slane %v5555_v30, 4  ;;  %v5562_v36 = vsel %vm2179_vm6, %v2183_v31, %v5555_v30 }
0x1505   :  { %1162 = vrot.lane.b32.xlu1 %v1161_v35, %s5025_s20 }
0x1577   :  { %v1163_v38 = vpop.permute.xlu1 %1162 }
0x1578   :  { %4028 = vmatmul.mubr.msk.f32.vlgmr.msra.gmra.mrb[6].mxu0 %vm356_vm5, %v1163_v38 }
0x1579   :  { %4405 = vmatpush3.bf16.msra.mxu0 %v5541_v17  ;;  %4049 = vmatprep.mubr.msk.f32.mxu0 %vm5023_vm4, %v5021_v22 }
0x157a   :  { %4406 = vmatprep.subr.bf16.mxu0 %v5022_v29 }
0x157d   :  { %4408 = vmatpush3.bf16.msra.mxu0 %v5551_v20 }
0x157e   :  { %4415 = vmatprep.subr.bf16.mxu0 %v5022_v29 }
0x1580   :  { %4050 = vmatmul.mubr.f32.vlgmr.msra.gmra.mrb[8].mxu0 %v5021_v22 }
0x1581   :  { %4417 = vmatpush3.bf16.msra.mxu0 %v5541_v17  ;;  %4071 = vmatprep.mubr.msk.f32.mxu0 %vm5023_vm4, %v5021_v22 }
0x1582   :  { %4418 = vmatprep.subr.bf16.mxu0 %v5022_v29 }
0x1585   :  { %4420 = vmatpush3.bf16.msra.mxu0 %v5551_v20 }
0x1586   :  { %4427 = vmatprep.subr.bf16.mxu0 %v5022_v29 }
0x164b   :  { %v5579_v27 = vpop.f32.mrb[6].mxu0 }
0x164c   :  { %v4029_v40 = vpop.f32.mrb[7].mxu0 }
0x1653   :  { %v1427_v28 = vpop.f32.mrb[8].mxu0 }
0x1654   :  { %v1428_v42 = vadd.f32 %v5581_v41, %v1427_v28  ;;  %v4051_v44 = vpop.f32.mrb[9].mxu0 }
0x1656   :  { %v1432_v45 = vrot.slane %v1428_v42, 2 }
0x1658   :  { %1439 = vrot.lane.b32.xlu0 %v1432_v45, %s5024_s6  ;;  %v1434_v32 = vadd.f32 %v1432_v45, %v5585_v46 }
0x165a   :  { %v1435_v47 = vmul.f32 0.5, %v1434_v32 }
0x165c   :  { %4626 = vtanh.f32 %v1435_v47 }
0x1666   :  { %v4627_v48 = vpop.eup %4626 }
0x1667   :  { %v1437_v49 = vadd.f32 1.0, %v4627_v48 }
0x1669   :  { %v1438_v50 = vmul.f32 0.5, %v1437_v49 }
0x166b   :  { %v1449_v56 = vsub.f32 1.0, %v1438_v50  ;;  %v1455_v58 = vmul.f32 0.0, %v1438_v50 }
0x16ca   :  { %v1440_v51 = vpop.permute.xlu0 %1439 }
0x16cb   :  { %v1442_v52 = vmul.f32 %v1440_v51, %v1438_v50 }
0x16cd   :  { %1444 = vrot.lane.b32.xlu1 %v1442_v52, %s5024_s6 }
0x173f   :  { %v1445_v53 = vpop.permute.xlu1 %1444 }
0x1740   :  { %v1447_v54 = vadd.f32 %v1445_v53, %v5585_v46 }
0x1742   :  { %4628 = vtanh.f32 %v1447_v54 }
0x174c   :  { %v4629_v55 = vpop.eup %4628 }
0x174d   :  { %1451 = vrot.lane.b32.xlu0 %v4629_v55, %s5025_s20 }
0x17bf   :  { %v1452_v57 = vpop.permute.xlu0 %1451 }
0x17c0   :  { %v1454_v59 = vmul.f32 %v1452_v57, %v1449_v56 }
0x17c2   :  { %v5591_v60 = vadd.f32 %v1455_v58, %v1454_v59 }
0x17c4   :  { %v1458_v61 = vrot.slane %v5591_v60, 6  ;;  %v1557_v13 = vrot.slane %v5591_v60, 2 }
0x17c6   :  { %1459 = vrot.lane.b32.xlu1 %v1458_v61, %s5025_s20 }
0x1838   :  { %v1460_v62 = vpop.permute.xlu1 %1459 }
0x1839   :  { %4061 = vmatmul.mubr.msk.f32.vlgmr.msra.gmra.mrb[14].mxu1 %vm356_vm5, %v1460_v62 }
0x183a   :  { %4423 = vmatpush3.bf16.msra.mxu1 %v5541_v17  ;;  %4082 = vmatprep.mubr.msk.f32.mxu1 %vm5023_vm4, %v5021_v22 }
0x183b   :  { %4424 = vmatprep.subr.bf16.mxu1 %v5022_v29 }
0x183e   :  { %4426 = vmatpush3.bf16.msra.mxu1 %v5551_v20 }
0x183f   :  { %4433 = vmatprep.subr.bf16.mxu1 %v5022_v29 }
0x190c   :  { %v1529_v63 = vpop.f32.mrb[14].mxu1 }
0x190d   :  { %v1530_v0 = vadd.f32 %v5581_v41, %v1529_v63  ;;  %v4062_v1 = vpop.f32.mrb[15].mxu1 }
0x190f   :  { %v1534_v2 = vrot.slane %v1530_v0, 4 }
0x1911   :  { %1541 = vrot.lane.b32.xlu0 %v1534_v2, %s5024_s6  ;;  %v1536_v3 = vadd.f32 %v1534_v2, %v5585_v46 }
0x1913   :  { %v1537_v4 = vmul.f32 0.5, %v1536_v3 }
0x1915   :  { %4630 = vtanh.f32 %v1537_v4 }
0x191f   :  { %v4631_v34 = vpop.eup %4630 }
0x1920   :  { %v1539_v6 = vadd.f32 1.0, %v4631_v34 }
0x1922   :  { %v1540_v7 = vmul.f32 0.5, %v1539_v6 }
0x1924   :  { %v1551_v12 = vsub.f32 1.0, %v1540_v7  ;;  %v1559_v15 = vmul.f32 %v1557_v13, %v1540_v7 }
0x1983   :  { %v1542_v33 = vpop.permute.xlu0 %1541 }
0x1984   :  { %v1544_v9 = vmul.f32 %v1542_v33, %v1540_v7 }
0x1986   :  { %1546 = vrot.lane.b32.xlu1 %v1544_v9, %s5024_s6 }
0x19f8   :  { %v1547_v43 = vpop.permute.xlu1 %1546 }
0x19f9   :  { %v1549_v10 = vadd.f32 %v1547_v43, %v5585_v46 }
0x19fb   :  { %4632 = vtanh.f32 %v1549_v10 }
0x1a05   :  { %v4633_v11 = vpop.eup %4632 }
0x1a06   :  { %1553 = vrot.lane.b32.xlu0 %v4633_v11, %s5025_s20 }
0x1a78   :  { %v1554_v14 = vpop.permute.xlu0 %1553 }
0x1a79   :  { %v1556_v16 = vmul.f32 %v1554_v14, %v1551_v12 }
0x1a7b   :  { %v5609_v18 = vadd.f32 %v1559_v15, %v1556_v16 }
0x1a7d   :  { %v1562_v19 = vrot.slane %v5609_v18, 4  ;;  %v1661_v49 = vrot.slane %v5609_v18, 2 }
0x1a7f   :  { %1563 = vrot.lane.b32.xlu1 %v1562_v19, %s5025_s20 }
0x1af1   :  { %v1564_v21 = vpop.permute.xlu1 %1563 }
0x1af2   :  { %4072 = vmatmul.mubr.msk.f32.vlgmr.msra.gmra.mrb[10].mxu0 %vm356_vm5, %v1564_v21 }
0x1af3   :  { %4429 = vmatpush3.bf16.msra.mxu0 %v5541_v17  ;;  %4093 = vmatprep.mubr.msk.f32.mxu0 %vm5023_vm4, %v5021_v22 }
0x1af4   :  { %4430 = vmatprep.subr.bf16.mxu0 %v5022_v29 }
0x1af7   :  { %4432 = vmatpush3.bf16.msra.mxu0 %v5551_v20 }
0x1af8   :  { %4439 = vmatprep.subr.bf16.mxu0 %v5022_v29 }
0x1bc5   :  { %v1633_v23 = vpop.f32.mrb[10].mxu0 }
0x1bc6   :  { %v1634_v24 = vadd.f32 %v5581_v41, %v1633_v23  ;;  %v4073_v25 = vpop.f32.mrb[11].mxu0 }
0x1bc8   :  { %v1638_v26 = vrot.slane %v1634_v24, 6 }
0x1bca   :  { %1645 = vrot.lane.b32.xlu0 %v1638_v26, %s5024_s6  ;;  %v1640_v31 = vadd.f32 %v1638_v26, %v5585_v46 }
0x1bcc   :  { %v1641_v35 = vmul.f32 0.5, %v1640_v31 }
0x1bce   :  { %4634 = vtanh.f32 %v1641_v35 }
0x1bd8   :  { %v4635_v38 = vpop.eup %4634 }
0x1bd9   :  { %v1643_v40 = vadd.f32 1.0, %v4635_v38 }
0x1bdb   :  { %v1644_v28 = vmul.f32 0.5, %v1643_v40 }
0x1bdd   :  { %v1655_v48 = vsub.f32 1.0, %v1644_v28  ;;  %v1663_v51 = vmul.f32 %v1661_v49, %v1644_v28 }
0x1c3c   :  { %v1646_v42 = vpop.permute.xlu0 %1645 }
0x1c3d   :  { %v1648_v44 = vmul.f32 %v1646_v42, %v1644_v28 }
0x1c3f   :  { %1650 = vrot.lane.b32.xlu1 %v1648_v44, %s5024_s6 }
0x1cb1   :  { %v1651_v45 = vpop.permute.xlu1 %1650 }
0x1cb2   :  { %v1653_v32 = vadd.f32 %v1651_v45, %v5585_v46 }
0x1cb4   :  { %4636 = vtanh.f32 %v1653_v32 }
0x1cbe   :  { %v4637_v47 = vpop.eup %4636 }
0x1cbf   :  { %1657 = vrot.lane.b32.xlu0 %v4637_v47, %s5025_s20 }
0x1d31   :  { %v1658_v50 = vpop.permute.xlu0 %1657 }
0x1d32   :  { %v1660_v52 = vmul.f32 %v1658_v50, %v1655_v48 }
0x1d34   :  { %v5627_v53 = vadd.f32 %v1663_v51, %v1660_v52 }
0x1d36   :  { %v1666_v54 = vrot.slane %v5627_v53, 2 }
0x1d38   :  { %1667 = vrot.lane.b32.xlu1 %v1666_v54, %s5025_s20 }
0x1daa   :  { %v1668_v55 = vpop.permute.xlu1 %1667 }
0x1dab   :  { %4083 = vmatmul.mubr.msk.f32.vlgmr.msra.gmra.mrb[16].mxu1 %vm356_vm5, %v1668_v55 }
0x1dac   :  { %4435 = vmatpush3.bf16.msra.mxu1 %v5541_v17  ;;  %4104 = vmatprep.mubr.msk.f32.mxu1 %vm5023_vm4, %v5021_v22 }
0x1dad   :  { %4436 = vmatprep.subr.bf16.mxu1 %v5022_v29 }
0x1db0   :  { %4438 = vmatpush3.bf16.msra.mxu1 %v5551_v20 }
0x1db1   :  { %4445 = vmatprep.subr.bf16.mxu1 %v5022_v29 }
0x1e7e   :  { %v1737_v56 = vpop.f32.mrb[16].mxu1 }
0x1e7f   :  { %v1738_v57 = vadd.f32 %v5581_v41, %v1737_v56  ;;  %v4084_v58 = vpop.f32.mrb[17].mxu1 }
0x1e81   :  { %1747 = vrot.lane.b32.xlu0 %v1738_v57, %s5024_s6  ;;  %v1741_v59 = vadd.f32 %v1738_v57, %v5585_v46 }
0x1e83   :  { %v1742_v61 = vmul.f32 0.5, %v1741_v59 }
0x1e85   :  { %4638 = vtanh.f32 %v1742_v61 }
0x1e8f   :  { %v4639_v62 = vpop.eup %4638 }
0x1e90   :  { %v1744_v63 = vadd.f32 1.0, %v4639_v62 }
0x1e92   :  { %v1745_v0 = vmul.f32 0.5, %v1744_v63 }
0x1e94   :  { %v1757_v6 = vsub.f32 1.0, %v1745_v0  ;;  %v1764_v33 = vmul.f32 %v1745_v0, %v1666_v54 }
0x1ef3   :  { %v1748_v1 = vpop.permute.xlu0 %1747 }
0x1ef4   :  { %v1750_v2 = vmul.f32 %v1748_v1, %v1745_v0 }
0x1ef6   :  { %1752 = vrot.lane.b32.xlu1 %v1750_v2, %s5024_s6 }
0x1f68   :  { %v1753_v3 = vpop.permute.xlu1 %1752 }
0x1f69   :  { %v1755_v4 = vadd.f32 %v1753_v3, %v5585_v46 }
0x1f6b   :  { %4640 = vtanh.f32 %v1755_v4 }
0x1f75   :  { %v4641_v34 = vpop.eup %4640 }
0x1f76   :  { %1759 = vrot.lane.b32.xlu0 %v4641_v34, %s5025_s20 }
0x1fe8   :  { %v1760_v7 = vpop.permute.xlu0 %1759 }
0x1fe9   :  { %v1762_v9 = vmul.f32 %v1760_v7, %v1757_v6 }
0x1feb   :  { %v5644_v43 = vadd.f32 %v1764_v33, %v1762_v9 }
0x1fed   :  { %1767 = vrot.lane.b32.xlu1 %v5644_v43, %s5025_s20  ;;  %v1865_v38 = vrot.slane %v5644_v43, 2 }
0x205f   :  { %v1768_v10 = vpop.permute.xlu1 %1767 }
0x2060   :  { %4094 = vmatmul.mubr.msk.f32.vlgmr.msra.gmra.mrb[12].mxu0 %vm356_vm5, %v1768_v10 }
0x2061   :  { %4441 = vmatpush3.bf16.msra.mxu0 %v5541_v17  ;;  %4115 = vmatprep.mubr.msk.f32.mxu0 %vm5023_vm4, %v5021_v22 }
0x2062   :  { %4442 = vmatprep.subr.bf16.mxu0 %v5022_v29 }
0x2065   :  { %4444 = vmatpush3.bf16.msra.mxu0 %v5551_v20 }
0x2133   :  { %v1837_v46 = vpop.f32.mrb[12].mxu0 }
0x2134   :  { %v1838_v11 = vadd.f32 %v5581_v41, %v1837_v46  ;;  %v4095_v12 = vpop.f32.mrb[13].mxu0 }
0x2136   :  { %v1842_v13 = vrot.slane %v1838_v11, 2 }
0x2138   :  { %1849 = vrot.lane.b32.xlu0 %v1842_v13, %s5024_s6  ;;  %v1844_v14 = vadd.f32 %v1842_v13, %v5529_v5 }
0x213a   :  { %v1845_v15 = vmul.f32 0.5, %v1844_v14 }
0x213c   :  { %4642 = vtanh.f32 %v1845_v15 }
0x2146   :  { %v4643_v16 = vpop.eup %4642 }
0x2147   :  { %v1847_v19 = vadd.f32 1.0, %v4643_v16 }
0x2149   :  { %v1848_v21 = vmul.f32 0.5, %v1847_v19  ;;  %v1233_v19 = vadd.f32 %v5413_v39, %v5579_v27 }
0x214b   :  { %v1859_v35 = vsub.f32 1.0, %v1848_v21  ;;  %v1867_v28 = vmul.f32 %v1865_v38, %v1848_v21 }
0x21aa   :  { %v1850_v23 = vpop.permute.xlu0 %1849 }
0x21ab   :  { %v1852_v24 = vmul.f32 %v1850_v23, %v1848_v21  ;;  %v1237_v23 = vrot.slane %v1233_v19, 2  ;;  %v2208_v19 = vld [vmem:[%s6127_s4 + $0x30] sm:$0xff] }
0x21ad   :  { %1854 = vrot.lane.b32.xlu1 %v1852_v24, %s5024_s6  ;;  %v1239_v24 = vadd.f32 %v1237_v23, %v5411_v37 }
0x221f   :  { %v1855_v25 = vpop.permute.xlu1 %1854 }
0x2220   :  { %v1857_v26 = vadd.f32 %v1855_v25, %v5529_v5  ;;  %v1240_v25 = vmul.f32 0.5, %v1239_v24 }
0x2222   :  { %4644 = vtanh.f32 %v1857_v26 }
0x222c   :  { %v4645_v31 = vpop.eup %4644 }
0x222d   :  { %1861 = vrot.lane.b32.xlu0 %v4645_v31, %s5025_s20 }
0x229f   :  { %v1862_v40 = vpop.permute.xlu0 %1861 }
0x22a0   :  { %v1864_v42 = vmul.f32 %v1862_v40, %v1859_v35 }
0x22a2   :  { %v5661_v44 = vadd.f32 %v1867_v28, %v1864_v42 }
0x22a4   :  { %v1870_v45 = vrot.slane %v5661_v44, 6  ;;  %v1969_v62 = vrot.slane %v5661_v44, 2 }
0x22a6   :  { %1871 = vrot.lane.b32.xlu1 %v1870_v45, %s5025_s20 }
0x2318   :  { %v1872_v32 = vpop.permute.xlu1 %1871 }
0x2319   :  { %4105 = vmatmul.mubr.msk.f32.vlgmr.msra.gmra.mrb[18].mxu1 %vm356_vm5, %v1872_v32 }
0x231a   :  { %4447 = vmatpush3.bf16.msra.mxu1 %v5541_v17  ;;  %4126 = vmatprep.mubr.msk.f32.mxu1 %vm5023_vm4, %v5021_v22 }
0x231b   :  { %4448 = vmatprep.subr.bf16.mxu1 %v5022_v29 }
0x231e   :  { %4450 = vmatpush3.bf16.msra.mxu1 %v5551_v20 }
0x231f   :  { %4467 = vmatprep.subr.bf16.mxu1 %v5022_v29 }
0x23ec   :  { %v1941_v47 = vpop.f32.mrb[18].mxu1 }
0x23ed   :  { %v1942_v48 = vadd.f32 %v5581_v41, %v1941_v47  ;;  %v4106_v49 = vpop.f32.mrb[19].mxu1 }
0x23ef   :  { %v1946_v50 = vrot.slane %v1942_v48, 4 }
0x23f1   :  { %1953 = vrot.lane.b32.xlu0 %v1946_v50, %s5024_s6  ;;  %v1948_v51 = vadd.f32 %v1946_v50, %v5529_v5 }
0x23f3   :  { %v1949_v52 = vmul.f32 0.5, %v1948_v51 }
0x23f5   :  { %4646 = vtanh.f32 %v1949_v52 }
0x23ff   :  { %v4647_v17 = vpop.eup %4646 }
0x2400   :  { %v1951_v54 = vadd.f32 1.0, %v4647_v17  ;;  %v1260_v17 = vrot.slane %v5555_v30, 6 }
0x2402   :  { %v1952_v55 = vmul.f32 0.5, %v1951_v54 }
0x2404   :  { %v1963_v61 = vsub.f32 1.0, %v1952_v55  ;;  %v1971_v0 = vmul.f32 %v1969_v62, %v1952_v55 }
0x2463   :  { %v1954_v56 = vpop.permute.xlu0 %1953 }
0x2464   :  { %v1956_v57 = vmul.f32 %v1954_v56, %v1952_v55 }
0x2466   :  { %1958 = vrot.lane.b32.xlu1 %v1956_v57, %s5024_s6 }
0x24d8   :  { %v1959_v20 = vpop.permute.xlu1 %1958 }
0x24d9   :  { %v1961_v58 = vadd.f32 %v1959_v20, %v5529_v5 }
0x24db   :  { %4648 = vtanh.f32 %v1961_v58 }
0x24e5   :  { %v4649_v59 = vpop.eup %4648 }
0x24e6   :  { %1965 = vrot.lane.b32.xlu0 %v4649_v59, %s5025_s20 }
0x2558   :  { %v1966_v63 = vpop.permute.xlu0 %1965 }
0x2559   :  { %v1968_v1 = vmul.f32 %v1966_v63, %v1963_v61 }
0x255b   :  { %v5679_v2 = vadd.f32 %v1971_v0, %v1968_v1 }
0x255d   :  { %v1974_v3 = vrot.slane %v5679_v2, 4  ;;  %v2073_v35 = vrot.slane %v5679_v2, 2 }
0x255f   :  { %1975 = vrot.lane.b32.xlu1 %v1974_v3, %s5025_s20  ;;  %v2213_v3 = vld [vmem:[%s6126_s24 + $0x10] sm:$0xff] }
0x25d1   :  { %v1976_v4 = vpop.permute.xlu1 %1975 }
0x25d2   :  { %4116 = vmatmul.mubr.msk.f32.vlgmr.msra.gmra.mrb[14].mxu0 %vm356_vm5, %v1976_v4 }
0x26a5   :  { %v2045_v34 = vpop.f32.mrb[14].mxu0 }
0x26a6   :  { %v2046_v6 = vadd.f32 %v5581_v41, %v2045_v34  ;;  %v4117_v7 = vpop.f32.mrb[15].mxu0  ;;  %v2214_v34 = vld [vmem:[%s6126_s24 + $0x18] sm:$0xff] }
0x26a7   :  { %v2203_v7 = vld [vmem:[%s6127_s4 + $0x8] sm:$0xff] }
0x26a8   :  { %v2050_v33 = vrot.slane %v2046_v6, 6  ;;  %v2202_v6 = vld [vmem:[%s6127_s4] sm:$0xff] }
0x26aa   :  { %2057 = vrot.lane.b32.xlu0 %v2050_v33, %s5024_s6  ;;  %v2052_v9 = vadd.f32 %v2050_v33, %v5529_v5  ;;  %v4451_v33 = vpack.c.bf16 %v2203_v7, %v2202_v6 }
0x26ac   :  { %v2053_v10 = vmul.f32 0.5, %v2052_v9  ;;  %v2204_v9 = vld [vmem:[%s6127_s4 + $0x10] sm:$0xff]  ;;  %4452 = vmatprep.subr.bf16.mxu0 %v4451_v33 }
0x26ad   :  { %4454 = vmatpush3.bf16.msra.mxu0 %v4451_v33 }
0x26ae   :  { %4650 = vtanh.f32 %v2053_v10  ;;  %v2205_v10 = vld [vmem:[%s6127_s4 + $0x18] sm:$0xff] }
0x26b8   :  { %v4651_v46 = vpop.eup %4650 }
0x26b9   :  { %v2055_v11 = vadd.f32 1.0, %v4651_v46  ;;  %v5743_v46 = vpack.c.bf16 %v2214_v34, %v2213_v3 }
0x26bb   :  { %v2056_v12 = vmul.f32 0.5, %v2055_v11  ;;  %v4455_v11 = vpack.c.bf16 %v2205_v10, %v2204_v9 }
0x26bd   :  { %v2067_v31 = vsub.f32 1.0, %v2056_v12  ;;  %v2075_v28 = vmul.f32 %v2073_v35, %v2056_v12  ;;  %4456 = vmatprep.subr.bf16.mxu0 %v4455_v11 }
0x26be   :  { %4458 = vmatpush3.bf16.msra.mxu0 %v4455_v11 }
0x271c   :  { %v2058_v13 = vpop.permute.xlu0 %2057 }
0x271d   :  { %v2060_v14 = vmul.f32 %v2058_v13, %v2056_v12  ;;  %v2206_v12 = vld [vmem:[%s6127_s4 + $0x20] sm:$0xff]  ;;  %v2207_v13 = vld [vmem:[%s6127_s4 + $0x28] sm:$0xff] }
0x271f   :  { %2062 = vrot.lane.b32.xlu1 %v2060_v14, %s5024_s6 }
0x2791   :  { %v2063_v15 = vpop.permute.xlu1 %2062 }
0x2792   :  { %v2065_v16 = vadd.f32 %v2063_v15, %v5529_v5  ;;  %v4459_v15 = vpack.c.bf16 %v2207_v13, %v2206_v12 }
0x2794   :  { %4652 = vtanh.f32 %v2065_v16  ;;  %4460 = vmatprep.subr.bf16.mxu0 %v4459_v15 }
0x2795   :  { %4654 = vtanh.f32 %v1240_v25  ;;  %4462 = vmatpush3.bf16.msra.mxu0 %v4459_v15 }
0x279e   :  { %v4653_v21 = vpop.eup %4652 }
0x279f   :  { %2069 = vrot.lane.b32.xlu0 %v4653_v21, %s5025_s20  ;;  %v4655_v26 = vpop.eup %4654  ;;  %v2209_v21 = vld [vmem:[%s6127_s4 + $0x38] sm:$0xff] }
0x27a0   :  { %v1242_v38 = vadd.f32 1.0, %v4655_v26 }
0x27a2   :  { %v1243_v39 = vmul.f32 0.5, %v1242_v38 }
0x27a3   :  { %1244 = vrot.lane.b32.xlu0 %v1237_v23, %s5024_s6  ;;  %v4463_v23 = vpack.c.bf16 %v2209_v21, %v2208_v19 }
0x27a4   :  { %v1254_v52 = vsub.f32 1.0, %v1243_v39  ;;  %v1262_v55 = vmul.f32 %v1260_v17, %v1243_v39 }
0x27a5   :  { %4464 = vmatprep.subr.bf16.mxu0 %v4463_v23 }
0x27a6   :  { %4466 = vmatpush3.bf16.msra.mxu0 %v4463_v23 }
0x27a7   :  { %4479 = vmatprep.subr.bf16.mxu0 %v5022_v29 }
0x2811   :  { %v2070_v40 = vpop.permute.xlu0 %2069 }
0x2812   :  { %v2072_v42 = vmul.f32 %v2070_v40, %v2067_v31 }
0x2814   :  { %v5695_v45 = vadd.f32 %v2075_v28, %v2072_v42  ;;  %v2189_v42 = vsel %vm261_vm0, %v5644_v43, %v5627_v53 }
0x2815   :  { %v1245_v27 = vpop.permute.xlu0 %1244 }
0x2816   :  { %v1247_v32 = vmul.f32 %v1245_v27, %v1243_v39  ;;  %v2078_v47 = vrot.slane %v5695_v45, 2 }
0x2818   :  { %2079 = vrot.lane.b32.xlu1 %v2078_v47, %s5025_s20  ;;  %1249 = vrot.lane.b32.xlu0 %v1247_v32, %s5024_s6  ;;  %v2190_v32 = vsel %vm2179_vm6, %v2189_v42, %v5609_v18 }
0x288a   :  { %v2080_v48 = vpop.permute.xlu1 %2079  ;;  %v1250_v49 = vpop.permute.xlu0 %1249 }
0x288b   :  { %v1252_v50 = vadd.f32 %v1250_v49, %v5411_v37  ;;  %4127 = vmatmul.mubr.msk.f32.vlgmr.msra.gmra.mrb[20].mxu1 %vm356_vm5, %v2080_v48 }
0x288c   :  { %4156 = vmatprep.mubr.msk.f32.mxu1 %vm5023_vm4, %v5021_v22 }
0x288d   :  { %4656 = vtanh.f32 %v1252_v50 }
0x2897   :  { %v4657_v51 = vpop.eup %4656 }
0x2898   :  { %1256 = vrot.lane.b32.xlu0 %v4657_v51, %s5025_s20  ;;  %v2191_v51 = vsel %vm2181_vm7, %v2190_v32, %v5591_v60  ;;  %v3693_v60 = vld [vmem:[%s6128_s3] ss:$0 sm:$0xff] }
0x289c   :  { %2194 = vrot.lane.b32.xlu0 %v5473_v8, %s5025_s20 }
0x290a   :  { %v1257_v54 = vpop.permute.xlu0 %1256 }
0x290b   :  { %v1259_v56 = vmul.f32 %v1257_v54, %v1254_v52 }
0x290d   :  { %v1263_v57 = vadd.f32 %v1262_v55, %v1259_v56 }
0x290e   :  { %v2195_v50 = vpop.permute.xlu0 %2194 }
0x290f   :  { %v2185_v37 = vsel %vm2181_vm7, %v5562_v36, %v1263_v57  ;;  %v2211_v36 = vld [vmem:[%s6126_s24] sm:$0xff] }
0x295e   :  { %v2149_v20 = vpop.f32.mrb[20].mxu1 }
0x295f   :  { %v2150_v58 = vadd.f32 %v5581_v41, %v2149_v20  ;;  %v4128_v59 = vpop.f32.mrb[21].mxu1  ;;  %v2212_v41 = vld [vmem:[%s6126_s24 + $0x8] sm:$0xff] }
0x2960   :  { %v5725_v4 = vpack.c.bf16 %v2212_v41, %v2211_v36 }
0x2961   :  { %2159 = vrot.lane.b32.xlu1 %v2150_v58, %s5024_s6  ;;  %v2153_v61 = vadd.f32 %v2150_v58, %v5529_v5 }
0x2962   :  { %4469 = vmatpush3.bf16.msra.mxu1 %v5725_v4 }
0x2963   :  { %v2154_v62 = vmul.f32 0.5, %v2153_v61  ;;  %4470 = vmatprep.subr.bf16.mxu1 %v5022_v29 }
0x2965   :  { %4658 = vtanh.f32 %v2154_v62 }
0x2966   :  { %4472 = vmatpush3.bf16.msra.mxu1 %v5743_v46 }
0x2967   :  { %4473 = vmatprep.subr.bf16.mxu1 %v5022_v29 }
0x2969   :  { %4157 = vmatmul.mubr.f32.vlgmr.msra.gmra.mrb[22].mxu1 %v5021_v22 }
0x296a   :  { %4475 = vmatpush3.bf16.msra.mxu1 %v5725_v4  ;;  %4167 = vmatprep.mubr.msk.f32.mxu1 %vm5023_vm4, %v5021_v22 }
0x296b   :  { %4476 = vmatprep.subr.bf16.mxu1 %v5022_v29 }
0x296e   :  { %4478 = vmatpush3.bf16.msra.mxu1 %v5743_v46 }
0x296f   :  { %v4659_v8 = vpop.eup %4658  ;;  %4485 = vmatprep.subr.bf16.mxu1 %v5022_v29 }
0x2970   :  { %v2156_v63 = vadd.f32 1.0, %v4659_v8 }
0x2972   :  { %v2157_v30 = vmul.f32 0.5, %v2156_v63 }
0x2974   :  { %v2169_v35 = vsub.f32 1.0, %v2157_v30  ;;  %v2176_v40 = vmul.f32 %v2157_v30, %v2078_v47 }
0x29d3   :  { %v2160_v0 = vpop.permute.xlu1 %2159 }
0x29d4   :  { %v2162_v1 = vmul.f32 %v2160_v0, %v2157_v30 }
0x29d6   :  { %2164 = vrot.lane.b32.xlu1 %v2162_v1, %s5024_s6 }
0x2a3c   :  { %v2376_v25 = vpop.f32.mrb[22].mxu1 }
0x2a3d   :  { %v4158_v31 = vpop.f32.mrb[23].mxu1 }
0x2a48   :  { %v2165_v14 = vpop.permute.xlu1 %2164 }
0x2a49   :  { %v2167_v16 = vadd.f32 %v2165_v14, %v5529_v5  ;;  %v5774_v5 = vld [vmem:[%s6075_s13] ss:$0 sm:$0xff] }
0x2a4a   :  { %v2377_v26 = vadd.f32 %v5774_v5, %v2376_v25 }
0x2a4b   :  { %4660 = vtanh.f32 %v2167_v16 }
0x2a4c   :  { %2386 = vrot.lane.b32.xlu0 %v2377_v26, %s5024_s6 }
0x2a55   :  { %v4661_v24 = vpop.eup %4660 }
0x2a56   :  { %2171 = vrot.lane.b32.xlu1 %v4661_v24, %s5025_s20 }
0x2a5a   :  { %2196 = vrot.lane.b32.xlu1 %v2185_v37, %s5025_s20 }
0x2abe   :  { %v2387_v56 = vpop.permute.xlu0 %2386 }
0x2ac8   :  { %v2172_v38 = vpop.permute.xlu1 %2171 }
0x2ac9   :  { %v2174_v28 = vmul.f32 %v2172_v38, %v2169_v35 }
0x2acb   :  { %v2177_v39 = vadd.f32 %v2176_v40, %v2174_v28 }
0x2acc   :  { %v2197_v48 = vpop.permute.xlu1 %2196 }
0x2acd   :  { %v2186_v27 = vsel %vm261_vm0, %v2177_v39, %v5695_v45  ;;  %v5797_v43 = vsel %vm356_vm5, %v2197_v48, %v2191_v51 }
0x2ace   :  { %v2187_v49 = vsel %vm2179_vm6, %v2186_v27, %v5679_v2 }
0x2acf   :  { %v2188_v47 = vsel %vm2181_vm7, %v2187_v49, %v5661_v44 }
0x2ad0   :  { %v5794_v53 = vsel %vm356_vm5, %v2195_v50, %v2188_v47 }
0x2ad1   :  { %4145 = vmatprep.mubr.msk.f32.mxu0 %vm2222_vm8, %v5794_v53 }
0x2ad2   :  { %4146 = vmatmul.mubr.msk.f32.vlgmr.msra.gmra.mrb[16].mxu0 %vm2222_vm8, %v5797_v43 }
0x2ad3   :  { %4481 = vmatpush3.bf16.msra.mxu0 %v5725_v4  ;;  %4178 = vmatprep.mubr.msk.f32.mxu0 %vm5023_vm4, %v5021_v22 }
0x2ad4   :  { %4482 = vmatprep.subr.bf16.mxu0 %v5022_v29 }
0x2ad7   :  { %4484 = vmatpush3.bf16.msra.mxu0 %v5743_v46 }
0x2ad8   :  { %4491 = vmatprep.subr.bf16.mxu0 %v5022_v29 }
0x2ba5   :  { %v4147_v18 = vpop.f32.mrb[16].mxu0 }
0x2ba6   :  { %v5812_v44 = vadd.f32 %v4147_v18, %v3693_v60  ;;  %v2295_v2 = vpop.f32.mrb[17].mxu0 }
0x2ba7   :  { %v5814_v45 = vadd.f32 %v3693_v60, %v2295_v2 }
0x2ba9   :  { %v2380_v52 = vadd.f32 %v2377_v26, %v5814_v45 }
0x2bab   :  { %v2381_v17 = vmul.f32 0.5, %v2380_v52 }
0x2bad   :  { %4662 = vtanh.f32 %v2381_v17 }
0x2bb7   :  { %v4663_v54 = vpop.eup %4662 }
0x2bb8   :  { %v2383_v55 = vadd.f32 1.0, %v4663_v54 }
0x2bba   :  { %v2384_v57 = vmul.f32 0.5, %v2383_v55 }
0x2bbc   :  { %v2389_v37 = vmul.f32 %v2387_v56, %v2384_v57  ;;  %v2396_v61 = vsub.f32 1.0, %v2384_v57  ;;  %v2402_v8 = vmul.f32 0.0, %v2384_v57 }
0x2bbe   :  { %2391 = vrot.lane.b32.xlu1 %v2389_v37, %s5024_s6 }
0x2c30   :  { %v2392_v20 = vpop.permute.xlu1 %2391 }
0x2c31   :  { %v2394_v58 = vadd.f32 %v2392_v20, %v5814_v45 }
0x2c33   :  { %4664 = vtanh.f32 %v2394_v58 }
0x2c3d   :  { %v4665_v59 = vpop.eup %4664 }
0x2c3e   :  { %2398 = vrot.lane.b32.xlu0 %v4665_v59, %s5025_s20 }
0x2cb0   :  { %v2399_v62 = vpop.permute.xlu0 %2398 }
0x2cb1   :  { %v2401_v63 = vmul.f32 %v2399_v62, %v2396_v61 }
0x2cb3   :  { %v2403_v30 = vadd.f32 %v2402_v8, %v2401_v63 }
0x2cb5   :  { %2405 = vrot.lane.b32.xlu1 %v2403_v30, %s5025_s20  ;;  %v2503_v15 = vrot.slane %v2403_v30, 6 }
0x2d27   :  { %v2406_v0 = vpop.permute.xlu1 %2405 }
0x2d28   :  { %4168 = vmatmul.mubr.msk.f32.vlgmr.msra.gmra.mrb[24].mxu1 %vm356_vm5, %v2406_v0 }
0x2d29   :  { %4487 = vmatpush3.bf16.msra.mxu1 %v5725_v4  ;;  %4189 = vmatprep.mubr.msk.f32.mxu1 %vm5023_vm4, %v5021_v22 }
0x2d2a   :  { %4488 = vmatprep.subr.bf16.mxu1 %v5022_v29 }
0x2d2d   :  { %4490 = vmatpush3.bf16.msra.mxu1 %v5743_v46 }
0x2d2e   :  { %4497 = vmatprep.subr.bf16.mxu1 %v5022_v29 }
0x2dfb   :  { %v2475_v1 = vpop.f32.mrb[24].mxu1 }
0x2dfc   :  { %v2476_v36 = vadd.f32 %v5774_v5, %v2475_v1  ;;  %v4169_v41 = vpop.f32.mrb[25].mxu1 }
0x2dfe   :  { %v2480_v3 = vrot.slane %v2476_v36, 6 }
0x2e00   :  { %2487 = vrot.lane.b32.xlu0 %v2480_v3, %s5024_s6  ;;  %v2482_v34 = vadd.f32 %v2480_v3, %v5814_v45 }
0x2e02   :  { %v2483_v6 = vmul.f32 0.5, %v2482_v34 }
0x2e04   :  { %4666 = vtanh.f32 %v2483_v6 }
0x2e0e   :  { %v4667_v7 = vpop.eup %4666 }
0x2e0f   :  { %v2485_v33 = vadd.f32 1.0, %v4667_v7 }
0x2e11   :  { %v2486_v9 = vmul.f32 0.5, %v2485_v33 }
0x2e13   :  { %v2497_v16 = vsub.f32 1.0, %v2486_v9  ;;  %v2505_v21 = vmul.f32 %v2503_v15, %v2486_v9 }
0x2e72   :  { %v2488_v10 = vpop.permute.xlu0 %2487 }
0x2e73   :  { %v2490_v11 = vmul.f32 %v2488_v10, %v2486_v9 }
0x2e75   :  { %2492 = vrot.lane.b32.xlu1 %v2490_v11, %s5024_s6 }
0x2ee7   :  { %v2493_v12 = vpop.permute.xlu1 %2492 }
0x2ee8   :  { %v2495_v13 = vadd.f32 %v2493_v12, %v5814_v45 }
0x2eea   :  { %4668 = vtanh.f32 %v2495_v13 }
0x2ef4   :  { %v4669_v14 = vpop.eup %4668 }
0x2ef5   :  { %2499 = vrot.lane.b32.xlu0 %v4669_v14, %s5025_s20 }
0x2f67   :  { %v2500_v19 = vpop.permute.xlu0 %2499 }
0x2f68   :  { %v2502_v23 = vmul.f32 %v2500_v19, %v2497_v16 }
0x2f6a   :  { %v2506_v24 = vadd.f32 %v2505_v21, %v2502_v23 }
0x2f6c   :  { %v2508_v25 = vrot.slane %v2506_v24, 2  ;;  %v2607_v60 = vrot.slane %v2506_v24, 6 }
0x2f6e   :  { %2509 = vrot.lane.b32.xlu1 %v2508_v25, %s5025_s20 }
0x2fe0   :  { %v2510_v26 = vpop.permute.xlu1 %2509 }
0x2fe1   :  { %4179 = vmatmul.mubr.msk.f32.vlgmr.msra.gmra.mrb[18].mxu0 %vm356_vm5, %v2510_v26 }
0x2fe2   :  { %4493 = vmatpush3.bf16.msra.mxu0 %v5725_v4  ;;  %4200 = vmatprep.mubr.msk.f32.mxu0 %vm5023_vm4, %v5021_v22 }
0x2fe3   :  { %4494 = vmatprep.subr.bf16.mxu0 %v5022_v29 }
0x2fe6   :  { %4496 = vmatpush3.bf16.msra.mxu0 %v5743_v46 }
0x2fe7   :  { %4503 = vmatprep.subr.bf16.mxu0 %v5022_v29 }
0x30b4   :  { %v2579_v31 = vpop.f32.mrb[18].mxu0 }
0x30b5   :  { %v2580_v35 = vadd.f32 %v5774_v5, %v2579_v31  ;;  %v4180_v38 = vpop.f32.mrb[19].mxu0 }
0x30b7   :  { %v2584_v40 = vrot.slane %v2580_v35, 4 }
0x30b9   :  { %2591 = vrot.lane.b32.xlu0 %v2584_v40, %s5024_s6  ;;  %v2586_v28 = vadd.f32 %v2584_v40, %v5814_v45 }
0x30bb   :  { %v2587_v42 = vmul.f32 0.5, %v2586_v28 }
0x30bd   :  { %4670 = vtanh.f32 %v2587_v42 }
0x30c7   :  { %v4671_v39 = vpop.eup %4670 }
0x30c8   :  { %v2589_v27 = vadd.f32 1.0, %v4671_v39 }
0x30ca   :  { %v2590_v32 = vmul.f32 0.5, %v2589_v27 }
0x30cc   :  { %v2601_v18 = vsub.f32 1.0, %v2590_v32  ;;  %v2609_v52 = vmul.f32 %v2607_v60, %v2590_v32 }
0x312b   :  { %v2592_v48 = vpop.permute.xlu0 %2591 }
0x312c   :  { %v2594_v49 = vmul.f32 %v2592_v48, %v2590_v32 }
0x312e   :  { %2596 = vrot.lane.b32.xlu1 %v2594_v49, %s5024_s6 }
0x31a0   :  { %v2597_v50 = vpop.permute.xlu1 %2596 }
0x31a1   :  { %v2599_v47 = vadd.f32 %v2597_v50, %v5814_v45 }
0x31a3   :  { %4672 = vtanh.f32 %v2599_v47 }
0x31ad   :  { %v4673_v51 = vpop.eup %4672 }
0x31ae   :  { %2603 = vrot.lane.b32.xlu0 %v4673_v51, %s5025_s20 }
0x3220   :  { %v2604_v2 = vpop.permute.xlu0 %2603 }
0x3221   :  { %v2606_v17 = vmul.f32 %v2604_v2, %v2601_v18 }
0x3223   :  { %v2610_v54 = vadd.f32 %v2609_v52, %v2606_v17  ;;  %v3127_v17 = vld [vmem:[%s6076_s14] sm:$0xff] }
0x3225   :  { %v2612_v55 = vrot.slane %v2610_v54, 4  ;;  %v2711_v3 = vrot.slane %v2610_v54, 6  ;;  %v3128_v54 = vld [vmem:[%s6076_s14 + $0x8] sm:$0xff] }
0x3227   :  { %2613 = vrot.lane.b32.xlu1 %v2612_v55, %s5025_s20  ;;  %v4515_v55 = vpack.c.bf16 %v3128_v54, %v3127_v17 }
0x3299   :  { %v2614_v56 = vpop.permute.xlu1 %2613 }
0x329a   :  { %4190 = vmatmul.mubr.msk.f32.vlgmr.msra.gmra.mrb[26].mxu1 %vm356_vm5, %v2614_v56 }
0x329b   :  { %4499 = vmatpush3.bf16.msra.mxu1 %v5725_v4  ;;  %4211 = vmatprep.mubr.msk.f32.mxu1 %vm5023_vm4, %v5021_v22 }
0x329c   :  { %4500 = vmatprep.subr.bf16.mxu1 %v5022_v29 }
0x329f   :  { %4502 = vmatpush3.bf16.msra.mxu1 %v5743_v46 }
0x32a0   :  { %4509 = vmatprep.subr.bf16.mxu1 %v5022_v29 }
0x336d   :  { %v2683_v57 = vpop.f32.mrb[26].mxu1 }
0x336e   :  { %v2684_v37 = vadd.f32 %v5774_v5, %v2683_v57  ;;  %v4191_v20 = vpop.f32.mrb[27].mxu1 }
0x3370   :  { %v2688_v58 = vrot.slane %v2684_v37, 2 }
0x3372   :  { %2695 = vrot.lane.b32.xlu0 %v2688_v58, %s5024_s6  ;;  %v2690_v59 = vadd.f32 %v2688_v58, %v5814_v45 }
0x3374   :  { %v2691_v61 = vmul.f32 0.5, %v2690_v59 }
0x3376   :  { %4674 = vtanh.f32 %v2691_v61 }
0x3380   :  { %v4675_v62 = vpop.eup %4674 }
0x3381   :  { %v2693_v8 = vadd.f32 1.0, %v4675_v62 }
0x3383   :  { %v2694_v63 = vmul.f32 0.5, %v2693_v8  ;;  %v3129_v8 = vld [vmem:[%s6076_s14 + $0x10] sm:$0xff] }
0x3385   :  { %v2705_v34 = vsub.f32 1.0, %v2694_v63  ;;  %v2713_v7 = vmul.f32 %v2711_v3, %v2694_v63  ;;  %v3133_v3 = vld [vmem:[%s6076_s14 + $0x30] sm:$0xff] }
0x33e4   :  { %v2696_v30 = vpop.permute.xlu0 %2695 }
0x33e5   :  { %v2698_v0 = vmul.f32 %v2696_v30, %v2694_v63  ;;  %v3130_v63 = vld [vmem:[%s6076_s14 + $0x18] sm:$0xff] }
0x33e6   :  { %v4519_v30 = vpack.c.bf16 %v3130_v63, %v3129_v8 }
0x33e7   :  { %2700 = vrot.lane.b32.xlu1 %v2698_v0, %s5024_s6 }
0x3459   :  { %v2701_v1 = vpop.permute.xlu1 %2700 }
0x345a   :  { %v2703_v36 = vadd.f32 %v2701_v1, %v5814_v45  ;;  %v3131_v1 = vld [vmem:[%s6076_s14 + $0x20] sm:$0xff] }
0x345c   :  { %4676 = vtanh.f32 %v2703_v36  ;;  %v3132_v36 = vld [vmem:[%s6076_s14 + $0x28] sm:$0xff] }
0x3466   :  { %v4677_v41 = vpop.eup %4676 }
0x3467   :  { %2707 = vrot.lane.b32.xlu0 %v4677_v41, %s5025_s20  ;;  %v4523_v41 = vpack.c.bf16 %v3132_v36, %v3131_v1 }
0x34d9   :  { %v2708_v6 = vpop.permute.xlu0 %2707 }
0x34da   :  { %v2710_v33 = vmul.f32 %v2708_v6, %v2705_v34  ;;  %v3134_v34 = vld [vmem:[%s6076_s14 + $0x38] sm:$0xff] }
0x34db   :  { %v4527_v6 = vpack.c.bf16 %v3134_v34, %v3133_v3  ;;  %v3328_v34 = vld [vmem:[%s6080_s18] sm:$0xff] }
0x34dc   :  { %v2714_v9 = vadd.f32 %v2713_v7, %v2710_v33 }
0x34de   :  { %v2716_v10 = vrot.slane %v2714_v9, 6 }
0x34e0   :  { %2717 = vrot.lane.b32.xlu1 %v2716_v10, %s5025_s20 }
0x3552   :  { %v2718_v11 = vpop.permute.xlu1 %2717 }
0x3553   :  { %4201 = vmatmul.mubr.msk.f32.vlgmr.msra.gmra.mrb[20].mxu0 %vm356_vm5, %v2718_v11 }
0x3554   :  { %4505 = vmatpush3.bf16.msra.mxu0 %v5725_v4  ;;  %4222 = vmatprep.mubr.msk.f32.mxu0 %vm5023_vm4, %v5021_v22 }
0x3555   :  { %4506 = vmatprep.subr.bf16.mxu0 %v5022_v29 }
0x3558   :  { %4508 = vmatpush3.bf16.msra.mxu0 %v5743_v46 }
0x3559   :  { %4516 = vmatprep.subr.bf16.mxu0 %v4515_v55 }
0x3626   :  { %v2787_v45 = vpop.f32.mrb[20].mxu0 }
0x3627   :  { %v2788_v12 = vadd.f32 %v5774_v5, %v2787_v45  ;;  %v4202_v13 = vpop.f32.mrb[21].mxu0 }
0x3629   :  { %2797 = vrot.lane.b32.xlu0 %v2788_v12, %s5024_s6  ;;  %v2791_v14 = vadd.f32 %v2788_v12, %v5812_v44 }
0x362b   :  { %v2792_v15 = vmul.f32 0.5, %v2791_v14 }
0x362d   :  { %4678 = vtanh.f32 %v2792_v15 }
0x3637   :  { %v4679_v16 = vpop.eup %4678 }
0x3638   :  { %v2794_v19 = vadd.f32 1.0, %v4679_v16 }
0x363a   :  { %v2795_v21 = vmul.f32 0.5, %v2794_v19 }
0x363c   :  { %v2807_v35 = vsub.f32 1.0, %v2795_v21  ;;  %v2814_v40 = vmul.f32 %v2795_v21, %v2716_v10 }
0x369b   :  { %v2798_v23 = vpop.permute.xlu0 %2797 }
0x369c   :  { %v2800_v24 = vmul.f32 %v2798_v23, %v2795_v21 }
0x369e   :  { %2802 = vrot.lane.b32.xlu1 %v2800_v24, %s5024_s6 }
0x3710   :  { %v2803_v25 = vpop.permute.xlu1 %2802 }
0x3711   :  { %v2805_v26 = vadd.f32 %v2803_v25, %v5812_v44 }
0x3713   :  { %4680 = vtanh.f32 %v2805_v26 }
0x371d   :  { %v4681_v31 = vpop.eup %4680 }
0x371e   :  { %2809 = vrot.lane.b32.xlu0 %v4681_v31, %s5025_s20 }
0x3790   :  { %v2810_v38 = vpop.permute.xlu0 %2809 }
0x3791   :  { %v2812_v28 = vmul.f32 %v2810_v38, %v2807_v35 }
0x3793   :  { %v2815_v42 = vadd.f32 %v2814_v40, %v2812_v28  ;;  %v3136_v28 = vld [vmem:[#allocation10] sm:$0xff] }
0x3795   :  { %2817 = vrot.lane.b32.xlu1 %v2815_v42, %s5025_s20  ;;  %v2915_v57 = vrot.slane %v2815_v42, 6  ;;  %v3137_v42 = vld [vmem:[#allocation10 + $0x8] sm:$0xff] }
0x3807   :  { %v2818_v39 = vpop.permute.xlu1 %2817 }
0x3808   :  { %4212 = vmatmul.mubr.msk.f32.vlgmr.msra.gmra.mrb[28].mxu1 %vm356_vm5, %v2818_v39  ;;  %v4532_v39 = vpack.c.bf16 %v3137_v42, %v3136_v28 }
0x3809   :  { %4511 = vmatpush3.bf16.msra.mxu1 %v5725_v4  ;;  %4233 = vmatprep.mubr.msk.f32.mxu1 %vm5023_vm4, %v5021_v22 }
0x380a   :  { %4512 = vmatprep.subr.bf16.mxu1 %v5022_v29 }
0x380d   :  { %4514 = vmatpush3.bf16.msra.mxu1 %v5743_v46 }
0x380e   :  { %4531 = vmatprep.subr.bf16.mxu1 %v5022_v29 }
0x38db   :  { %v2887_v27 = vpop.f32.mrb[28].mxu1 }
0x38dc   :  { %v2888_v32 = vadd.f32 %v5774_v5, %v2887_v27  ;;  %v4213_v48 = vpop.f32.mrb[29].mxu1  ;;  %v3138_v27 = vld [vmem:[#allocation10 + $0x10] sm:$0xff] }
0x38de   :  { %v2892_v49 = vrot.slane %v2888_v32, 6  ;;  %v3139_v32 = vld [vmem:[#allocation10 + $0x18] sm:$0xff] }
0x38e0   :  { %2899 = vrot.lane.b32.xlu0 %v2892_v49, %s5024_s6  ;;  %v2894_v50 = vadd.f32 %v2892_v49, %v5812_v44  ;;  %v4535_v49 = vpack.c.bf16 %v3139_v32, %v3138_v27 }
0x38e2   :  { %v2895_v47 = vmul.f32 0.5, %v2894_v50 }
0x38e4   :  { %4682 = vtanh.f32 %v2895_v47 }
0x38ee   :  { %v4683_v4 = vpop.eup %4682 }
0x38ef   :  { %v2897_v51 = vadd.f32 1.0, %v4683_v4 }
0x38f1   :  { %v2898_v60 = vmul.f32 0.5, %v2897_v51 }
0x38f3   :  { %v2909_v37 = vsub.f32 1.0, %v2898_v60  ;;  %v2917_v58 = vmul.f32 %v2915_v57, %v2898_v60 }
0x3952   :  { %v2900_v18 = vpop.permute.xlu0 %2899 }
0x3953   :  { %v2902_v2 = vmul.f32 %v2900_v18, %v2898_v60  ;;  %v3707_v60 = vld [vmem:[%s6079_s17] ss:$0 sm:$0xff] }
0x3955   :  { %2904 = vrot.lane.b32.xlu1 %v2902_v2, %s5024_s6 }
0x39c7   :  { %v2905_v46 = vpop.permute.xlu1 %2904 }
0x39c8   :  { %v2907_v52 = vadd.f32 %v2905_v46, %v5812_v44 }
0x39ca   :  { %4684 = vtanh.f32 %v2907_v52 }
0x39d4   :  { %v4685_v56 = vpop.eup %4684 }
0x39d5   :  { %2911 = vrot.lane.b32.xlu0 %v4685_v56, %s5025_s20 }
0x3a47   :  { %v2912_v20 = vpop.permute.xlu0 %2911 }
0x3a48   :  { %v2914_v59 = vmul.f32 %v2912_v20, %v2909_v37 }
0x3a4a   :  { %v2918_v61 = vadd.f32 %v2917_v58, %v2914_v59 }
0x3a4c   :  { %v2920_v62 = vrot.slane %v2918_v61, 2  ;;  %v3019_v24 = vrot.slane %v2918_v61, 6 }
0x3a4e   :  { %2921 = vrot.lane.b32.xlu1 %v2920_v62, %s5025_s20 }
0x3ac0   :  { %v2922_v0 = vpop.permute.xlu1 %2921 }
0x3ac1   :  { %4223 = vmatmul.mubr.msk.f32.vlgmr.msra.gmra.mrb[22].mxu0 %vm356_vm5, %v2922_v0 }
0x3ac2   :  { %4518 = vmatpush3.bf16.msra.mxu0 %v4515_v55  ;;  %4252 = vmatprep.mubr.msk.f32.mxu0 %vm2222_vm8, %v5794_v53 }
0x3ac3   :  { %4520 = vmatprep.subr.bf16.mxu0 %v4519_v30 }
0x3ac6   :  { %4522 = vmatpush3.bf16.msra.mxu0 %v4519_v30 }
0x3ac7   :  { %4524 = vmatprep.subr.bf16.mxu0 %v4523_v41 }
0x3aca   :  { %4526 = vmatpush3.bf16.msra.mxu0 %v4523_v41 }
0x3acb   :  { %4528 = vmatprep.subr.bf16.mxu0 %v4527_v6 }
0x3ace   :  { %4530 = vmatpush3.bf16.msra.mxu0 %v4527_v6  ;;  %v3329_v6 = vld [vmem:[%s6080_s18 + $0x8] sm:$0xff] }
0x3acf   :  { %4549 = vmatprep.subr.bf16.mxu0 %v5022_v29 }
0x3ad1   :  { %4253 = vmatmul.mubr.msk.f32.vlgmr.msra.gmra.mrb[24].mxu0 %vm2222_vm8, %v5797_v43 }
0x3ad2   :  { %4317 = vmatprep.mubr.msk.f32.mxu0 %vm5023_vm4, %v5021_v22 }
0x3b94   :  { %v2991_v53 = vpop.f32.mrb[22].mxu0 }
0x3b95   :  { %v2992_v7 = vadd.f32 %v5774_v5, %v2991_v53  ;;  %v4224_v33 = vpop.f32.mrb[23].mxu0  ;;  %v3330_v53 = vld [vmem:[%s6080_s18 + $0x10] sm:$0xff] }
0x3b97   :  { %v2996_v9 = vrot.slane %v2992_v7, 4  ;;  %v4538_v7 = vpack.c.bf16 %v3329_v6, %v3328_v34 }
0x3b99   :  { %3003 = vrot.lane.b32.xlu0 %v2996_v9, %s5024_s6  ;;  %v2998_v45 = vadd.f32 %v2996_v9, %v5812_v44 }
0x3b9b   :  { %v2999_v12 = vmul.f32 0.5, %v2998_v45 }
0x3b9d   :  { %4686 = vtanh.f32 %v2999_v12 }
0x3ba4   :  { %v4254_v10 = vpop.f32.mrb[24].mxu0 }
0x3ba5   :  { %v3213_v11 = vpop.f32.mrb[25].mxu0 }
0x3ba6   :  { %v3333_v11 = vld [vmem:[%s6080_s18 + $0x28] sm:$0xff] }
0x3ba7   :  { %v4687_v13 = vpop.eup %4686 }
0x3ba8   :  { %v3001_v14 = vadd.f32 1.0, %v4687_v13  ;;  %v3334_v13 = vld [vmem:[%s6080_s18 + $0x30] sm:$0xff] }
0x3baa   :  { %v3002_v15 = vmul.f32 0.5, %v3001_v14  ;;  %v3335_v14 = vld [vmem:[%s6080_s18 + $0x38] sm:$0xff] }
0x3bac   :  { %v3013_v25 = vsub.f32 1.0, %v3002_v15  ;;  %v3021_v31 = vmul.f32 %v3019_v24, %v3002_v15 }
0x3c0b   :  { %v3004_v43 = vpop.permute.xlu0 %3003 }
0x3c0c   :  { %v3006_v16 = vmul.f32 %v3004_v43, %v3002_v15  ;;  %v4547_v15 = vpack.c.bf16 %v3335_v14, %v3334_v13  ;;  %v3440_v43 = vld [vmem:[%s6084_s22] sm:$0xff] }
0x3c0e   :  { %3008 = vrot.lane.b32.xlu1 %v3006_v16, %s5024_s6  ;;  %v3441_v16 = vld [vmem:[%s6084_s22 + $0x8] sm:$0xff] }
0x3c80   :  { %v3009_v19 = vpop.permute.xlu1 %3008 }
0x3c81   :  { %v3011_v21 = vadd.f32 %v3009_v19, %v5812_v44  ;;  %v4550_v19 = vpack.c.bf16 %v3441_v16, %v3440_v43 }
0x3c83   :  { %4688 = vtanh.f32 %v3011_v21  ;;  %4551 = vmatpush3.bf16.msra.mxu0 %v4550_v19 }
0x3c84   :  { %4552 = vmatprep.subr.bf16.mxu0 %v5022_v29 }
0x3c8d   :  { %v4689_v23 = vpop.eup %4688 }
0x3c8e   :  { %3015 = vrot.lane.b32.xlu0 %v4689_v23, %s5025_s20 }
0x3d00   :  { %v3016_v26 = vpop.permute.xlu0 %3015 }
0x3d01   :  { %v3018_v35 = vmul.f32 %v3016_v26, %v3013_v25 }
0x3d03   :  { %v5928_v38 = vadd.f32 %v3021_v31, %v3018_v35 }
0x3d05   :  { %v3024_v40 = vrot.slane %v5928_v38, 4  ;;  %v3123_v21 = vrot.slane %v5928_v38, 6  ;;  %v3442_v38 = vld [vmem:[%s6084_s22 + $0x10] sm:$0xff] }
0x3d07   :  { %3025 = vrot.lane.b32.xlu1 %v3024_v40, %s5025_s20 }
0x3d79   :  { %v3026_v48 = vpop.permute.xlu1 %3025 }
0x3d7a   :  { %4234 = vmatmul.mubr.msk.f32.vlgmr.msra.gmra.mrb[30].mxu1 %vm356_vm5, %v3026_v48 }
0x3d7b   :  { %4533 = vmatpush3.bf16.msra.mxu1 %v4532_v39  ;;  %4263 = vmatprep.mubr.msk.f32.mxu1 %vm5023_vm4, %v5021_v22 }
0x3d7c   :  { %4534 = vmatprep.subr.bf16.mxu1 %v5022_v29 }
0x3d7f   :  { %4536 = vmatpush3.bf16.msra.mxu1 %v4535_v49  ;;  %v3443_v49 = vld [vmem:[%s6084_s22 + $0x18] sm:$0xff] }
0x3d80   :  { %4537 = vmatprep.subr.bf16.mxu1 %v5022_v29 }
0x3d82   :  { %4264 = vmatmul.mubr.f32.vlgmr.msra.gmra.mrb[32].mxu1 %v5021_v22 }
0x3d83   :  { %4282 = vmatprep.mubr.msk.f32.mxu1 %vm5023_vm4, %v5021_v22  ;;  %4539 = vmatpush3.bf16.msra.mxu1 %v4538_v7  ;;  %v3557_v7 = vld [vmem:[%s6088_s26 + $0x8] sm:$0xff] }
0x3d84   :  { %4540 = vmatprep.subr.bf16.mxu1 %v5022_v29 }
0x3e4d   :  { %v3095_v50 = vpop.f32.mrb[30].mxu1 }
0x3e4e   :  { %v3096_v47 = vadd.f32 %v5774_v5, %v3095_v50  ;;  %v4235_v4 = vpop.f32.mrb[31].mxu1  ;;  %v3704_v5 = vld [vmem:[%s6077_s15] ss:$0 sm:$0xff]  ;;  %v4553_v50 = vpack.c.bf16 %v3443_v49, %v3442_v38 }
0x3e4f   :  { %v3218_v55 = vadd.f32 %v4254_v10, %v3704_v5  ;;  %v3332_v10 = vld [vmem:[%s6080_s18 + $0x20] sm:$0xff]  ;;  %v3451_v5 = vld [vmem:[%s6084_s22 + $0x58] sm:$0xff] }
0x3e50   :  { %v3100_v51 = vrot.slane %v3096_v47, 2  ;;  %v4544_v45 = vpack.c.bf16 %v3333_v11, %v3332_v10  ;;  %4554 = vmatpush3.bf16.msra.mxu0 %v4553_v50  ;;  %v3444_v47 = vld [vmem:[%s6084_s22 + $0x20] sm:$0xff]  ;;  %v3714_v10 = vld [vmem:[#allocation17] ss:$0 sm:$0xff] }
0x3e51   :  { %4555 = vmatprep.subr.bf16.mxu0 %v5022_v29 }
0x3e52   :  { %3107 = vrot.lane.b32.xlu0 %v3100_v51, %s5024_s6  ;;  %v3102_v17 = vadd.f32 %v3100_v51, %v5812_v44  ;;  %v3446_v51 = vld [vmem:[%s6084_s22 + $0x30] sm:$0xff] }
0x3e54   :  { %v3103_v54 = vmul.f32 0.5, %v3102_v17  ;;  %v3450_v17 = vld [vmem:[%s6084_s22 + $0x50] sm:$0xff] }
0x3e55   :  { %v3293_v18 = vpop.f32.mrb[32].mxu1 }
0x3e56   :  { %v3294_v2 = vadd.f32 %v3707_v60, %v3293_v18  ;;  %v4265_v46 = vpop.f32.mrb[33].mxu1  ;;  %4690 = vtanh.f32 %v3103_v54  ;;  %v3447_v60 = vld [vmem:[%s6084_s22 + $0x38] sm:$0xff]  ;;  %v4565_v54 = vpack.c.bf16 %v3451_v5, %v3450_v17 }
0x3e57   :  { %v4559_v18 = vpack.c.bf16 %v3447_v60, %v3446_v51  ;;  %v3449_v46 = vld [vmem:[%s6084_s22 + $0x48] sm:$0xff] }
0x3e58   :  { %v3298_v52 = vrot.slane %v3294_v2, 2  ;;  %v3448_v2 = vld [vmem:[%s6084_s22 + $0x40] sm:$0xff] }
0x3e5a   :  { %3305 = vrot.lane.b32.xlu1 %v3298_v52, %s5024_s6  ;;  %v3300_v56 = vadd.f32 %v3298_v52, %v3218_v55  ;;  %v4562_v52 = vpack.c.bf16 %v3449_v46, %v3448_v2 }
0x3e5c   :  { %v3301_v57 = vmul.f32 0.5, %v3300_v56  ;;  %v3453_v56 = vld [vmem:[%s6084_s22 + $0x68] sm:$0xff] }
0x3e5e   :  { %4692 = vtanh.f32 %v3301_v57 }
0x3e60   :  { %v4691_v37 = vpop.eup %4690 }
0x3e61   :  { %v3105_v20 = vadd.f32 1.0, %v4691_v37  ;;  %v3454_v37 = vld [vmem:[%s6084_s22 + $0x70] sm:$0xff] }
0x3e63   :  { %v3106_v58 = vmul.f32 0.5, %v3105_v20  ;;  %v3455_v20 = vld [vmem:[%s6084_s22 + $0x78] sm:$0xff] }
0x3e65   :  { %v3117_v23 = vsub.f32 1.0, %v3106_v58  ;;  %v3125_v25 = vmul.f32 %v3123_v21, %v3106_v58 }
0x3e68   :  { %v4693_v59 = vpop.eup %4692 }
0x3e69   :  { %v3303_v8 = vadd.f32 1.0, %v4693_v59  ;;  %v3708_v59 = vld [vmem:[#allocation11] ss:$0 sm:$0xff] }
0x3e6b   :  { %v3304_v63 = vmul.f32 0.5, %v3303_v8 }
0x3e6d   :  { %v3315_v40 = vsub.f32 1.0, %v3304_v63  ;;  %v3321_v42 = vmul.f32 0.0, %v3304_v63 }
0x3ec4   :  { %v3108_v61 = vpop.permute.xlu0 %3107 }
0x3ec5   :  { %v3110_v62 = vmul.f32 %v3108_v61, %v3106_v58  ;;  %v4571_v58 = vpack.c.bf16 %v3455_v20, %v3454_v37 }
0x3ec7   :  { %3112 = vrot.lane.b32.xlu0 %v3110_v62, %s5024_s6  ;;  %v3710_v62 = vld [vmem:[#allocation13] ss:$0 sm:$0xff] }
0x3ecc   :  { %v3306_v30 = vpop.permute.xlu1 %3305 }
0x3ecd   :  { %v3308_v0 = vmul.f32 %v3306_v30, %v3304_v63  ;;  %v3711_v30 = vld [vmem:[#allocation14] ss:$0 sm:$0xff] }
0x3ecf   :  { %3310 = vrot.lane.b32.xlu1 %v3308_v0, %s5024_s6 }
0x3f39   :  { %v3113_v1 = vpop.permute.xlu0 %3112 }
0x3f3a   :  { %v3115_v36 = vadd.f32 %v3113_v1, %v5812_v44  ;;  %v3331_v44 = vld [vmem:[%s6080_s18 + $0x18] sm:$0xff] }
0x3f3b   :  { %v4541_v9 = vpack.c.bf16 %v3331_v44, %v3330_v53 }
0x3f3c   :  { %4694 = vtanh.f32 %v3115_v36 }
0x3f3d   :  { %4542 = vmatpush3.bf16.msra.mxu1 %v4541_v9 }
0x3f3e   :  { %4543 = vmatprep.subr.bf16.mxu1 %v5022_v29 }
0x3f41   :  { %v3311_v41 = vpop.permute.xlu1 %3310  ;;  %4545 = vmatpush3.bf16.msra.mxu1 %v4544_v45 }
0x3f42   :  { %v3313_v3 = vadd.f32 %v3311_v41, %v3218_v55  ;;  %4546 = vmatprep.subr.bf16.mxu1 %v5022_v29  ;;  %v3452_v55 = vld [vmem:[%s6084_s22 + $0x60] sm:$0xff] }
0x3f43   :  { %v4568_v57 = vpack.c.bf16 %v3453_v56, %v3452_v55 }
0x3f44   :  { %4696 = vtanh.f32 %v3313_v3 }
0x3f45   :  { %4548 = vmatpush3.bf16.msra.mxu1 %v4547_v15 }
0x3f46   :  { %v4695_v33 = vpop.eup %4694  ;;  %4573 = vmatprep.subr.bf16.mxu1 %v5022_v29 }
0x3f47   :  { %3119 = vrot.lane.b32.xlu0 %v4695_v33, %s5025_s20  ;;  %v3713_v33 = vld [vmem:[#allocation16] ss:$0 sm:$0xff] }
0x3f4e   :  { %v4697_v12 = vpop.eup %4696 }
0x3f4f   :  { %3317 = vrot.lane.b32.xlu1 %v4697_v12, %s5025_s20  ;;  %v3715_v12 = vld [vmem:[#allocation19] ss:$0 sm:$0xff] }
0x3fb9   :  { %v3120_v24 = vpop.permute.xlu0 %3119 }
0x3fba   :  { %v3122_v26 = vmul.f32 %v3120_v24, %v3117_v23  ;;  %v3717_v24 = vld [vmem:[#allocation20] ss:$0 sm:$0xff] }
0x3fbc   :  { %v3126_v31 = vadd.f32 %v3125_v25, %v3122_v26 }
0x3fbe   :  { %3324 = vrot.lane.b32.xlu0 %v3126_v31, %s5025_s20 }
0x3fc1   :  { %v3318_v35 = vpop.permute.xlu1 %3317 }
0x3fc2   :  { %v3320_v28 = vmul.f32 %v3318_v35, %v3315_v40 }
0x3fc4   :  { %v3322_v39 = vadd.f32 %v3321_v42, %v3320_v28 }
0x4030   :  { %v3325_v27 = vpop.permute.xlu0 %3324 }
0x4031   :  { %v3327_v32 = vsel %vm356_vm5, %v3325_v27, %v3322_v39 }
0x4032   :  { %v3344_v48 = vrot.slane %v3327_v32, 6 }
0x4034   :  { %4283 = vmatmul.mubr.msk.f32.vlgmr.msra.gmra.mrb[34].mxu1 %vm2222_vm8, %v3344_v48 }
0x4035   :  { %4324 = vmatprep.mubr.msk.f32.mxu1 %vm5023_vm4, %v5021_v22  ;;  %v3445_v22 = vld [vmem:[%s6084_s22 + $0x28] sm:$0xff] }
0x4036   :  { %v4556_v4 = vpack.c.bf16 %v3445_v22, %v3444_v47 }
0x4038   :  { %4557 = vmatpush3.bf16.msra.mxu0 %v4556_v4 }
0x4039   :  { %4558 = vmatprep.subr.bf16.mxu0 %v5022_v29 }
0x403c   :  { %4560 = vmatpush3.bf16.msra.mxu0 %v4559_v18 }
0x403d   :  { %4561 = vmatprep.subr.bf16.mxu0 %v5022_v29 }
0x4040   :  { %4563 = vmatpush3.bf16.msra.mxu0 %v4562_v52 }
0x4041   :  { %4564 = vmatprep.subr.bf16.mxu0 %v5022_v29 }
0x4044   :  { %4566 = vmatpush3.bf16.msra.mxu0 %v4565_v54 }
0x4045   :  { %4567 = vmatprep.subr.bf16.mxu0 %v5022_v29 }
0x4048   :  { %4569 = vmatpush3.bf16.msra.mxu0 %v4568_v57 }
0x4049   :  { %4570 = vmatprep.subr.bf16.mxu0 %v5022_v29  ;;  %v3556_v29 = vld [vmem:[%s6088_s26] sm:$0xff]  ;;  %s5026_s26 = smov [#allocation22]  }
0x404a   :  { %v4574_v44 = vpack.c.bf16 %v3557_v7, %v3556_v29  ;;  %s3651_s20 = sshll.u32 %s5026_s26, 4  ;;  %s3652_s20 = int_to_ptr.vmem [resolvable:$true] %s3651_s20 }
0x404b   :  { %s4968_s14 = scalar_lea.vmem %s3652_s20, 32  ;;  %p4973_p13 = scmp.lt.s32.totalorder %s3652_s20, %s3652_s20 }
0x404c   :  { %4572 = vmatpush3.bf16.msra.mxu0 %v4571_v58  ;;  %4575 = vmatpush3.bf16.msra.mxu1 %v4574_v44  ;;  %p4969_p12 = scmp.ne.s32.totalorder %s3652_s20, %s4968_s14  ;;  %p4974_p0 = scmp.lt.s32.totalorder %s4968_s14, %s4968_s14 }
0x404e   :  { %p4975_p1 = por %p4974_p0, %p4973_p13 }
0x4050   :  { %p4976_p2 = pnand %p4975_p1, %p4969_p12 }
0x4107   :  { %v3413_v61 = vpop.f32.mrb[34].mxu1 }
0x4108   :  { %v3414_v8 = vadd.f32 %v3708_v59, %v3413_v61  ;;  %v4284_v63 = vpop.f32.mrb[35].mxu1 }
0x410a   :  { %v3424_v0 = vmul.f32 %v3710_v62, %v3414_v8 }
0x410c   :  { %v3432_v1 = vadd.f32 %v3711_v30, %v3424_v0 }
0x410e   :  { %v3434_v36 = vmul.f32 1.442695, %v3432_v1  ;;  %vm3433_vm9 = vcmp.gt.f32.partialorder %v3432_v1, 0.0 }
0x4110   :  { %4698 = vpow2.f32 %v3434_v36 }
0x411a   :  { %v4699_v41 = vpop.eup %4698 }
0x411b   :  { %v3712_v3 = vadd.f32 -1.0, %v4699_v41 }
0x411d   :  { %v3437_v34 = vmul.f32 1.6732632, %v3712_v3 }
0x411f   :  { %v3438_v6 = vsel %vm3433_vm9, %v3432_v1, %v3437_v34 }
0x4120   :  { %v3439_v53 = vmul.f32 1.050701, %v3438_v6 }
0x4122   :  { %4318 = vmatmul.mubr.f32.vlgmr.msra.gmra.mrb[26].mxu0 %v3439_v53 }
0x41f5   :  { %v3529_v9 = vpop.f32.mrb[26].mxu0 }
0x41f6   :  { %v3530_v11 = vadd.f32 %v3713_v33, %v3529_v9  ;;  %v4319_v45 = vpop.f32.mrb[27].mxu0 }
0x41f8   :  { %v3540_v13 = vmul.f32 %v3714_v10, %v3530_v11 }
0x41fa   :  { %v3548_v14 = vadd.f32 %v3715_v12, %v3540_v13 }
0x41fc   :  { %v3550_v15 = vmul.f32 1.442695, %v3548_v14  ;;  %vm3549_vm10 = vcmp.gt.f32.partialorder %v3548_v14, 0.0 }
0x41fe   :  { %4700 = vpow2.f32 %v3550_v15 }
0x4208   :  { %v4701_v43 = vpop.eup %4700 }
0x4209   :  { %v3716_v16 = vadd.f32 -1.0, %v4701_v43 }
0x420b   :  { %v3553_v19 = vmul.f32 1.6732632, %v3716_v16 }
0x420d   :  { %v3554_v21 = vsel %vm3549_vm10, %v3548_v14, %v3553_v19 }
0x420e   :  { %v3555_v23 = vmul.f32 1.050701, %v3554_v21 }
0x4210   :  { %4325 = vmatmul.mubr.msk.f32.vlgmr.msra.gmra.mrb[36].mxu1 %vm3565_vm11, %v3555_v23 }
0x42e3   :  { %v3635_v25 = vpop.f32.mrb[36].mxu1 }
0x42e4   :  { %v3636_v26 = vadd.f32 %v3717_v24, %v3635_v25  ;;  %v4326_v31 = vpop.f32.mrb[37].mxu1 }
0x42e6   :  { %v3639_v35 = vmul.f32 0.5, %v3636_v26 }
0x42e8   :  { %4702 = vtanh.f32 %v3639_v35 }
0x42f2   :  { %v4703_v40 = vpop.eup %4702 }
0x42f3   :  { %v3641_v28 = vadd.f32 1.0, %v4703_v40 }
0x42f5   :  { %v3642_v42 = vmul.f32 0.5, %v3641_v28 }
0x42f7   :  { %3644 = vst.msk [vmem:[#allocation22] sm:$0x3] %vm3643_vm12, %v3642_v42 }
0x42f8   :  { %4979 = shalt.err (!%p4976_p2)
}
0x42f9   :  { %s4980_s16 = scalar_lea.hbm %s6090_s28, 32 }
0x42fa   :  { %p4981_p3 = scmp.ne.s32.totalorder %s6090_s28, %s4980_s16  ;;  %p4984_p4 = scmp.lt.u32.totalorder %s4980_s16, %s6090_s28 }
0x42fc   :  { %p4986_p5 = pnand %p4984_p4, %p4981_p3 }
0x42fe   :  { %4989 = shalt.err (!%p4986_p5)
}
0x42ff   :  { %3654 = dma.vmem_to_hbm [thread:$0]  %s3652_s20, 32, %s6090_s28, [#allocation4]  }
0x4300   :  { %5004 = dma.done.wait [#allocation4], 32  }
0x4301   :  { %5005 = vsyncadd [#allocation4], 4294967264 }
0x4302   :  { %3658 = vsyncpa [#allocation3], 1 }
0x4303   :  { %3659 = vsyncpa [#allocation6], 1 }
0x4304   :  { %3660 = vsyncpa [#allocation9], 1 }
0x4305   :  { %3661 = vsyncpa [#allocation12], 1 }
0x4306   :  { %3662 = vsyncpa [#allocation15], 1 }
0x4307   :  { %3663 = vsyncpa [#allocation18], 1 }
0x4308   :  { %3664 = vsyncpa [#allocation21], 1 }
0x4309   :  { %3665 = vsyncpa [#allocation4], 1 }

</bundles_post_ra>
